<compile_context>
chip_gen: v6e
topology: v6e:2x2x1
jax: 0.10.0
libtpu: 0.0.40
codegen_flags: <defaults>
</compile_context>

<pallas_src>
import math
import functools

import jax
import jax.numpy as jnp
from jax.experimental import pallas as pl
from jax.experimental.pallas import tpu as pltpu

# f32 keeps the kernel bit-comparable (~1e-3) to the XLA reference on all TPU
# generations.  On v6e/v7x, jnp.bfloat16 here halves MXU input traffic.
MXU_INPUT_DTYPE = jnp.float32


def _round_up(x, m):
    return (x + m - 1) // m * m


def _fast_mod(a, m):
    if (m & (m - 1)) == 0:                      # power-of-two fast path
        return jnp.bitwise_and(a, m - 1)
    return a % m


# ---------------------------------------------------------------------------
# Fused MODEL forward (head + blocks + tail + skip) as a single Pallas kernel
# ---------------------------------------------------------------------------
def _build_fused_kernel(H, W, LB, layer_meta, num_blocks, has_skip):
    """layer_meta: tuple of (K, cin_eff, cout) in order head, (c1,c2)*nb, tail[, skip].

    Activation layout inside the kernel: (channels, lanes) with lanes = flattened
    (image, h, w); LB lanes per grid step (a whole number of images).
    """
    HW = H * W

    def kernel(x_ref, w_ref, b_ref, out_ref, col_ref):
        # ---- hoisted SAME-padding edge masks (shared by every conv layer) ----
        lane = jax.lax.broadcasted_iota(jnp.int32, (1, LB), 1)
        rim = _fast_mod(lane, HW)               # position within its image
        ww = _fast_mod(rim, W)                  # column within its image
        pmax = 2 if has_skip else 1             # 5x5 skip needs |shift| up to 2
        masks = {}
        for dh in range(-pmax, pmax + 1):
            if dh > 0:
                hm = rim < (H - dh) * W
            elif dh < 0:
                hm = rim >= (-dh) * W
            else:
                hm = None
            for dw in range(-pmax, pmax + 1):
                if dw > 0:
                    wm = ww < (W - dw)
                elif dw < 0:
                    wm = ww >= (-dw)
                else:
                    wm = None
                if hm is not None and wm is not None:
                    m = jnp.logical_and(hm, wm)
                elif hm is not None:
                    m = hm
                else:
                    m = wm
                masks[(dh, dw)] = m             # None for the centre tap

        def conv(v, layer_idx):
            """v: (cin_eff, LB) f32 -> (cout, LB) f32, one matmul per conv."""
            K, cin, cout = layer_meta[layer_idx]
            p = K // 2
            tap = 0
            for dh in range(-p, p + 1):
                for dw in range(-p, p + 1):
                    delta = dh * W + dw         # out[:, r] = v[:, r + delta]
                    vs = v if delta == 0 else pltpu.roll(v, (-delta) % LB, axis=1)
                    m = masks[(dh, dw)]
                    if m is not None:
                        vs = jnp.where(m, vs, 0.0)
                    col_ref[pl.ds(tap * cin, cin), :] = vs
                    tap += 1
            kkc = K * K * cin
            w = w_ref[layer_idx, pl.ds(0, cout), pl.ds(0, kkc)]
            col = col_ref[pl.ds(0, kkc), :]
            if MXU_INPUT_DTYPE != jnp.float32:
                w = w.astype(MXU_INPUT_DTYPE)
                col = col.astype(MXU_INPUT_DTYPE)
            y = jnp.dot(w, col, preferred_element_type=jnp.float32)
            return y + b_ref[layer_idx, pl.ds(0, cout)]     # (cout,1) lane-broadcast

        x = x_ref[...]                           # (cin_pad, LB)

        li = 0
        h = conv(x, li); li += 1                 # head conv
        for _ in range(num_blocks):
            t = jnp.maximum(conv(h, li), 0.0); li += 1      # conv + ReLU
            h = conv(t, li) + h; li += 1                    # conv + residual add
        body = conv(h, li); li += 1              # tail conv
        if has_skip:
            skip = conv(x, li); li += 1          # 5x5 skip conv
        else:
            skip = x[pl.ds(0, out_ref.shape[0]), :]

        out_ref[...] = (body + skip).astype(out_ref.dtype)

    return kernel


def _choose_grid_steps(N):
    # 2 steps keep both v7x TensorCores busy ("parallel"); on single-TC v5e/v6e
    # the extra step is only ~0.35us while lanes stay wide.
    return 2 if (N >= 2 and N % 2 == 0) else 1


def fused_model_pallas(x_cf, w_packed, b_packed, *, H, W, N, num_blocks,
                       has_skip, layer_meta, cout_total):
    """x_cf: (cin_pad, N*H*W) f32, image-mean already subtracted, channel-first,
    batch folded into the lane axis.  Returns body(x)+skip(x): (cout_total, N*H*W).
    """
    cin_pad, total = x_cf.shape
    HW = H * W
    assert total == N * HW
    G = _choose_grid_steps(N)
    LB = (N // G) * HW
    # TODO(synk): pad the spatial axis in the wrapper if H*W per chunk is ever
    # not a multiple of 128 (keeps the final store unmasked / lane-dense).
    assert LB % 128 == 0, (LB,)

    L, cout_max, kkc_pad = w_packed.shape

    kernel = _build_fused_kernel(H, W, LB, layer_meta, num_blocks, has_skip)

    flops = 2 * total * sum(k * k * cin * cout for (k, cin, cout) in layer_meta)
    bytes_accessed = 4 * (x_cf.size + w_packed.size + b_packed.size
                          + cout_total * total)

    return pl.pallas_call(
        kernel,
        out_shape=jax.ShapeDtypeStruct((cout_total, total), jnp.float32),
        grid_spec=pltpu.PrefetchScalarGridSpec(
            num_scalar_prefetch=0,
            grid=(G,),
            in_specs=[
                pl.BlockSpec((cin_pad, LB), lambda n: (0, n)),
                pl.BlockSpec((L, cout_max, kkc_pad), lambda n: (0, 0, 0)),
                pl.BlockSpec((L, cout_max, 1), lambda n: (0, 0, 0)),
            ],
            out_specs=pl.BlockSpec((cout_total, LB), lambda n: (0, n)),
            scratch_shapes=[pltpu.VMEM((kkc_pad, LB), jnp.float32)],
        ),
        compiler_params=pltpu.CompilerParams(
            dimension_semantics=("parallel",)),
        cost_estimate=pl.CostEstimate(flops=int(flops), transcendentals=0,
                                      bytes_accessed=int(bytes_accessed)),
    )(x_cf, w_packed, b_packed)


# ---------------------------------------------------------------------------
# Parameter construction (deterministic, weight-norm parameterization)
# ---------------------------------------------------------------------------
def make_wn_conv(key, cin, cout, k, g_val):
    """Weight-norm conv: w = g * v / ||v||_per_out_channel (OIHW), bias = 0."""
    v = jax.random.normal(key, (cout, cin, k, k), jnp.float32) * 0.1
    norm = jnp.sqrt(jnp.sum(v * v, axis=(1, 2, 3), keepdims=True))
    w = (g_val * v) / norm                       # (Cout, Cin, K, K)
    b = jnp.zeros((cout,), jnp.float32)
    return w, b


def init_model(key, *, num_blocks, width_multiplier, num_channels,
               num_residual_units, scale):
    K, SKIP_K = 3, 5
    num_inputs = num_channels
    num_outputs = scale * scale * num_channels
    R = num_residual_units
    RW = int(R * width_multiplier)
    res_scale = 1.0 / math.sqrt(num_blocks)

    keys = jax.random.split(key, 3 + 2 * num_blocks)
    ki = iter(range(len(keys)))

    params = {}
    params["head"] = make_wn_conv(keys[next(ki)], num_inputs, R, K, 1.0)
    blocks = []
    for _ in range(num_blocks):
        c1 = make_wn_conv(keys[next(ki)], R, RW, K, 2.0)
        c2 = make_wn_conv(keys[next(ki)], RW, R, K, res_scale)
        blocks.append((c1, c2))
    params["blocks"] = blocks
    params["tail"] = make_wn_conv(keys[next(ki)], R, num_outputs, K, 1.0)
    if num_inputs != num_outputs:
        params["skip"] = make_wn_conv(keys[next(ki)], num_inputs, num_outputs,
                                      SKIP_K, 1.0)
    else:
        params["skip"] = None
    # NOTE: `scale` is deliberately NOT stored in params (static Python value).
    return params


def pack_params(params, cin_pad):
    """Pack all conv weights/biases into two zero-padded tensors.

    Weight rows are flattened as (kh, kw, cin) to match the in-kernel im2col
    ordering; layers whose input is the padded network input get their Cin
    zero-padded to cin_pad.
    Returns (w_packed (L, Cout_max, KKC_pad), b_packed (L, Cout_max, 1), meta).
    """
    layers = []

    def add(wb, cin_eff):
        w, b = wb                                 # (cout, cin, K, K), (cout,)
        cout, cin, K, _ = w.shape
        if cin_eff > cin:
            w = jnp.pad(w, ((0, 0), (0, cin_eff - cin), (0, 0), (0, 0)))
        wf = jnp.transpose(w, (0, 2, 3, 1)).reshape(cout, K * K * cin_eff)
        layers.append((wf, b, K, cin_eff, cout))

    add(params["head"], cin_pad)
    for c1, c2 in params["blocks"]:
        add(c1, c1[0].shape[1])
        add(c2, c2[0].shape[1])
    add(params["tail"], params["tail"][0].shape[1])
    has_skip = params["skip"] is not None
    if has_skip:
        add(params["skip"], cin_pad)

    L = len(layers)
    cout_max = _round_up(max(c for *_, c in layers), 8)
    kkc_max = max(wf.shape[1] for (wf, *_rest) in layers)
    kkc_pad = _round_up(kkc_max, 128)

    w_packed = jnp.zeros((L, cout_max, kkc_pad), jnp.float32)
    b_packed = jnp.zeros((L, cout_max, 1), jnp.float32)
    for i, (wf, b, K, cin_eff, cout) in enumerate(layers):
        w_packed = w_packed.at[i, :cout, :wf.shape[1]].set(wf)
        b_packed = b_packed.at[i, :cout, 0].set(b)

    meta = tuple((K, cin_eff, cout) for (_, _, K, cin_eff, cout) in layers)
    return w_packed, b_packed, meta, has_skip


# ---------------------------------------------------------------------------
# MODEL / Dyna_MODEL forward
# ---------------------------------------------------------------------------
def pixel_shuffle_nchw(y, r):
    N, C2, H, W = y.shape
    C = C2 // (r * r)
    y = y.reshape(N, C, r, r, H, W)
    y = jnp.transpose(y, (0, 1, 4, 2, 5, 3))      # N, C, H, r, W, r
    return y.reshape(N, C, H * r, W * r)


def model_forward(params, x_nchw, *, image_mean, scale):
    N, Cin, H, W = x_nchw.shape
    cout_total = params["tail"][0].shape[0]       # num_outputs

    x = (x_nchw - image_mean).astype(jnp.float32)
    cin_pad = _round_up(Cin, 8)                   # keep sublane concat layout-only
    if cin_pad > Cin:
        x = jnp.pad(x, ((0, 0), (0, cin_pad - Cin), (0, 0), (0, 0)))
    # Channel-first, batch folded into the lane axis: (cin_pad, N*H*W).
    x_cf = jnp.transpose(x, (1, 0, 2, 3)).reshape(cin_pad, N * H * W)

    w_packed, b_packed, layer_meta, has_skip = pack_params(params, cin_pad)

    y = fused_model_pallas(x_cf, w_packed, b_packed,
                           H=H, W=W, N=N, num_blocks=len(params["blocks"]),
                           has_skip=has_skip, layer_meta=layer_meta,
                           cout_total=cout_total)          # (cout_total, N*H*W)

    y = y.reshape(cout_total, N, H, W).transpose(1, 0, 2, 3)
    if scale > 1:
        y = pixel_shuffle_nchw(y, scale)
    return y + image_mean


def dyna_model_forward(net1_params, net2_params, x_nchw, *,
                       image_mean, global_size, scale):
    # Shape-based branch; x.shape and global_size are static Python ints.
    if x_nchw.shape[2] < global_size:
        return model_forward(net1_params, x_nchw,
                             image_mean=image_mean, scale=scale)
    return model_forward(net2_params, x_nchw,
                         image_mean=image_mean, scale=scale)


# ---------------------------------------------------------------------------
# Pure-XLA reference (correctness check of the fused kernel)
# ---------------------------------------------------------------------------
def _conv_ref(x, wb):
    w, b = wb                                     # (Cout, Cin, K, K), (Cout,)
    y = jax.lax.conv_general_dilated(
        x, w, window_strides=(1, 1), padding="SAME",
        dimension_numbers=("NCHW", "OIHW", "NCHW"),
        precision=jax.lax.Precision.HIGHEST)
    return y + b.reshape(1, -1, 1, 1)


def model_forward_ref(params, x_nchw, *, image_mean, scale):
    x = x_nchw - image_mean
    h = _conv_ref(x, params["head"])
    for c1, c2 in params["blocks"]:
        t = jnp.maximum(_conv_ref(h, c1), 0.0)
        h = _conv_ref(t, c2) + h
    body = _conv_ref(h, params["tail"])
    skip = _conv_ref(x, params["skip"]) if params["skip"] is not None else x
    y = body + skip
    if scale > 1:
        y = pixel_shuffle_nchw(y, scale)
    return y + image_mean


# ---------------------------------------------------------------------------
if __name__ == "__main__":
    NUM_CHANNELS = 4
    NUM_RESIDUAL_UNITS = 8
    SCALE = 2
    IMAGE_MEAN = 0.5
    GLOBAL_SIZE = 32
    N, H, W = 2, 16, 16

    key = jax.random.PRNGKey(0)
    k_net1, k_net2, k_x = jax.random.split(key, 3)

    net1 = init_model(k_net1, num_blocks=4, width_multiplier=2,
                      num_channels=NUM_CHANNELS,
                      num_residual_units=NUM_RESIDUAL_UNITS, scale=SCALE)
    net2 = init_model(k_net2, num_blocks=2, width_multiplier=2,
                      num_channels=NUM_CHANNELS,
                      num_residual_units=NUM_RESIDUAL_UNITS, scale=SCALE)

    x = jax.random.normal(k_x, (N, NUM_CHANNELS, H, W), jnp.float32)

    fwd = jax.jit(functools.partial(dyna_model_forward,
                                    image_mean=IMAGE_MEAN,
                                    global_size=GLOBAL_SIZE,
                                    scale=SCALE))
    out = jax.block_until_ready(fwd(net1, net2, x))

    expected_shape = (N, NUM_CHANNELS, H * SCALE, W * SCALE)
    assert out.shape == expected_shape, (out.shape, expected_shape)
    assert bool(jnp.all(jnp.isfinite(out)))

    # Correctness check of the fused Pallas path vs. a pure-XLA reference.
    # All-f32 path: 1e-3 catches any structural bug (wrong tap / mask / weight
    # ordering gives O(0.1+) errors) while allowing f32 summation-order noise.
    # With MXU_INPUT_DTYPE = bfloat16 (v6e/v7x), expect ~1e-2 instead.
    ref_params = net1 if H < GLOBAL_SIZE else net2
    out_ref = model_forward_ref(ref_params, x, image_mean=IMAGE_MEAN, scale=SCALE)
    max_diff = float(jnp.max(jnp.abs(out - out_ref)))
    assert bool(jnp.allclose(out, out_ref, rtol=1e-3, atol=1e-3)), (
        "max abs diff", max_diff)

    print("KERNEL_OK")
</pallas_src>

<mosaic_0001>
module attributes {stable_mosaic.version = 11 : i64} {
  func.func @kernel(%arg0: i32, %arg1: memref<8x256xf32, #tpu.memory_space<vmem>>, %arg2: memref<11x16x256xf32, #tpu.memory_space<vmem>>, %arg3: memref<11x16x1xf32, #tpu.memory_space<vmem>>, %arg4: memref<16x256xf32, #tpu.memory_space<vmem>>, %arg5: memref<256x256xf32, #tpu.memory_space<vmem>>) attributes {dimension_semantics = [#tpu.dimension_semantics<parallel>], iteration_bounds = array<i64: 2>, scalar_prefetch = 0 : i64, scratch_operands = 1 : i64, tpu.core_type = #tpu.core_type<tc>, window_params = [{transform_indices = @transform_0, window_bounds = array<i64: 8, 256>}, {pipeline_mode = #tpu.pipeline_mode<synchronous>, transform_indices = @transform_1, window_bounds = array<i64: 11, 16, 256>}, {pipeline_mode = #tpu.pipeline_mode<synchronous>, transform_indices = @transform_2, window_bounds = array<i64: 11, 16, 1>}, {transform_indices = @transform_3, window_bounds = array<i64: 16, 256>}]} {
    %0 = tpu.iota {dimensions = array<i32: 1>} : vector<1x256xi32>
    %c255_i32 = arith.constant 255 : i32
    %1 = vector.broadcast %c255_i32 : i32 to vector<1x256xi32>
    %2 = arith.andi %0, %1 : vector<1x256xi32>
    %c15_i32 = arith.constant 15 : i32
    %3 = vector.broadcast %c15_i32 : i32 to vector<1x256xi32>
    %4 = arith.andi %2, %3 : vector<1x256xi32>
    %c32_i32 = arith.constant 32 : i32
    %5 = vector.broadcast %c32_i32 : i32 to vector<1x256xi32>
    %6 = arith.cmpi sge, %2, %5 : vector<1x256xi32>
    %c2_i32 = arith.constant 2 : i32
    %7 = vector.broadcast %c2_i32 : i32 to vector<1x256xi32>
    %8 = arith.cmpi sge, %4, %7 : vector<1x256xi32>
    %9 = arith.andi %6, %8 : vector<1x256xi1>
    %c1_i32 = arith.constant 1 : i32
    %10 = vector.broadcast %c1_i32 : i32 to vector<1x256xi32>
    %11 = arith.cmpi sge, %4, %10 : vector<1x256xi32>
    %12 = arith.andi %6, %11 : vector<1x256xi1>
    %c15_i32_0 = arith.constant 15 : i32
    %13 = vector.broadcast %c15_i32_0 : i32 to vector<1x256xi32>
    %14 = arith.cmpi slt, %4, %13 : vector<1x256xi32>
    %15 = arith.andi %6, %14 : vector<1x256xi1>
    %c14_i32 = arith.constant 14 : i32
    %16 = vector.broadcast %c14_i32 : i32 to vector<1x256xi32>
    %17 = arith.cmpi slt, %4, %16 : vector<1x256xi32>
    %18 = arith.andi %6, %17 : vector<1x256xi1>
    %c16_i32 = arith.constant 16 : i32
    %19 = vector.broadcast %c16_i32 : i32 to vector<1x256xi32>
    %20 = arith.cmpi sge, %2, %19 : vector<1x256xi32>
    %c2_i32_1 = arith.constant 2 : i32
    %21 = vector.broadcast %c2_i32_1 : i32 to vector<1x256xi32>
    %22 = arith.cmpi sge, %4, %21 : vector<1x256xi32>
    %23 = arith.andi %20, %22 : vector<1x256xi1>
    %c1_i32_2 = arith.constant 1 : i32
    %24 = vector.broadcast %c1_i32_2 : i32 to vector<1x256xi32>
    %25 = arith.cmpi sge, %4, %24 : vector<1x256xi32>
    %26 = arith.andi %20, %25 : vector<1x256xi1>
    %c15_i32_3 = arith.constant 15 : i32
    %27 = vector.broadcast %c15_i32_3 : i32 to vector<1x256xi32>
    %28 = arith.cmpi slt, %4, %27 : vector<1x256xi32>
    %29 = arith.andi %20, %28 : vector<1x256xi1>
    %c14_i32_4 = arith.constant 14 : i32
    %30 = vector.broadcast %c14_i32_4 : i32 to vector<1x256xi32>
    %31 = arith.cmpi slt, %4, %30 : vector<1x256xi32>
    %32 = arith.andi %20, %31 : vector<1x256xi1>
    %c2_i32_5 = arith.constant 2 : i32
    %33 = vector.broadcast %c2_i32_5 : i32 to vector<1x256xi32>
    %34 = arith.cmpi sge, %4, %33 : vector<1x256xi32>
    %c1_i32_6 = arith.constant 1 : i32
    %35 = vector.broadcast %c1_i32_6 : i32 to vector<1x256xi32>
    %36 = arith.cmpi sge, %4, %35 : vector<1x256xi32>
    %c15_i32_7 = arith.constant 15 : i32
    %37 = vector.broadcast %c15_i32_7 : i32 to vector<1x256xi32>
    %38 = arith.cmpi slt, %4, %37 : vector<1x256xi32>
    %c14_i32_8 = arith.constant 14 : i32
    %39 = vector.broadcast %c14_i32_8 : i32 to vector<1x256xi32>
    %40 = arith.cmpi slt, %4, %39 : vector<1x256xi32>
    %c240_i32 = arith.constant 240 : i32
    %41 = vector.broadcast %c240_i32 : i32 to vector<1x256xi32>
    %42 = arith.cmpi slt, %2, %41 : vector<1x256xi32>
    %c2_i32_9 = arith.constant 2 : i32
    %43 = vector.broadcast %c2_i32_9 : i32 to vector<1x256xi32>
    %44 = arith.cmpi sge, %4, %43 : vector<1x256xi32>
    %45 = arith.andi %42, %44 : vector<1x256xi1>
    %c1_i32_10 = arith.constant 1 : i32
    %46 = vector.broadcast %c1_i32_10 : i32 to vector<1x256xi32>
    %47 = arith.cmpi sge, %4, %46 : vector<1x256xi32>
    %48 = arith.andi %42, %47 : vector<1x256xi1>
    %c15_i32_11 = arith.constant 15 : i32
    %49 = vector.broadcast %c15_i32_11 : i32 to vector<1x256xi32>
    %50 = arith.cmpi slt, %4, %49 : vector<1x256xi32>
    %51 = arith.andi %42, %50 : vector<1x256xi1>
    %c14_i32_12 = arith.constant 14 : i32
    %52 = vector.broadcast %c14_i32_12 : i32 to vector<1x256xi32>
    %53 = arith.cmpi slt, %4, %52 : vector<1x256xi32>
    %54 = arith.andi %42, %53 : vector<1x256xi1>
    %c224_i32 = arith.constant 224 : i32
    %55 = vector.broadcast %c224_i32 : i32 to vector<1x256xi32>
    %56 = arith.cmpi slt, %2, %55 : vector<1x256xi32>
    %c2_i32_13 = arith.constant 2 : i32
    %57 = vector.broadcast %c2_i32_13 : i32 to vector<1x256xi32>
    %58 = arith.cmpi sge, %4, %57 : vector<1x256xi32>
    %59 = arith.andi %56, %58 : vector<1x256xi1>
    %c1_i32_14 = arith.constant 1 : i32
    %60 = vector.broadcast %c1_i32_14 : i32 to vector<1x256xi32>
    %61 = arith.cmpi sge, %4, %60 : vector<1x256xi32>
    %62 = arith.andi %56, %61 : vector<1x256xi1>
    %c15_i32_15 = arith.constant 15 : i32
    %63 = vector.broadcast %c15_i32_15 : i32 to vector<1x256xi32>
    %64 = arith.cmpi slt, %4, %63 : vector<1x256xi32>
    %65 = arith.andi %56, %64 : vector<1x256xi1>
    %c14_i32_16 = arith.constant 14 : i32
    %66 = vector.broadcast %c14_i32_16 : i32 to vector<1x256xi32>
    %67 = arith.cmpi slt, %4, %66 : vector<1x256xi32>
    %68 = arith.andi %56, %67 : vector<1x256xi1>
    %c0 = arith.constant 0 : index
    %c0_17 = arith.constant 0 : index
    %69 = vector.load %arg1[%c0, %c0_17] : memref<8x256xf32, #tpu.memory_space<vmem>>, vector<8x256xf32>
    %c17_i32 = arith.constant 17 : i32
    %70 = tpu.dynamic_rotate %69 by %c17_i32 dim 1 : vector<8x256xf32>, i32 -> vector<8x256xf32>
    %cst = arith.constant 0.000000e+00 : f32
    %71 = vector.shape_cast %26 : vector<1x256xi1> to vector<1x256xi1>
    %72 = vector.broadcast %71 : vector<1x256xi1> to vector<8x256xi1>
    %73 = vector.broadcast %cst : f32 to vector<8x256xf32>
    %74 = arith.select %72, %70, %73 : vector<8x256xi1>, vector<8x256xf32>
    %c0_18 = arith.constant 0 : index
    %c0_19 = arith.constant 0 : index
    %75 = vector.load %arg5[%c0_18, %c0_19] : memref<256x256xf32, #tpu.memory_space<vmem>>, vector<8x256xf32>
    tpu.vector_store %arg5[%c0_18, %c0_19], %74 {strides = array<i32>} : memref<256x256xf32, #tpu.memory_space<vmem>>, vector<8x256xf32>,
    %c16_i32_20 = arith.constant 16 : i32
    %76 = tpu.dynamic_rotate %69 by %c16_i32_20 dim 1 : vector<8x256xf32>, i32 -> vector<8x256xf32>
    %cst_21 = arith.constant 0.000000e+00 : f32
    %77 = vector.shape_cast %20 : vector<1x256xi1> to vector<1x256xi1>
    %78 = vector.broadcast %77 : vector<1x256xi1> to vector<8x256xi1>
    %79 = vector.broadcast %cst_21 : f32 to vector<8x256xf32>
    %80 = arith.select %78, %76, %79 : vector<8x256xi1>, vector<8x256xf32>
    %c8 = arith.constant 8 : index
    %c0_22 = arith.constant 0 : index
    %81 = vector.load %arg5[%c8, %c0_22] : memref<256x256xf32, #tpu.memory_space<vmem>>, vector<8x256xf32>
    tpu.vector_store %arg5[%c8, %c0_22], %80 {strides = array<i32>} : memref<256x256xf32, #tpu.memory_space<vmem>>, vector<8x256xf32>,
    %c15_i32_23 = arith.constant 15 : i32
    %82 = tpu.dynamic_rotate %69 by %c15_i32_23 dim 1 : vector<8x256xf32>, i32 -> vector<8x256xf32>
    %cst_24 = arith.constant 0.000000e+00 : f32
    %83 = vector.shape_cast %29 : vector<1x256xi1> to vector<1x256xi1>
    %84 = vector.broadcast %83 : vector<1x256xi1> to vector<8x256xi1>
    %85 = vector.broadcast %cst_24 : f32 to vector<8x256xf32>
    %86 = arith.select %84, %82, %85 : vector<8x256xi1>, vector<8x256xf32>
    %c16 = arith.constant 16 : index
    %c0_25 = arith.constant 0 : index
    %87 = vector.load %arg5[%c16, %c0_25] : memref<256x256xf32, #tpu.memory_space<vmem>>, vector<8x256xf32>
    tpu.vector_store %arg5[%c16, %c0_25], %86 {strides = array<i32>} : memref<256x256xf32, #tpu.memory_space<vmem>>, vector<8x256xf32>,
    %c1_i32_26 = arith.constant 1 : i32
    %88 = tpu.dynamic_rotate %69 by %c1_i32_26 dim 1 : vector<8x256xf32>, i32 -> vector<8x256xf32>
    %cst_27 = arith.constant 0.000000e+00 : f32
    %89 = vector.shape_cast %36 : vector<1x256xi1> to vector<1x256xi1>
    %90 = vector.broadcast %89 : vector<1x256xi1> to vector<8x256xi1>
    %91 = vector.broadcast %cst_27 : f32 to vector<8x256xf32>
    %92 = arith.select %90, %88, %91 : vector<8x256xi1>, vector<8x256xf32>
    %c24 = arith.constant 24 : index
    %c0_28 = arith.constant 0 : index
    %93 = vector.load %arg5[%c24, %c0_28] : memref<256x256xf32, #tpu.memory_space<vmem>>, vector<8x256xf32>
    tpu.vector_store %arg5[%c24, %c0_28], %92 {strides = array<i32>} : memref<256x256xf32, #tpu.memory_space<vmem>>, vector<8x256xf32>,
    %c32 = arith.constant 32 : index
    %c0_29 = arith.constant 0 : index
    %94 = vector.load %arg5[%c32, %c0_29] : memref<256x256xf32, #tpu.memory_space<vmem>>, vector<8x256xf32>
    tpu.vector_store %arg5[%c32, %c0_29], %69 {strides = array<i32>} : memref<256x256xf32, #tpu.memory_space<vmem>>, vector<8x256xf32>,
    %c255_i32_30 = arith.constant 255 : i32
    %95 = tpu.dynamic_rotate %69 by %c255_i32_30 dim 1 : vector<8x256xf32>, i32 -> vector<8x256xf32>
    %cst_31 = arith.constant 0.000000e+00 : f32
    %96 = vector.shape_cast %38 : vector<1x256xi1> to vector<1x256xi1>
    %97 = vector.broadcast %96 : vector<1x256xi1> to vector<8x256xi1>
    %98 = vector.broadcast %cst_31 : f32 to vector<8x256xf32>
    %99 = arith.select %97, %95, %98 : vector<8x256xi1>, vector<8x256xf32>
    %c40 = arith.constant 40 : index
    %c0_32 = arith.constant 0 : index
    %100 = vector.load %arg5[%c40, %c0_32] : memref<256x256xf32, #tpu.memory_space<vmem>>, vector<8x256xf32>
    tpu.vector_store %arg5[%c40, %c0_32], %99 {strides = array<i32>} : memref<256x256xf32, #tpu.memory_space<vmem>>, vector<8x256xf32>,
    %c241_i32 = arith.constant 241 : i32
    %101 = tpu.dynamic_rotate %69 by %c241_i32 dim 1 : vector<8x256xf32>, i32 -> vector<8x256xf32>
    %cst_33 = arith.constant 0.000000e+00 : f32
    %102 = vector.shape_cast %48 : vector<1x256xi1> to vector<1x256xi1>
    %103 = vector.broadcast %102 : vector<1x256xi1> to vector<8x256xi1>
    %104 = vector.broadcast %cst_33 : f32 to vector<8x256xf32>
    %105 = arith.select %103, %101, %104 : vector<8x256xi1>, vector<8x256xf32>
    %c48 = arith.constant 48 : index
    %c0_34 = arith.constant 0 : index
    %106 = vector.load %arg5[%c48, %c0_34] : memref<256x256xf32, #tpu.memory_space<vmem>>, vector<8x256xf32>
    tpu.vector_store %arg5[%c48, %c0_34], %105 {strides = array<i32>} : memref<256x256xf32, #tpu.memory_space<vmem>>, vector<8x256xf32>,
    %c240_i32_35 = arith.constant 240 : i32
    %107 = tpu.dynamic_rotate %69 by %c240_i32_35 dim 1 : vector<8x256xf32>, i32 -> vector<8x256xf32>
    %cst_36 = arith.constant 0.000000e+00 : f32
    %108 = vector.shape_cast %42 : vector<1x256xi1> to vector<1x256xi1>
    %109 = vector.broadcast %108 : vector<1x256xi1> to vector<8x256xi1>
    %110 = vector.broadcast %cst_36 : f32 to vector<8x256xf32>
    %111 = arith.select %109, %107, %110 : vector<8x256xi1>, vector<8x256xf32>
    %c56 = arith.constant 56 : index
    %c0_37 = arith.constant 0 : index
    %112 = vector.load %arg5[%c56, %c0_37] : memref<256x256xf32, #tpu.memory_space<vmem>>, vector<8x256xf32>
    tpu.vector_store %arg5[%c56, %c0_37], %111 {strides = array<i32>} : memref<256x256xf32, #tpu.memory_space<vmem>>, vector<8x256xf32>,
    %c239_i32 = arith.constant 239 : i32
    %113 = tpu.dynamic_rotate %69 by %c239_i32 dim 1 : vector<8x256xf32>, i32 -> vector<8x256xf32>
    %cst_38 = arith.constant 0.000000e+00 : f32
    %114 = vector.shape_cast %51 : vector<1x256xi1> to vector<1x256xi1>
    %115 = vector.broadcast %114 : vector<1x256xi1> to vector<8x256xi1>
    %116 = vector.broadcast %cst_38 : f32 to vector<8x256xf32>
    %117 = arith.select %115, %113, %116 : vector<8x256xi1>, vector<8x256xf32>
    %c64 = arith.constant 64 : index
    %c0_39 = arith.constant 0 : index
    %118 = vector.load %arg5[%c64, %c0_39] : memref<256x256xf32, #tpu.memory_space<vmem>>, vector<8x256xf32>
    tpu.vector_store %arg5[%c64, %c0_39], %117 {strides = array<i32>} : memref<256x256xf32, #tpu.memory_space<vmem>>, vector<8x256xf32>,
    %c0_40 = arith.constant 0 : index
    %c0_41 = arith.constant 0 : index
    %c0_42 = arith.constant 0 : index
    %119 = vector.load %arg2[%c0_40, %c0_41, %c0_42] : memref<11x16x256xf32, #tpu.memory_space<vmem>>, vector<1x8x72xf32>
    %120 = vector.shape_cast %119 : vector<1x8x72xf32> to vector<8x72xf32>
    %c0_43 = arith.constant 0 : index
    %c0_44 = arith.constant 0 : index
    %121 = vector.load %arg5[%c0_43, %c0_44] : memref<256x256xf32, #tpu.memory_space<vmem>>, vector<72x256xf32>
    %cst_45 = arith.constant dense<0.000000e+00> : vector<8x256xf32>
    %122 = tpu.matmul %120, %121, %cst_45 {dimension_numbers = #tpu.dot_dimension_numbers<[1], [0], [0], [1], [0, 0, 1, 1], [], []>} : vector<8x72xf32>, vector<72x256xf32>, vector<8x256xf32> -> vector<8x256xf32>
    %c0_46 = arith.constant 0 : index
    %c0_47 = arith.constant 0 : index
    %c0_48 = arith.constant 0 : index
    %123 = vector.load %arg3[%c0_46, %c0_47, %c0_48] : memref<11x16x1xf32, #tpu.memory_space<vmem>>, vector<1x8x1xf32>
    %124 = vector.shape_cast %123 : vector<1x8x1xf32> to vector<8x1xf32>
    %125 = vector.broadcast %124 : vector<8x1xf32> to vector<8x256xf32>
    %126 = arith.addf %122, %125 : vector<8x256xf32>
    %c17_i32_49 = arith.constant 17 : i32
    %127 = tpu.dynamic_rotate %126 by %c17_i32_49 dim 1 : vector<8x256xf32>, i32 -> vector<8x256xf32>
    %cst_50 = arith.constant 0.000000e+00 : f32
    %128 = vector.shape_cast %26 : vector<1x256xi1> to vector<1x256xi1>
    %129 = vector.broadcast %128 : vector<1x256xi1> to vector<8x256xi1>
    %130 = vector.broadcast %cst_50 : f32 to vector<8x256xf32>
    %131 = arith.select %129, %127, %130 : vector<8x256xi1>, vector<8x256xf32>
    %c0_51 = arith.constant 0 : index
    %c0_52 = arith.constant 0 : index
    %132 = vector.load %arg5[%c0_51, %c0_52] : memref<256x256xf32, #tpu.memory_space<vmem>>, vector<8x256xf32>
    tpu.vector_store %arg5[%c0_51, %c0_52], %131 {strides = array<i32>} : memref<256x256xf32, #tpu.memory_space<vmem>>, vector<8x256xf32>,
    %c16_i32_53 = arith.constant 16 : i32
    %133 = tpu.dynamic_rotate %126 by %c16_i32_53 dim 1 : vector<8x256xf32>, i32 -> vector<8x256xf32>
    %cst_54 = arith.constant 0.000000e+00 : f32
    %134 = vector.shape_cast %20 : vector<1x256xi1> to vector<1x256xi1>
    %135 = vector.broadcast %134 : vector<1x256xi1> to vector<8x256xi1>
    %136 = vector.broadcast %cst_54 : f32 to vector<8x256xf32>
    %137 = arith.select %135, %133, %136 : vector<8x256xi1>, vector<8x256xf32>
    %c8_55 = arith.constant 8 : index
    %c0_56 = arith.constant 0 : index
    %138 = vector.load %arg5[%c8_55, %c0_56] : memref<256x256xf32, #tpu.memory_space<vmem>>, vector<8x256xf32>
    tpu.vector_store %arg5[%c8_55, %c0_56], %137 {strides = array<i32>} : memref<256x256xf32, #tpu.memory_space<vmem>>, vector<8x256xf32>,
    %c15_i32_57 = arith.constant 15 : i32
    %139 = tpu.dynamic_rotate %126 by %c15_i32_57 dim 1 : vector<8x256xf32>, i32 -> vector<8x256xf32>
    %cst_58 = arith.constant 0.000000e+00 : f32
    %140 = vector.shape_cast %29 : vector<1x256xi1> to vector<1x256xi1>
    %141 = vector.broadcast %140 : vector<1x256xi1> to vector<8x256xi1>
    %142 = vector.broadcast %cst_58 : f32 to vector<8x256xf32>
    %143 = arith.select %141, %139, %142 : vector<8x256xi1>, vector<8x256xf32>
    %c16_59 = arith.constant 16 : index
    %c0_60 = arith.constant 0 : index
    %144 = vector.load %arg5[%c16_59, %c0_60] : memref<256x256xf32, #tpu.memory_space<vmem>>, vector<8x256xf32>
    tpu.vector_store %arg5[%c16_59, %c0_60], %143 {strides = array<i32>} : memref<256x256xf32, #tpu.memory_space<vmem>>, vector<8x256xf32>,
    %c1_i32_61 = arith.constant 1 : i32
    %145 = tpu.dynamic_rotate %126 by %c1_i32_61 dim 1 : vector<8x256xf32>, i32 -> vector<8x256xf32>
    %cst_62 = arith.constant 0.000000e+00 : f32
    %146 = vector.shape_cast %36 : vector<1x256xi1> to vector<1x256xi1>
    %147 = vector.broadcast %146 : vector<1x256xi1> to vector<8x256xi1>
    %148 = vector.broadcast %cst_62 : f32 to vector<8x256xf32>
    %149 = arith.select %147, %145, %148 : vector<8x256xi1>, vector<8x256xf32>
    %c24_63 = arith.constant 24 : index
    %c0_64 = arith.constant 0 : index
    %150 = vector.load %arg5[%c24_63, %c0_64] : memref<256x256xf32, #tpu.memory_space<vmem>>, vector<8x256xf32>
    tpu.vector_store %arg5[%c24_63, %c0_64], %149 {strides = array<i32>} : memref<256x256xf32, #tpu.memory_space<vmem>>, vector<8x256xf32>,
    %c32_65 = arith.constant 32 : index
    %c0_66 = arith.constant 0 : index
    %151 = vector.load %arg5[%c32_65, %c0_66] : memref<256x256xf32, #tpu.memory_space<vmem>>, vector<8x256xf32>
    tpu.vector_store %arg5[%c32_65, %c0_66], %126 {strides = array<i32>} : memref<256x256xf32, #tpu.memory_space<vmem>>, vector<8x256xf32>,
    %c255_i32_67 = arith.constant 255 : i32
    %152 = tpu.dynamic_rotate %126 by %c255_i32_67 dim 1 : vector<8x256xf32>, i32 -> vector<8x256xf32>
    %cst_68 = arith.constant 0.000000e+00 : f32
    %153 = vector.shape_cast %38 : vector<1x256xi1> to vector<1x256xi1>
    %154 = vector.broadcast %153 : vector<1x256xi1> to vector<8x256xi1>
    %155 = vector.broadcast %cst_68 : f32 to vector<8x256xf32>
    %156 = arith.select %154, %152, %155 : vector<8x256xi1>, vector<8x256xf32>
    %c40_69 = arith.constant 40 : index
    %c0_70 = arith.constant 0 : index
    %157 = vector.load %arg5[%c40_69, %c0_70] : memref<256x256xf32, #tpu.memory_space<vmem>>, vector<8x256xf32>
    tpu.vector_store %arg5[%c40_69, %c0_70], %156 {strides = array<i32>} : memref<256x256xf32, #tpu.memory_space<vmem>>, vector<8x256xf32>,
    %c241_i32_71 = arith.constant 241 : i32
    %158 = tpu.dynamic_rotate %126 by %c241_i32_71 dim 1 : vector<8x256xf32>, i32 -> vector<8x256xf32>
    %cst_72 = arith.constant 0.000000e+00 : f32
    %159 = vector.shape_cast %48 : vector<1x256xi1> to vector<1x256xi1>
    %160 = vector.broadcast %159 : vector<1x256xi1> to vector<8x256xi1>
    %161 = vector.broadcast %cst_72 : f32 to vector<8x256xf32>
    %162 = arith.select %160, %158, %161 : vector<8x256xi1>, vector<8x256xf32>
    %c48_73 = arith.constant 48 : index
    %c0_74 = arith.constant 0 : index
    %163 = vector.load %arg5[%c48_73, %c0_74] : memref<256x256xf32, #tpu.memory_space<vmem>>, vector<8x256xf32>
    tpu.vector_store %arg5[%c48_73, %c0_74], %162 {strides = array<i32>} : memref<256x256xf32, #tpu.memory_space<vmem>>, vector<8x256xf32>,
    %c240_i32_75 = arith.constant 240 : i32
    %164 = tpu.dynamic_rotate %126 by %c240_i32_75 dim 1 : vector<8x256xf32>, i32 -> vector<8x256xf32>
    %cst_76 = arith.constant 0.000000e+00 : f32
    %165 = vector.shape_cast %42 : vector<1x256xi1> to vector<1x256xi1>
    %166 = vector.broadcast %165 : vector<1x256xi1> to vector<8x256xi1>
    %167 = vector.broadcast %cst_76 : f32 to vector<8x256xf32>
    %168 = arith.select %166, %164, %167 : vector<8x256xi1>, vector<8x256xf32>
    %c56_77 = arith.constant 56 : index
    %c0_78 = arith.constant 0 : index
    %169 = vector.load %arg5[%c56_77, %c0_78] : memref<256x256xf32, #tpu.memory_space<vmem>>, vector<8x256xf32>
    tpu.vector_store %arg5[%c56_77, %c0_78], %168 {strides = array<i32>} : memref<256x256xf32, #tpu.memory_space<vmem>>, vector<8x256xf32>,
    %c239_i32_79 = arith.constant 239 : i32
    %170 = tpu.dynamic_rotate %126 by %c239_i32_79 dim 1 : vector<8x256xf32>, i32 -> vector<8x256xf32>
    %cst_80 = arith.constant 0.000000e+00 : f32
    %171 = vector.shape_cast %51 : vector<1x256xi1> to vector<1x256xi1>
    %172 = vector.broadcast %171 : vector<1x256xi1> to vector<8x256xi1>
    %173 = vector.broadcast %cst_80 : f32 to vector<8x256xf32>
    %174 = arith.select %172, %170, %173 : vector<8x256xi1>, vector<8x256xf32>
    %c64_81 = arith.constant 64 : index
    %c0_82 = arith.constant 0 : index
    %175 = vector.load %arg5[%c64_81, %c0_82] : memref<256x256xf32, #tpu.memory_space<vmem>>, vector<8x256xf32>
    tpu.vector_store %arg5[%c64_81, %c0_82], %174 {strides = array<i32>} : memref<256x256xf32, #tpu.memory_space<vmem>>, vector<8x256xf32>,
    %c1 = arith.constant 1 : index
    %c0_83 = arith.constant 0 : index
    %c0_84 = arith.constant 0 : index
    %176 = vector.load %arg2[%c1, %c0_83, %c0_84] : memref<11x16x256xf32, #tpu.memory_space<vmem>>, vector<1x16x72xf32>
    %177 = vector.shape_cast %176 : vector<1x16x72xf32> to vector<16x72xf32>
    %c0_85 = arith.constant 0 : index
    %c0_86 = arith.constant 0 : index
    %178 = vector.load %arg5[%c0_85, %c0_86] : memref<256x256xf32, #tpu.memory_space<vmem>>, vector<72x256xf32>
    %cst_87 = arith.constant dense<0.000000e+00> : vector<16x256xf32>
    %179 = tpu.matmul %177, %178, %cst_87 {dimension_numbers = #tpu.dot_dimension_numbers<[1], [0], [0], [1], [0, 0, 1, 1], [], []>} : vector<16x72xf32>, vector<72x256xf32>, vector<16x256xf32> -> vector<16x256xf32>
    %c1_88 = arith.constant 1 : index
    %c0_89 = arith.constant 0 : index
    %c0_90 = arith.constant 0 : index
    %180 = vector.load %arg3[%c1_88, %c0_89, %c0_90] : memref<11x16x1xf32, #tpu.memory_space<vmem>>, vector<1x16x1xf32>
    %181 = vector.shape_cast %180 : vector<1x16x1xf32> to vector<16x1xf32>
    %182 = vector.broadcast %181 : vector<16x1xf32> to vector<16x256xf32>
    %183 = arith.addf %179, %182 : vector<16x256xf32>
    %cst_91 = arith.constant 0.000000e+00 : f32
    %184 = vector.broadcast %cst_91 : f32 to vector<16x256xf32>
    %185 = arith.maximumf %183, %184 : vector<16x256xf32>
    %c17_i32_92 = arith.constant 17 : i32
    %186 = tpu.dynamic_rotate %185 by %c17_i32_92 dim 1 : vector<16x256xf32>, i32 -> vector<16x256xf32>
    %cst_93 = arith.constant 0.000000e+00 : f32
    %187 = vector.shape_cast %26 : vector<1x256xi1> to vector<1x256xi1>
    %188 = vector.broadcast %187 : vector<1x256xi1> to vector<16x256xi1>
    %189 = vector.broadcast %cst_93 : f32 to vector<16x256xf32>
    %190 = arith.select %188, %186, %189 : vector<16x256xi1>, vector<16x256xf32>
    %c0_94 = arith.constant 0 : index
    %c0_95 = arith.constant 0 : index
    %191 = vector.load %arg5[%c0_94, %c0_95] : memref<256x256xf32, #tpu.memory_space<vmem>>, vector<16x256xf32>
    tpu.vector_store %arg5[%c0_94, %c0_95], %190 {strides = array<i32>} : memref<256x256xf32, #tpu.memory_space<vmem>>, vector<16x256xf32>,
    %c16_i32_96 = arith.constant 16 : i32
    %192 = tpu.dynamic_rotate %185 by %c16_i32_96 dim 1 : vector<16x256xf32>, i32 -> vector<16x256xf32>
    %cst_97 = arith.constant 0.000000e+00 : f32
    %193 = vector.shape_cast %20 : vector<1x256xi1> to vector<1x256xi1>
    %194 = vector.broadcast %193 : vector<1x256xi1> to vector<16x256xi1>
    %195 = vector.broadcast %cst_97 : f32 to vector<16x256xf32>
    %196 = arith.select %194, %192, %195 : vector<16x256xi1>, vector<16x256xf32>
    %c16_98 = arith.constant 16 : index
    %c0_99 = arith.constant 0 : index
    %197 = vector.load %arg5[%c16_98, %c0_99] : memref<256x256xf32, #tpu.memory_space<vmem>>, vector<16x256xf32>
    tpu.vector_store %arg5[%c16_98, %c0_99], %196 {strides = array<i32>} : memref<256x256xf32, #tpu.memory_space<vmem>>, vector<16x256xf32>,
    %c15_i32_100 = arith.constant 15 : i32
    %198 = tpu.dynamic_rotate %185 by %c15_i32_100 dim 1 : vector<16x256xf32>, i32 -> vector<16x256xf32>
    %cst_101 = arith.constant 0.000000e+00 : f32
    %199 = vector.shape_cast %29 : vector<1x256xi1> to vector<1x256xi1>
    %200 = vector.broadcast %199 : vector<1x256xi1> to vector<16x256xi1>
    %201 = vector.broadcast %cst_101 : f32 to vector<16x256xf32>
    %202 = arith.select %200, %198, %201 : vector<16x256xi1>, vector<16x256xf32>
    %c32_102 = arith.constant 32 : index
    %c0_103 = arith.constant 0 : index
    %203 = vector.load %arg5[%c32_102, %c0_103] : memref<256x256xf32, #tpu.memory_space<vmem>>, vector<16x256xf32>
    tpu.vector_store %arg5[%c32_102, %c0_103], %202 {strides = array<i32>} : memref<256x256xf32, #tpu.memory_space<vmem>>, vector<16x256xf32>,
    %c1_i32_104 = arith.constant 1 : i32
    %204 = tpu.dynamic_rotate %185 by %c1_i32_104 dim 1 : vector<16x256xf32>, i32 -> vector<16x256xf32>
    %cst_105 = arith.constant 0.000000e+00 : f32
    %205 = vector.shape_cast %36 : vector<1x256xi1> to vector<1x256xi1>
    %206 = vector.broadcast %205 : vector<1x256xi1> to vector<16x256xi1>
    %207 = vector.broadcast %cst_105 : f32 to vector<16x256xf32>
    %208 = arith.select %206, %204, %207 : vector<16x256xi1>, vector<16x256xf32>
    %c48_106 = arith.constant 48 : index
    %c0_107 = arith.constant 0 : index
    %209 = vector.load %arg5[%c48_106, %c0_107] : memref<256x256xf32, #tpu.memory_space<vmem>>, vector<16x256xf32>
    tpu.vector_store %arg5[%c48_106, %c0_107], %208 {strides = array<i32>} : memref<256x256xf32, #tpu.memory_space<vmem>>, vector<16x256xf32>,
    %c64_108 = arith.constant 64 : index
    %c0_109 = arith.constant 0 : index
    %210 = vector.load %arg5[%c64_108, %c0_109] : memref<256x256xf32, #tpu.memory_space<vmem>>, vector<16x256xf32>
    tpu.vector_store %arg5[%c64_108, %c0_109], %185 {strides = array<i32>} : memref<256x256xf32, #tpu.memory_space<vmem>>, vector<16x256xf32>,
    %c255_i32_110 = arith.constant 255 : i32
    %211 = tpu.dynamic_rotate %185 by %c255_i32_110 dim 1 : vector<16x256xf32>, i32 -> vector<16x256xf32>
    %cst_111 = arith.constant 0.000000e+00 : f32
    %212 = vector.shape_cast %38 : vector<1x256xi1> to vector<1x256xi1>
    %213 = vector.broadcast %212 : vector<1x256xi1> to vector<16x256xi1>
    %214 = vector.broadcast %cst_111 : f32 to vector<16x256xf32>
    %215 = arith.select %213, %211, %214 : vector<16x256xi1>, vector<16x256xf32>
    %c80 = arith.constant 80 : index
    %c0_112 = arith.constant 0 : index
    %216 = vector.load %arg5[%c80, %c0_112] : memref<256x256xf32, #tpu.memory_space<vmem>>, vector<16x256xf32>
    tpu.vector_store %arg5[%c80, %c0_112], %215 {strides = array<i32>} : memref<256x256xf32, #tpu.memory_space<vmem>>, vector<16x256xf32>,
    %c241_i32_113 = arith.constant 241 : i32
    %217 = tpu.dynamic_rotate %185 by %c241_i32_113 dim 1 : vector<16x256xf32>, i32 -> vector<16x256xf32>
    %cst_114 = arith.constant 0.000000e+00 : f32
    %218 = vector.shape_cast %48 : vector<1x256xi1> to vector<1x256xi1>
    %219 = vector.broadcast %218 : vector<1x256xi1> to vector<16x256xi1>
    %220 = vector.broadcast %cst_114 : f32 to vector<16x256xf32>
    %221 = arith.select %219, %217, %220 : vector<16x256xi1>, vector<16x256xf32>
    %c96 = arith.constant 96 : index
    %c0_115 = arith.constant 0 : index
    %222 = vector.load %arg5[%c96, %c0_115] : memref<256x256xf32, #tpu.memory_space<vmem>>, vector<16x256xf32>
    tpu.vector_store %arg5[%c96, %c0_115], %221 {strides = array<i32>} : memref<256x256xf32, #tpu.memory_space<vmem>>, vector<16x256xf32>,
    %c240_i32_116 = arith.constant 240 : i32
    %223 = tpu.dynamic_rotate %185 by %c240_i32_116 dim 1 : vector<16x256xf32>, i32 -> vector<16x256xf32>
    %cst_117 = arith.constant 0.000000e+00 : f32
    %224 = vector.shape_cast %42 : vector<1x256xi1> to vector<1x256xi1>
    %225 = vector.broadcast %224 : vector<1x256xi1> to vector<16x256xi1>
    %226 = vector.broadcast %cst_117 : f32 to vector<16x256xf32>
    %227 = arith.select %225, %223, %226 : vector<16x256xi1>, vector<16x256xf32>
    %c112 = arith.constant 112 : index
    %c0_118 = arith.constant 0 : index
    %228 = vector.load %arg5[%c112, %c0_118] : memref<256x256xf32, #tpu.memory_space<vmem>>, vector<16x256xf32>
    tpu.vector_store %arg5[%c112, %c0_118], %227 {strides = array<i32>} : memref<256x256xf32, #tpu.memory_space<vmem>>, vector<16x256xf32>,
    %c239_i32_119 = arith.constant 239 : i32
    %229 = tpu.dynamic_rotate %185 by %c239_i32_119 dim 1 : vector<16x256xf32>, i32 -> vector<16x256xf32>
    %cst_120 = arith.constant 0.000000e+00 : f32
    %230 = vector.shape_cast %51 : vector<1x256xi1> to vector<1x256xi1>
    %231 = vector.broadcast %230 : vector<1x256xi1> to vector<16x256xi1>
    %232 = vector.broadcast %cst_120 : f32 to vector<16x256xf32>
    %233 = arith.select %231, %229, %232 : vector<16x256xi1>, vector<16x256xf32>
    %c128 = arith.constant 128 : index
    %c0_121 = arith.constant 0 : index
    %234 = vector.load %arg5[%c128, %c0_121] : memref<256x256xf32, #tpu.memory_space<vmem>>, vector<16x256xf32>
    tpu.vector_store %arg5[%c128, %c0_121], %233 {strides = array<i32>} : memref<256x256xf32, #tpu.memory_space<vmem>>, vector<16x256xf32>,
    %c2 = arith.constant 2 : index
    %c0_122 = arith.constant 0 : index
    %c0_123 = arith.constant 0 : index
    %235 = vector.load %arg2[%c2, %c0_122, %c0_123] : memref<11x16x256xf32, #tpu.memory_space<vmem>>, vector<1x8x144xf32>
    %236 = vector.shape_cast %235 : vector<1x8x144xf32> to vector<8x144xf32>
    %c0_124 = arith.constant 0 : index
    %c0_125 = arith.constant 0 : index
    %237 = vector.load %arg5[%c0_124, %c0_125] : memref<256x256xf32, #tpu.memory_space<vmem>>, vector<144x256xf32>
    %cst_126 = arith.constant dense<0.000000e+00> : vector<8x256xf32>
    %238 = tpu.matmul %236, %237, %cst_126 {dimension_numbers = #tpu.dot_dimension_numbers<[1], [0], [0], [1], [0, 0, 1, 1], [], []>} : vector<8x144xf32>, vector<144x256xf32>, vector<8x256xf32> -> vector<8x256xf32>
    %c2_127 = arith.constant 2 : index
    %c0_128 = arith.constant 0 : index
    %c0_129 = arith.constant 0 : index
    %239 = vector.load %arg3[%c2_127, %c0_128, %c0_129] : memref<11x16x1xf32, #tpu.memory_space<vmem>>, vector<1x8x1xf32>
    %240 = vector.shape_cast %239 : vector<1x8x1xf32> to vector<8x1xf32>
    %241 = vector.broadcast %240 : vector<8x1xf32> to vector<8x256xf32>
    %242 = arith.addf %238, %241 : vector<8x256xf32>
    %243 = arith.addf %242, %126 : vector<8x256xf32>
    %c17_i32_130 = arith.constant 17 : i32
    %244 = tpu.dynamic_rotate %243 by %c17_i32_130 dim 1 : vector<8x256xf32>, i32 -> vector<8x256xf32>
    %cst_131 = arith.constant 0.000000e+00 : f32
    %245 = vector.shape_cast %26 : vector<1x256xi1> to vector<1x256xi1>
    %246 = vector.broadcast %245 : vector<1x256xi1> to vector<8x256xi1>
    %247 = vector.broadcast %cst_131 : f32 to vector<8x256xf32>
    %248 = arith.select %246, %244, %247 : vector<8x256xi1>, vector<8x256xf32>
    %c0_132 = arith.constant 0 : index
    %c0_133 = arith.constant 0 : index
    %249 = vector.load %arg5[%c0_132, %c0_133] : memref<256x256xf32, #tpu.memory_space<vmem>>, vector<8x256xf32>
    tpu.vector_store %arg5[%c0_132, %c0_133], %248 {strides = array<i32>} : memref<256x256xf32, #tpu.memory_space<vmem>>, vector<8x256xf32>,
    %c16_i32_134 = arith.constant 16 : i32
    %250 = tpu.dynamic_rotate %243 by %c16_i32_134 dim 1 : vector<8x256xf32>, i32 -> vector<8x256xf32>
    %cst_135 = arith.constant 0.000000e+00 : f32
    %251 = vector.shape_cast %20 : vector<1x256xi1> to vector<1x256xi1>
    %252 = vector.broadcast %251 : vector<1x256xi1> to vector<8x256xi1>
    %253 = vector.broadcast %cst_135 : f32 to vector<8x256xf32>
    %254 = arith.select %252, %250, %253 : vector<8x256xi1>, vector<8x256xf32>
    %c8_136 = arith.constant 8 : index
    %c0_137 = arith.constant 0 : index
    %255 = vector.load %arg5[%c8_136, %c0_137] : memref<256x256xf32, #tpu.memory_space<vmem>>, vector<8x256xf32>
    tpu.vector_store %arg5[%c8_136, %c0_137], %254 {strides = array<i32>} : memref<256x256xf32, #tpu.memory_space<vmem>>, vector<8x256xf32>,
    %c15_i32_138 = arith.constant 15 : i32
    %256 = tpu.dynamic_rotate %243 by %c15_i32_138 dim 1 : vector<8x256xf32>, i32 -> vector<8x256xf32>
    %cst_139 = arith.constant 0.000000e+00 : f32
    %257 = vector.shape_cast %29 : vector<1x256xi1> to vector<1x256xi1>
    %258 = vector.broadcast %257 : vector<1x256xi1> to vector<8x256xi1>
    %259 = vector.broadcast %cst_139 : f32 to vector<8x256xf32>
    %260 = arith.select %258, %256, %259 : vector<8x256xi1>, vector<8x256xf32>
    %c16_140 = arith.constant 16 : index
    %c0_141 = arith.constant 0 : index
    %261 = vector.load %arg5[%c16_140, %c0_141] : memref<256x256xf32, #tpu.memory_space<vmem>>, vector<8x256xf32>
    tpu.vector_store %arg5[%c16_140, %c0_141], %260 {strides = array<i32>} : memref<256x256xf32, #tpu.memory_space<vmem>>, vector<8x256xf32>,
    %c1_i32_142 = arith.constant 1 : i32
    %262 = tpu.dynamic_rotate %243 by %c1_i32_142 dim 1 : vector<8x256xf32>, i32 -> vector<8x256xf32>
    %cst_143 = arith.constant 0.000000e+00 : f32
    %263 = vector.shape_cast %36 : vector<1x256xi1> to vector<1x256xi1>
    %264 = vector.broadcast %263 : vector<1x256xi1> to vector<8x256xi1>
    %265 = vector.broadcast %cst_143 : f32 to vector<8x256xf32>
    %266 = arith.select %264, %262, %265 : vector<8x256xi1>, vector<8x256xf32>
    %c24_144 = arith.constant 24 : index
    %c0_145 = arith.constant 0 : index
    %267 = vector.load %arg5[%c24_144, %c0_145] : memref<256x256xf32, #tpu.memory_space<vmem>>, vector<8x256xf32>
    tpu.vector_store %arg5[%c24_144, %c0_145], %266 {strides = array<i32>} : memref<256x256xf32, #tpu.memory_space<vmem>>, vector<8x256xf32>,
    %c32_146 = arith.constant 32 : index
    %c0_147 = arith.constant 0 : index
    %268 = vector.load %arg5[%c32_146, %c0_147] : memref<256x256xf32, #tpu.memory_space<vmem>>, vector<8x256xf32>
    tpu.vector_store %arg5[%c32_146, %c0_147], %243 {strides = array<i32>} : memref<256x256xf32, #tpu.memory_space<vmem>>, vector<8x256xf32>,
    %c255_i32_148 = arith.constant 255 : i32
    %269 = tpu.dynamic_rotate %243 by %c255_i32_148 dim 1 : vector<8x256xf32>, i32 -> vector<8x256xf32>
    %cst_149 = arith.constant 0.000000e+00 : f32
    %270 = vector.shape_cast %38 : vector<1x256xi1> to vector<1x256xi1>
    %271 = vector.broadcast %270 : vector<1x256xi1> to vector<8x256xi1>
    %272 = vector.broadcast %cst_149 : f32 to vector<8x256xf32>
    %273 = arith.select %271, %269, %272 : vector<8x256xi1>, vector<8x256xf32>
    %c40_150 = arith.constant 40 : index
    %c0_151 = arith.constant 0 : index
    %274 = vector.load %arg5[%c40_150, %c0_151] : memref<256x256xf32, #tpu.memory_space<vmem>>, vector<8x256xf32>
    tpu.vector_store %arg5[%c40_150, %c0_151], %273 {strides = array<i32>} : memref<256x256xf32, #tpu.memory_space<vmem>>, vector<8x256xf32>,
    %c241_i32_152 = arith.constant 241 : i32
    %275 = tpu.dynamic_rotate %243 by %c241_i32_152 dim 1 : vector<8x256xf32>, i32 -> vector<8x256xf32>
    %cst_153 = arith.constant 0.000000e+00 : f32
    %276 = vector.shape_cast %48 : vector<1x256xi1> to vector<1x256xi1>
    %277 = vector.broadcast %276 : vector<1x256xi1> to vector<8x256xi1>
    %278 = vector.broadcast %cst_153 : f32 to vector<8x256xf32>
    %279 = arith.select %277, %275, %278 : vector<8x256xi1>, vector<8x256xf32>
    %c48_154 = arith.constant 48 : index
    %c0_155 = arith.constant 0 : index
    %280 = vector.load %arg5[%c48_154, %c0_155] : memref<256x256xf32, #tpu.memory_space<vmem>>, vector<8x256xf32>
    tpu.vector_store %arg5[%c48_154, %c0_155], %279 {strides = array<i32>} : memref<256x256xf32, #tpu.memory_space<vmem>>, vector<8x256xf32>,
    %c240_i32_156 = arith.constant 240 : i32
    %281 = tpu.dynamic_rotate %243 by %c240_i32_156 dim 1 : vector<8x256xf32>, i32 -> vector<8x256xf32>
    %cst_157 = arith.constant 0.000000e+00 : f32
    %282 = vector.shape_cast %42 : vector<1x256xi1> to vector<1x256xi1>
    %283 = vector.broadcast %282 : vector<1x256xi1> to vector<8x256xi1>
    %284 = vector.broadcast %cst_157 : f32 to vector<8x256xf32>
    %285 = arith.select %283, %281, %284 : vector<8x256xi1>, vector<8x256xf32>
    %c56_158 = arith.constant 56 : index
    %c0_159 = arith.constant 0 : index
    %286 = vector.load %arg5[%c56_158, %c0_159] : memref<256x256xf32, #tpu.memory_space<vmem>>, vector<8x256xf32>
    tpu.vector_store %arg5[%c56_158, %c0_159], %285 {strides = array<i32>} : memref<256x256xf32, #tpu.memory_space<vmem>>, vector<8x256xf32>,
    %c239_i32_160 = arith.constant 239 : i32
    %287 = tpu.dynamic_rotate %243 by %c239_i32_160 dim 1 : vector<8x256xf32>, i32 -> vector<8x256xf32>
    %cst_161 = arith.constant 0.000000e+00 : f32
    %288 = vector.shape_cast %51 : vector<1x256xi1> to vector<1x256xi1>
    %289 = vector.broadcast %288 : vector<1x256xi1> to vector<8x256xi1>
    %290 = vector.broadcast %cst_161 : f32 to vector<8x256xf32>
    %291 = arith.select %289, %287, %290 : vector<8x256xi1>, vector<8x256xf32>
    %c64_162 = arith.constant 64 : index
    %c0_163 = arith.constant 0 : index
    %292 = vector.load %arg5[%c64_162, %c0_163] : memref<256x256xf32, #tpu.memory_space<vmem>>, vector<8x256xf32>
    tpu.vector_store %arg5[%c64_162, %c0_163], %291 {strides = array<i32>} : memref<256x256xf32, #tpu.memory_space<vmem>>, vector<8x256xf32>,
    %c3 = arith.constant 3 : index
    %c0_164 = arith.constant 0 : index
    %c0_165 = arith.constant 0 : index
    %293 = vector.load %arg2[%c3, %c0_164, %c0_165] : memref<11x16x256xf32, #tpu.memory_space<vmem>>, vector<1x16x72xf32>
    %294 = vector.shape_cast %293 : vector<1x16x72xf32> to vector<16x72xf32>
    %c0_166 = arith.constant 0 : index
    %c0_167 = arith.constant 0 : index
    %295 = vector.load %arg5[%c0_166, %c0_167] : memref<256x256xf32, #tpu.memory_space<vmem>>, vector<72x256xf32>
    %cst_168 = arith.constant dense<0.000000e+00> : vector<16x256xf32>
    %296 = tpu.matmul %294, %295, %cst_168 {dimension_numbers = #tpu.dot_dimension_numbers<[1], [0], [0], [1], [0, 0, 1, 1], [], []>} : vector<16x72xf32>, vector<72x256xf32>, vector<16x256xf32> -> vector<16x256xf32>
    %c3_169 = arith.constant 3 : index
    %c0_170 = arith.constant 0 : index
    %c0_171 = arith.constant 0 : index
    %297 = vector.load %arg3[%c3_169, %c0_170, %c0_171] : memref<11x16x1xf32, #tpu.memory_space<vmem>>, vector<1x16x1xf32>
    %298 = vector.shape_cast %297 : vector<1x16x1xf32> to vector<16x1xf32>
    %299 = vector.broadcast %298 : vector<16x1xf32> to vector<16x256xf32>
    %300 = arith.addf %296, %299 : vector<16x256xf32>
    %cst_172 = arith.constant 0.000000e+00 : f32
    %301 = vector.broadcast %cst_172 : f32 to vector<16x256xf32>
    %302 = arith.maximumf %300, %301 : vector<16x256xf32>
    %c17_i32_173 = arith.constant 17 : i32
    %303 = tpu.dynamic_rotate %302 by %c17_i32_173 dim 1 : vector<16x256xf32>, i32 -> vector<16x256xf32>
    %cst_174 = arith.constant 0.000000e+00 : f32
    %304 = vector.shape_cast %26 : vector<1x256xi1> to vector<1x256xi1>
    %305 = vector.broadcast %304 : vector<1x256xi1> to vector<16x256xi1>
    %306 = vector.broadcast %cst_174 : f32 to vector<16x256xf32>
    %307 = arith.select %305, %303, %306 : vector<16x256xi1>, vector<16x256xf32>
    %c0_175 = arith.constant 0 : index
    %c0_176 = arith.constant 0 : index
    %308 = vector.load %arg5[%c0_175, %c0_176] : memref<256x256xf32, #tpu.memory_space<vmem>>, vector<16x256xf32>
    tpu.vector_store %arg5[%c0_175, %c0_176], %307 {strides = array<i32>} : memref<256x256xf32, #tpu.memory_space<vmem>>, vector<16x256xf32>,
    %c16_i32_177 = arith.constant 16 : i32
    %309 = tpu.dynamic_rotate %302 by %c16_i32_177 dim 1 : vector<16x256xf32>, i32 -> vector<16x256xf32>
    %cst_178 = arith.constant 0.000000e+00 : f32
    %310 = vector.shape_cast %20 : vector<1x256xi1> to vector<1x256xi1>
    %311 = vector.broadcast %310 : vector<1x256xi1> to vector<16x256xi1>
    %312 = vector.broadcast %cst_178 : f32 to vector<16x256xf32>
    %313 = arith.select %311, %309, %312 : vector<16x256xi1>, vector<16x256xf32>
    %c16_179 = arith.constant 16 : index
    %c0_180 = arith.constant 0 : index
    %314 = vector.load %arg5[%c16_179, %c0_180] : memref<256x256xf32, #tpu.memory_space<vmem>>, vector<16x256xf32>
    tpu.vector_store %arg5[%c16_179, %c0_180], %313 {strides = array<i32>} : memref<256x256xf32, #tpu.memory_space<vmem>>, vector<16x256xf32>,
    %c15_i32_181 = arith.constant 15 : i32
    %315 = tpu.dynamic_rotate %302 by %c15_i32_181 dim 1 : vector<16x256xf32>, i32 -> vector<16x256xf32>
    %cst_182 = arith.constant 0.000000e+00 : f32
    %316 = vector.shape_cast %29 : vector<1x256xi1> to vector<1x256xi1>
    %317 = vector.broadcast %316 : vector<1x256xi1> to vector<16x256xi1>
    %318 = vector.broadcast %cst_182 : f32 to vector<16x256xf32>
    %319 = arith.select %317, %315, %318 : vector<16x256xi1>, vector<16x256xf32>
    %c32_183 = arith.constant 32 : index
    %c0_184 = arith.constant 0 : index
    %320 = vector.load %arg5[%c32_183, %c0_184] : memref<256x256xf32, #tpu.memory_space<vmem>>, vector<16x256xf32>
    tpu.vector_store %arg5[%c32_183, %c0_184], %319 {strides = array<i32>} : memref<256x256xf32, #tpu.memory_space<vmem>>, vector<16x256xf32>,
    %c1_i32_185 = arith.constant 1 : i32
    %321 = tpu.dynamic_rotate %302 by %c1_i32_185 dim 1 : vector<16x256xf32>, i32 -> vector<16x256xf32>
    %cst_186 = arith.constant 0.000000e+00 : f32
    %322 = vector.shape_cast %36 : vector<1x256xi1> to vector<1x256xi1>
    %323 = vector.broadcast %322 : vector<1x256xi1> to vector<16x256xi1>
    %324 = vector.broadcast %cst_186 : f32 to vector<16x256xf32>
    %325 = arith.select %323, %321, %324 : vector<16x256xi1>, vector<16x256xf32>
    %c48_187 = arith.constant 48 : index
    %c0_188 = arith.constant 0 : index
    %326 = vector.load %arg5[%c48_187, %c0_188] : memref<256x256xf32, #tpu.memory_space<vmem>>, vector<16x256xf32>
    tpu.vector_store %arg5[%c48_187, %c0_188], %325 {strides = array<i32>} : memref<256x256xf32, #tpu.memory_space<vmem>>, vector<16x256xf32>,
    %c64_189 = arith.constant 64 : index
    %c0_190 = arith.constant 0 : index
    %327 = vector.load %arg5[%c64_189, %c0_190] : memref<256x256xf32, #tpu.memory_space<vmem>>, vector<16x256xf32>
    tpu.vector_store %arg5[%c64_189, %c0_190], %302 {strides = array<i32>} : memref<256x256xf32, #tpu.memory_space<vmem>>, vector<16x256xf32>,
    %c255_i32_191 = arith.constant 255 : i32
    %328 = tpu.dynamic_rotate %302 by %c255_i32_191 dim 1 : vector<16x256xf32>, i32 -> vector<16x256xf32>
    %cst_192 = arith.constant 0.000000e+00 : f32
    %329 = vector.shape_cast %38 : vector<1x256xi1> to vector<1x256xi1>
    %330 = vector.broadcast %329 : vector<1x256xi1> to vector<16x256xi1>
    %331 = vector.broadcast %cst_192 : f32 to vector<16x256xf32>
    %332 = arith.select %330, %328, %331 : vector<16x256xi1>, vector<16x256xf32>
    %c80_193 = arith.constant 80 : index
    %c0_194 = arith.constant 0 : index
    %333 = vector.load %arg5[%c80_193, %c0_194] : memref<256x256xf32, #tpu.memory_space<vmem>>, vector<16x256xf32>
    tpu.vector_store %arg5[%c80_193, %c0_194], %332 {strides = array<i32>} : memref<256x256xf32, #tpu.memory_space<vmem>>, vector<16x256xf32>,
    %c241_i32_195 = arith.constant 241 : i32
    %334 = tpu.dynamic_rotate %302 by %c241_i32_195 dim 1 : vector<16x256xf32>, i32 -> vector<16x256xf32>
    %cst_196 = arith.constant 0.000000e+00 : f32
    %335 = vector.shape_cast %48 : vector<1x256xi1> to vector<1x256xi1>
    %336 = vector.broadcast %335 : vector<1x256xi1> to vector<16x256xi1>
    %337 = vector.broadcast %cst_196 : f32 to vector<16x256xf32>
    %338 = arith.select %336, %334, %337 : vector<16x256xi1>, vector<16x256xf32>
    %c96_197 = arith.constant 96 : index
    %c0_198 = arith.constant 0 : index
    %339 = vector.load %arg5[%c96_197, %c0_198] : memref<256x256xf32, #tpu.memory_space<vmem>>, vector<16x256xf32>
    tpu.vector_store %arg5[%c96_197, %c0_198], %338 {strides = array<i32>} : memref<256x256xf32, #tpu.memory_space<vmem>>, vector<16x256xf32>,
    %c240_i32_199 = arith.constant 240 : i32
    %340 = tpu.dynamic_rotate %302 by %c240_i32_199 dim 1 : vector<16x256xf32>, i32 -> vector<16x256xf32>
    %cst_200 = arith.constant 0.000000e+00 : f32
    %341 = vector.shape_cast %42 : vector<1x256xi1> to vector<1x256xi1>
    %342 = vector.broadcast %341 : vector<1x256xi1> to vector<16x256xi1>
    %343 = vector.broadcast %cst_200 : f32 to vector<16x256xf32>
    %344 = arith.select %342, %340, %343 : vector<16x256xi1>, vector<16x256xf32>
    %c112_201 = arith.constant 112 : index
    %c0_202 = arith.constant 0 : index
    %345 = vector.load %arg5[%c112_201, %c0_202] : memref<256x256xf32, #tpu.memory_space<vmem>>, vector<16x256xf32>
    tpu.vector_store %arg5[%c112_201, %c0_202], %344 {strides = array<i32>} : memref<256x256xf32, #tpu.memory_space<vmem>>, vector<16x256xf32>,
    %c239_i32_203 = arith.constant 239 : i32
    %346 = tpu.dynamic_rotate %302 by %c239_i32_203 dim 1 : vector<16x256xf32>, i32 -> vector<16x256xf32>
    %cst_204 = arith.constant 0.000000e+00 : f32
    %347 = vector.shape_cast %51 : vector<1x256xi1> to vector<1x256xi1>
    %348 = vector.broadcast %347 : vector<1x256xi1> to vector<16x256xi1>
    %349 = vector.broadcast %cst_204 : f32 to vector<16x256xf32>
    %350 = arith.select %348, %346, %349 : vector<16x256xi1>, vector<16x256xf32>
    %c128_205 = arith.constant 128 : index
    %c0_206 = arith.constant 0 : index
    %351 = vector.load %arg5[%c128_205, %c0_206] : memref<256x256xf32, #tpu.memory_space<vmem>>, vector<16x256xf32>
    tpu.vector_store %arg5[%c128_205, %c0_206], %350 {strides = array<i32>} : memref<256x256xf32, #tpu.memory_space<vmem>>, vector<16x256xf32>,
    %c4 = arith.constant 4 : index
    %c0_207 = arith.constant 0 : index
    %c0_208 = arith.constant 0 : index
    %352 = vector.load %arg2[%c4, %c0_207, %c0_208] : memref<11x16x256xf32, #tpu.memory_space<vmem>>, vector<1x8x144xf32>
    %353 = vector.shape_cast %352 : vector<1x8x144xf32> to vector<8x144xf32>
    %c0_209 = arith.constant 0 : index
    %c0_210 = arith.constant 0 : index
    %354 = vector.load %arg5[%c0_209, %c0_210] : memref<256x256xf32, #tpu.memory_space<vmem>>, vector<144x256xf32>
    %cst_211 = arith.constant dense<0.000000e+00> : vector<8x256xf32>
    %355 = tpu.matmul %353, %354, %cst_211 {dimension_numbers = #tpu.dot_dimension_numbers<[1], [0], [0], [1], [0, 0, 1, 1], [], []>} : vector<8x144xf32>, vector<144x256xf32>, vector<8x256xf32> -> vector<8x256xf32>
    %c4_212 = arith.constant 4 : index
    %c0_213 = arith.constant 0 : index
    %c0_214 = arith.constant 0 : index
    %356 = vector.load %arg3[%c4_212, %c0_213, %c0_214] : memref<11x16x1xf32, #tpu.memory_space<vmem>>, vector<1x8x1xf32>
    %357 = vector.shape_cast %356 : vector<1x8x1xf32> to vector<8x1xf32>
    %358 = vector.broadcast %357 : vector<8x1xf32> to vector<8x256xf32>
    %359 = arith.addf %355, %358 : vector<8x256xf32>
    %360 = arith.addf %359, %243 : vector<8x256xf32>
    %c17_i32_215 = arith.constant 17 : i32
    %361 = tpu.dynamic_rotate %360 by %c17_i32_215 dim 1 : vector<8x256xf32>, i32 -> vector<8x256xf32>
    %cst_216 = arith.constant 0.000000e+00 : f32
    %362 = vector.shape_cast %26 : vector<1x256xi1> to vector<1x256xi1>
    %363 = vector.broadcast %362 : vector<1x256xi1> to vector<8x256xi1>
    %364 = vector.broadcast %cst_216 : f32 to vector<8x256xf32>
    %365 = arith.select %363, %361, %364 : vector<8x256xi1>, vector<8x256xf32>
    %c0_217 = arith.constant 0 : index
    %c0_218 = arith.constant 0 : index
    %366 = vector.load %arg5[%c0_217, %c0_218] : memref<256x256xf32, #tpu.memory_space<vmem>>, vector<8x256xf32>
    tpu.vector_store %arg5[%c0_217, %c0_218], %365 {strides = array<i32>} : memref<256x256xf32, #tpu.memory_space<vmem>>, vector<8x256xf32>,
    %c16_i32_219 = arith.constant 16 : i32
    %367 = tpu.dynamic_rotate %360 by %c16_i32_219 dim 1 : vector<8x256xf32>, i32 -> vector<8x256xf32>
    %cst_220 = arith.constant 0.000000e+00 : f32
    %368 = vector.shape_cast %20 : vector<1x256xi1> to vector<1x256xi1>
    %369 = vector.broadcast %368 : vector<1x256xi1> to vector<8x256xi1>
    %370 = vector.broadcast %cst_220 : f32 to vector<8x256xf32>
    %371 = arith.select %369, %367, %370 : vector<8x256xi1>, vector<8x256xf32>
    %c8_221 = arith.constant 8 : index
    %c0_222 = arith.constant 0 : index
    %372 = vector.load %arg5[%c8_221, %c0_222] : memref<256x256xf32, #tpu.memory_space<vmem>>, vector<8x256xf32>
    tpu.vector_store %arg5[%c8_221, %c0_222], %371 {strides = array<i32>} : memref<256x256xf32, #tpu.memory_space<vmem>>, vector<8x256xf32>,
    %c15_i32_223 = arith.constant 15 : i32
    %373 = tpu.dynamic_rotate %360 by %c15_i32_223 dim 1 : vector<8x256xf32>, i32 -> vector<8x256xf32>
    %cst_224 = arith.constant 0.000000e+00 : f32
    %374 = vector.shape_cast %29 : vector<1x256xi1> to vector<1x256xi1>
    %375 = vector.broadcast %374 : vector<1x256xi1> to vector<8x256xi1>
    %376 = vector.broadcast %cst_224 : f32 to vector<8x256xf32>
    %377 = arith.select %375, %373, %376 : vector<8x256xi1>, vector<8x256xf32>
    %c16_225 = arith.constant 16 : index
    %c0_226 = arith.constant 0 : index
    %378 = vector.load %arg5[%c16_225, %c0_226] : memref<256x256xf32, #tpu.memory_space<vmem>>, vector<8x256xf32>
    tpu.vector_store %arg5[%c16_225, %c0_226], %377 {strides = array<i32>} : memref<256x256xf32, #tpu.memory_space<vmem>>, vector<8x256xf32>,
    %c1_i32_227 = arith.constant 1 : i32
    %379 = tpu.dynamic_rotate %360 by %c1_i32_227 dim 1 : vector<8x256xf32>, i32 -> vector<8x256xf32>
    %cst_228 = arith.constant 0.000000e+00 : f32
    %380 = vector.shape_cast %36 : vector<1x256xi1> to vector<1x256xi1>
    %381 = vector.broadcast %380 : vector<1x256xi1> to vector<8x256xi1>
    %382 = vector.broadcast %cst_228 : f32 to vector<8x256xf32>
    %383 = arith.select %381, %379, %382 : vector<8x256xi1>, vector<8x256xf32>
    %c24_229 = arith.constant 24 : index
    %c0_230 = arith.constant 0 : index
    %384 = vector.load %arg5[%c24_229, %c0_230] : memref<256x256xf32, #tpu.memory_space<vmem>>, vector<8x256xf32>
    tpu.vector_store %arg5[%c24_229, %c0_230], %383 {strides = array<i32>} : memref<256x256xf32, #tpu.memory_space<vmem>>, vector<8x256xf32>,
    %c32_231 = arith.constant 32 : index
    %c0_232 = arith.constant 0 : index
    %385 = vector.load %arg5[%c32_231, %c0_232] : memref<256x256xf32, #tpu.memory_space<vmem>>, vector<8x256xf32>
    tpu.vector_store %arg5[%c32_231, %c0_232], %360 {strides = array<i32>} : memref<256x256xf32, #tpu.memory_space<vmem>>, vector<8x256xf32>,
    %c255_i32_233 = arith.constant 255 : i32
    %386 = tpu.dynamic_rotate %360 by %c255_i32_233 dim 1 : vector<8x256xf32>, i32 -> vector<8x256xf32>
    %cst_234 = arith.constant 0.000000e+00 : f32
    %387 = vector.shape_cast %38 : vector<1x256xi1> to vector<1x256xi1>
    %388 = vector.broadcast %387 : vector<1x256xi1> to vector<8x256xi1>
    %389 = vector.broadcast %cst_234 : f32 to vector<8x256xf32>
    %390 = arith.select %388, %386, %389 : vector<8x256xi1>, vector<8x256xf32>
    %c40_235 = arith.constant 40 : index
    %c0_236 = arith.constant 0 : index
    %391 = vector.load %arg5[%c40_235, %c0_236] : memref<256x256xf32, #tpu.memory_space<vmem>>, vector<8x256xf32>
    tpu.vector_store %arg5[%c40_235, %c0_236], %390 {strides = array<i32>} : memref<256x256xf32, #tpu.memory_space<vmem>>, vector<8x256xf32>,
    %c241_i32_237 = arith.constant 241 : i32
    %392 = tpu.dynamic_rotate %360 by %c241_i32_237 dim 1 : vector<8x256xf32>, i32 -> vector<8x256xf32>
    %cst_238 = arith.constant 0.000000e+00 : f32
    %393 = vector.shape_cast %48 : vector<1x256xi1> to vector<1x256xi1>
    %394 = vector.broadcast %393 : vector<1x256xi1> to vector<8x256xi1>
    %395 = vector.broadcast %cst_238 : f32 to vector<8x256xf32>
    %396 = arith.select %394, %392, %395 : vector<8x256xi1>, vector<8x256xf32>
    %c48_239 = arith.constant 48 : index
    %c0_240 = arith.constant 0 : index
    %397 = vector.load %arg5[%c48_239, %c0_240] : memref<256x256xf32, #tpu.memory_space<vmem>>, vector<8x256xf32>
    tpu.vector_store %arg5[%c48_239, %c0_240], %396 {strides = array<i32>} : memref<256x256xf32, #tpu.memory_space<vmem>>, vector<8x256xf32>,
    %c240_i32_241 = arith.constant 240 : i32
    %398 = tpu.dynamic_rotate %360 by %c240_i32_241 dim 1 : vector<8x256xf32>, i32 -> vector<8x256xf32>
    %cst_242 = arith.constant 0.000000e+00 : f32
    %399 = vector.shape_cast %42 : vector<1x256xi1> to vector<1x256xi1>
    %400 = vector.broadcast %399 : vector<1x256xi1> to vector<8x256xi1>
    %401 = vector.broadcast %cst_242 : f32 to vector<8x256xf32>
    %402 = arith.select %400, %398, %401 : vector<8x256xi1>, vector<8x256xf32>
    %c56_243 = arith.constant 56 : index
    %c0_244 = arith.constant 0 : index
    %403 = vector.load %arg5[%c56_243, %c0_244] : memref<256x256xf32, #tpu.memory_space<vmem>>, vector<8x256xf32>
    tpu.vector_store %arg5[%c56_243, %c0_244], %402 {strides = array<i32>} : memref<256x256xf32, #tpu.memory_space<vmem>>, vector<8x256xf32>,
    %c239_i32_245 = arith.constant 239 : i32
    %404 = tpu.dynamic_rotate %360 by %c239_i32_245 dim 1 : vector<8x256xf32>, i32 -> vector<8x256xf32>
    %cst_246 = arith.constant 0.000000e+00 : f32
    %405 = vector.shape_cast %51 : vector<1x256xi1> to vector<1x256xi1>
    %406 = vector.broadcast %405 : vector<1x256xi1> to vector<8x256xi1>
    %407 = vector.broadcast %cst_246 : f32 to vector<8x256xf32>
    %408 = arith.select %406, %404, %407 : vector<8x256xi1>, vector<8x256xf32>
    %c64_247 = arith.constant 64 : index
    %c0_248 = arith.constant 0 : index
    %409 = vector.load %arg5[%c64_247, %c0_248] : memref<256x256xf32, #tpu.memory_space<vmem>>, vector<8x256xf32>
    tpu.vector_store %arg5[%c64_247, %c0_248], %408 {strides = array<i32>} : memref<256x256xf32, #tpu.memory_space<vmem>>, vector<8x256xf32>,
    %c5 = arith.constant 5 : index
    %c0_249 = arith.constant 0 : index
    %c0_250 = arith.constant 0 : index
    %410 = vector.load %arg2[%c5, %c0_249, %c0_250] : memref<11x16x256xf32, #tpu.memory_space<vmem>>, vector<1x16x72xf32>
    %411 = vector.shape_cast %410 : vector<1x16x72xf32> to vector<16x72xf32>
    %c0_251 = arith.constant 0 : index
    %c0_252 = arith.constant 0 : index
    %412 = vector.load %arg5[%c0_251, %c0_252] : memref<256x256xf32, #tpu.memory_space<vmem>>, vector<72x256xf32>
    %cst_253 = arith.constant dense<0.000000e+00> : vector<16x256xf32>
    %413 = tpu.matmul %411, %412, %cst_253 {dimension_numbers = #tpu.dot_dimension_numbers<[1], [0], [0], [1], [0, 0, 1, 1], [], []>} : vector<16x72xf32>, vector<72x256xf32>, vector<16x256xf32> -> vector<16x256xf32>
    %c5_254 = arith.constant 5 : index
    %c0_255 = arith.constant 0 : index
    %c0_256 = arith.constant 0 : index
    %414 = vector.load %arg3[%c5_254, %c0_255, %c0_256] : memref<11x16x1xf32, #tpu.memory_space<vmem>>, vector<1x16x1xf32>
    %415 = vector.shape_cast %414 : vector<1x16x1xf32> to vector<16x1xf32>
    %416 = vector.broadcast %415 : vector<16x1xf32> to vector<16x256xf32>
    %417 = arith.addf %413, %416 : vector<16x256xf32>
    %cst_257 = arith.constant 0.000000e+00 : f32
    %418 = vector.broadcast %cst_257 : f32 to vector<16x256xf32>
    %419 = arith.maximumf %417, %418 : vector<16x256xf32>
    %c17_i32_258 = arith.constant 17 : i32
    %420 = tpu.dynamic_rotate %419 by %c17_i32_258 dim 1 : vector<16x256xf32>, i32 -> vector<16x256xf32>
    %cst_259 = arith.constant 0.000000e+00 : f32
    %421 = vector.shape_cast %26 : vector<1x256xi1> to vector<1x256xi1>
    %422 = vector.broadcast %421 : vector<1x256xi1> to vector<16x256xi1>
    %423 = vector.broadcast %cst_259 : f32 to vector<16x256xf32>
    %424 = arith.select %422, %420, %423 : vector<16x256xi1>, vector<16x256xf32>
    %c0_260 = arith.constant 0 : index
    %c0_261 = arith.constant 0 : index
    %425 = vector.load %arg5[%c0_260, %c0_261] : memref<256x256xf32, #tpu.memory_space<vmem>>, vector<16x256xf32>
    tpu.vector_store %arg5[%c0_260, %c0_261], %424 {strides = array<i32>} : memref<256x256xf32, #tpu.memory_space<vmem>>, vector<16x256xf32>,
    %c16_i32_262 = arith.constant 16 : i32
    %426 = tpu.dynamic_rotate %419 by %c16_i32_262 dim 1 : vector<16x256xf32>, i32 -> vector<16x256xf32>
    %cst_263 = arith.constant 0.000000e+00 : f32
    %427 = vector.shape_cast %20 : vector<1x256xi1> to vector<1x256xi1>
    %428 = vector.broadcast %427 : vector<1x256xi1> to vector<16x256xi1>
    %429 = vector.broadcast %cst_263 : f32 to vector<16x256xf32>
    %430 = arith.select %428, %426, %429 : vector<16x256xi1>, vector<16x256xf32>
    %c16_264 = arith.constant 16 : index
    %c0_265 = arith.constant 0 : index
    %431 = vector.load %arg5[%c16_264, %c0_265] : memref<256x256xf32, #tpu.memory_space<vmem>>, vector<16x256xf32>
    tpu.vector_store %arg5[%c16_264, %c0_265], %430 {strides = array<i32>} : memref<256x256xf32, #tpu.memory_space<vmem>>, vector<16x256xf32>,
    %c15_i32_266 = arith.constant 15 : i32
    %432 = tpu.dynamic_rotate %419 by %c15_i32_266 dim 1 : vector<16x256xf32>, i32 -> vector<16x256xf32>
    %cst_267 = arith.constant 0.000000e+00 : f32
    %433 = vector.shape_cast %29 : vector<1x256xi1> to vector<1x256xi1>
    %434 = vector.broadcast %433 : vector<1x256xi1> to vector<16x256xi1>
    %435 = vector.broadcast %cst_267 : f32 to vector<16x256xf32>
    %436 = arith.select %434, %432, %435 : vector<16x256xi1>, vector<16x256xf32>
    %c32_268 = arith.constant 32 : index
    %c0_269 = arith.constant 0 : index
    %437 = vector.load %arg5[%c32_268, %c0_269] : memref<256x256xf32, #tpu.memory_space<vmem>>, vector<16x256xf32>
    tpu.vector_store %arg5[%c32_268, %c0_269], %436 {strides = array<i32>} : memref<256x256xf32, #tpu.memory_space<vmem>>, vector<16x256xf32>,
    %c1_i32_270 = arith.constant 1 : i32
    %438 = tpu.dynamic_rotate %419 by %c1_i32_270 dim 1 : vector<16x256xf32>, i32 -> vector<16x256xf32>
    %cst_271 = arith.constant 0.000000e+00 : f32
    %439 = vector.shape_cast %36 : vector<1x256xi1> to vector<1x256xi1>
    %440 = vector.broadcast %439 : vector<1x256xi1> to vector<16x256xi1>
    %441 = vector.broadcast %cst_271 : f32 to vector<16x256xf32>
    %442 = arith.select %440, %438, %441 : vector<16x256xi1>, vector<16x256xf32>
    %c48_272 = arith.constant 48 : index
    %c0_273 = arith.constant 0 : index
    %443 = vector.load %arg5[%c48_272, %c0_273] : memref<256x256xf32, #tpu.memory_space<vmem>>, vector<16x256xf32>
    tpu.vector_store %arg5[%c48_272, %c0_273], %442 {strides = array<i32>} : memref<256x256xf32, #tpu.memory_space<vmem>>, vector<16x256xf32>,
    %c64_274 = arith.constant 64 : index
    %c0_275 = arith.constant 0 : index
    %444 = vector.load %arg5[%c64_274, %c0_275] : memref<256x256xf32, #tpu.memory_space<vmem>>, vector<16x256xf32>
    tpu.vector_store %arg5[%c64_274, %c0_275], %419 {strides = array<i32>} : memref<256x256xf32, #tpu.memory_space<vmem>>, vector<16x256xf32>,
    %c255_i32_276 = arith.constant 255 : i32
    %445 = tpu.dynamic_rotate %419 by %c255_i32_276 dim 1 : vector<16x256xf32>, i32 -> vector<16x256xf32>
    %cst_277 = arith.constant 0.000000e+00 : f32
    %446 = vector.shape_cast %38 : vector<1x256xi1> to vector<1x256xi1>
    %447 = vector.broadcast %446 : vector<1x256xi1> to vector<16x256xi1>
    %448 = vector.broadcast %cst_277 : f32 to vector<16x256xf32>
    %449 = arith.select %447, %445, %448 : vector<16x256xi1>, vector<16x256xf32>
    %c80_278 = arith.constant 80 : index
    %c0_279 = arith.constant 0 : index
    %450 = vector.load %arg5[%c80_278, %c0_279] : memref<256x256xf32, #tpu.memory_space<vmem>>, vector<16x256xf32>
    tpu.vector_store %arg5[%c80_278, %c0_279], %449 {strides = array<i32>} : memref<256x256xf32, #tpu.memory_space<vmem>>, vector<16x256xf32>,
    %c241_i32_280 = arith.constant 241 : i32
    %451 = tpu.dynamic_rotate %419 by %c241_i32_280 dim 1 : vector<16x256xf32>, i32 -> vector<16x256xf32>
    %cst_281 = arith.constant 0.000000e+00 : f32
    %452 = vector.shape_cast %48 : vector<1x256xi1> to vector<1x256xi1>
    %453 = vector.broadcast %452 : vector<1x256xi1> to vector<16x256xi1>
    %454 = vector.broadcast %cst_281 : f32 to vector<16x256xf32>
    %455 = arith.select %453, %451, %454 : vector<16x256xi1>, vector<16x256xf32>
    %c96_282 = arith.constant 96 : index
    %c0_283 = arith.constant 0 : index
    %456 = vector.load %arg5[%c96_282, %c0_283] : memref<256x256xf32, #tpu.memory_space<vmem>>, vector<16x256xf32>
    tpu.vector_store %arg5[%c96_282, %c0_283], %455 {strides = array<i32>} : memref<256x256xf32, #tpu.memory_space<vmem>>, vector<16x256xf32>,
    %c240_i32_284 = arith.constant 240 : i32
    %457 = tpu.dynamic_rotate %419 by %c240_i32_284 dim 1 : vector<16x256xf32>, i32 -> vector<16x256xf32>
    %cst_285 = arith.constant 0.000000e+00 : f32
    %458 = vector.shape_cast %42 : vector<1x256xi1> to vector<1x256xi1>
    %459 = vector.broadcast %458 : vector<1x256xi1> to vector<16x256xi1>
    %460 = vector.broadcast %cst_285 : f32 to vector<16x256xf32>
    %461 = arith.select %459, %457, %460 : vector<16x256xi1>, vector<16x256xf32>
    %c112_286 = arith.constant 112 : index
    %c0_287 = arith.constant 0 : index
    %462 = vector.load %arg5[%c112_286, %c0_287] : memref<256x256xf32, #tpu.memory_space<vmem>>, vector<16x256xf32>
    tpu.vector_store %arg5[%c112_286, %c0_287], %461 {strides = array<i32>} : memref<256x256xf32, #tpu.memory_space<vmem>>, vector<16x256xf32>,
    %c239_i32_288 = arith.constant 239 : i32
    %463 = tpu.dynamic_rotate %419 by %c239_i32_288 dim 1 : vector<16x256xf32>, i32 -> vector<16x256xf32>
    %cst_289 = arith.constant 0.000000e+00 : f32
    %464 = vector.shape_cast %51 : vector<1x256xi1> to vector<1x256xi1>
    %465 = vector.broadcast %464 : vector<1x256xi1> to vector<16x256xi1>
    %466 = vector.broadcast %cst_289 : f32 to vector<16x256xf32>
    %467 = arith.select %465, %463, %466 : vector<16x256xi1>, vector<16x256xf32>
    %c128_290 = arith.constant 128 : index
    %c0_291 = arith.constant 0 : index
    %468 = vector.load %arg5[%c128_290, %c0_291] : memref<256x256xf32, #tpu.memory_space<vmem>>, vector<16x256xf32>
    tpu.vector_store %arg5[%c128_290, %c0_291], %467 {strides = array<i32>} : memref<256x256xf32, #tpu.memory_space<vmem>>, vector<16x256xf32>,
    %c6 = arith.constant 6 : index
    %c0_292 = arith.constant 0 : index
    %c0_293 = arith.constant 0 : index
    %469 = vector.load %arg2[%c6, %c0_292, %c0_293] : memref<11x16x256xf32, #tpu.memory_space<vmem>>, vector<1x8x144xf32>
    %470 = vector.shape_cast %469 : vector<1x8x144xf32> to vector<8x144xf32>
    %c0_294 = arith.constant 0 : index
    %c0_295 = arith.constant 0 : index
    %471 = vector.load %arg5[%c0_294, %c0_295] : memref<256x256xf32, #tpu.memory_space<vmem>>, vector<144x256xf32>
    %cst_296 = arith.constant dense<0.000000e+00> : vector<8x256xf32>
    %472 = tpu.matmul %470, %471, %cst_296 {dimension_numbers = #tpu.dot_dimension_numbers<[1], [0], [0], [1], [0, 0, 1, 1], [], []>} : vector<8x144xf32>, vector<144x256xf32>, vector<8x256xf32> -> vector<8x256xf32>
    %c6_297 = arith.constant 6 : index
    %c0_298 = arith.constant 0 : index
    %c0_299 = arith.constant 0 : index
    %473 = vector.load %arg3[%c6_297, %c0_298, %c0_299] : memref<11x16x1xf32, #tpu.memory_space<vmem>>, vector<1x8x1xf32>
    %474 = vector.shape_cast %473 : vector<1x8x1xf32> to vector<8x1xf32>
    %475 = vector.broadcast %474 : vector<8x1xf32> to vector<8x256xf32>
    %476 = arith.addf %472, %475 : vector<8x256xf32>
    %477 = arith.addf %476, %360 : vector<8x256xf32>
    %c17_i32_300 = arith.constant 17 : i32
    %478 = tpu.dynamic_rotate %477 by %c17_i32_300 dim 1 : vector<8x256xf32>, i32 -> vector<8x256xf32>
    %cst_301 = arith.constant 0.000000e+00 : f32
    %479 = vector.shape_cast %26 : vector<1x256xi1> to vector<1x256xi1>
    %480 = vector.broadcast %479 : vector<1x256xi1> to vector<8x256xi1>
    %481 = vector.broadcast %cst_301 : f32 to vector<8x256xf32>
    %482 = arith.select %480, %478, %481 : vector<8x256xi1>, vector<8x256xf32>
    %c0_302 = arith.constant 0 : index
    %c0_303 = arith.constant 0 : index
    %483 = vector.load %arg5[%c0_302, %c0_303] : memref<256x256xf32, #tpu.memory_space<vmem>>, vector<8x256xf32>
    tpu.vector_store %arg5[%c0_302, %c0_303], %482 {strides = array<i32>} : memref<256x256xf32, #tpu.memory_space<vmem>>, vector<8x256xf32>,
    %c16_i32_304 = arith.constant 16 : i32
    %484 = tpu.dynamic_rotate %477 by %c16_i32_304 dim 1 : vector<8x256xf32>, i32 -> vector<8x256xf32>
    %cst_305 = arith.constant 0.000000e+00 : f32
    %485 = vector.shape_cast %20 : vector<1x256xi1> to vector<1x256xi1>
    %486 = vector.broadcast %485 : vector<1x256xi1> to vector<8x256xi1>
    %487 = vector.broadcast %cst_305 : f32 to vector<8x256xf32>
    %488 = arith.select %486, %484, %487 : vector<8x256xi1>, vector<8x256xf32>
    %c8_306 = arith.constant 8 : index
    %c0_307 = arith.constant 0 : index
    %489 = vector.load %arg5[%c8_306, %c0_307] : memref<256x256xf32, #tpu.memory_space<vmem>>, vector<8x256xf32>
    tpu.vector_store %arg5[%c8_306, %c0_307], %488 {strides = array<i32>} : memref<256x256xf32, #tpu.memory_space<vmem>>, vector<8x256xf32>,
    %c15_i32_308 = arith.constant 15 : i32
    %490 = tpu.dynamic_rotate %477 by %c15_i32_308 dim 1 : vector<8x256xf32>, i32 -> vector<8x256xf32>
    %cst_309 = arith.constant 0.000000e+00 : f32
    %491 = vector.shape_cast %29 : vector<1x256xi1> to vector<1x256xi1>
    %492 = vector.broadcast %491 : vector<1x256xi1> to vector<8x256xi1>
    %493 = vector.broadcast %cst_309 : f32 to vector<8x256xf32>
    %494 = arith.select %492, %490, %493 : vector<8x256xi1>, vector<8x256xf32>
    %c16_310 = arith.constant 16 : index
    %c0_311 = arith.constant 0 : index
    %495 = vector.load %arg5[%c16_310, %c0_311] : memref<256x256xf32, #tpu.memory_space<vmem>>, vector<8x256xf32>
    tpu.vector_store %arg5[%c16_310, %c0_311], %494 {strides = array<i32>} : memref<256x256xf32, #tpu.memory_space<vmem>>, vector<8x256xf32>,
    %c1_i32_312 = arith.constant 1 : i32
    %496 = tpu.dynamic_rotate %477 by %c1_i32_312 dim 1 : vector<8x256xf32>, i32 -> vector<8x256xf32>
    %cst_313 = arith.constant 0.000000e+00 : f32
    %497 = vector.shape_cast %36 : vector<1x256xi1> to vector<1x256xi1>
    %498 = vector.broadcast %497 : vector<1x256xi1> to vector<8x256xi1>
    %499 = vector.broadcast %cst_313 : f32 to vector<8x256xf32>
    %500 = arith.select %498, %496, %499 : vector<8x256xi1>, vector<8x256xf32>
    %c24_314 = arith.constant 24 : index
    %c0_315 = arith.constant 0 : index
    %501 = vector.load %arg5[%c24_314, %c0_315] : memref<256x256xf32, #tpu.memory_space<vmem>>, vector<8x256xf32>
    tpu.vector_store %arg5[%c24_314, %c0_315], %500 {strides = array<i32>} : memref<256x256xf32, #tpu.memory_space<vmem>>, vector<8x256xf32>,
    %c32_316 = arith.constant 32 : index
    %c0_317 = arith.constant 0 : index
    %502 = vector.load %arg5[%c32_316, %c0_317] : memref<256x256xf32, #tpu.memory_space<vmem>>, vector<8x256xf32>
    tpu.vector_store %arg5[%c32_316, %c0_317], %477 {strides = array<i32>} : memref<256x256xf32, #tpu.memory_space<vmem>>, vector<8x256xf32>,
    %c255_i32_318 = arith.constant 255 : i32
    %503 = tpu.dynamic_rotate %477 by %c255_i32_318 dim 1 : vector<8x256xf32>, i32 -> vector<8x256xf32>
    %cst_319 = arith.constant 0.000000e+00 : f32
    %504 = vector.shape_cast %38 : vector<1x256xi1> to vector<1x256xi1>
    %505 = vector.broadcast %504 : vector<1x256xi1> to vector<8x256xi1>
    %506 = vector.broadcast %cst_319 : f32 to vector<8x256xf32>
    %507 = arith.select %505, %503, %506 : vector<8x256xi1>, vector<8x256xf32>
    %c40_320 = arith.constant 40 : index
    %c0_321 = arith.constant 0 : index
    %508 = vector.load %arg5[%c40_320, %c0_321] : memref<256x256xf32, #tpu.memory_space<vmem>>, vector<8x256xf32>
    tpu.vector_store %arg5[%c40_320, %c0_321], %507 {strides = array<i32>} : memref<256x256xf32, #tpu.memory_space<vmem>>, vector<8x256xf32>,
    %c241_i32_322 = arith.constant 241 : i32
    %509 = tpu.dynamic_rotate %477 by %c241_i32_322 dim 1 : vector<8x256xf32>, i32 -> vector<8x256xf32>
    %cst_323 = arith.constant 0.000000e+00 : f32
    %510 = vector.shape_cast %48 : vector<1x256xi1> to vector<1x256xi1>
    %511 = vector.broadcast %510 : vector<1x256xi1> to vector<8x256xi1>
    %512 = vector.broadcast %cst_323 : f32 to vector<8x256xf32>
    %513 = arith.select %511, %509, %512 : vector<8x256xi1>, vector<8x256xf32>
    %c48_324 = arith.constant 48 : index
    %c0_325 = arith.constant 0 : index
    %514 = vector.load %arg5[%c48_324, %c0_325] : memref<256x256xf32, #tpu.memory_space<vmem>>, vector<8x256xf32>
    tpu.vector_store %arg5[%c48_324, %c0_325], %513 {strides = array<i32>} : memref<256x256xf32, #tpu.memory_space<vmem>>, vector<8x256xf32>,
    %c240_i32_326 = arith.constant 240 : i32
    %515 = tpu.dynamic_rotate %477 by %c240_i32_326 dim 1 : vector<8x256xf32>, i32 -> vector<8x256xf32>
    %cst_327 = arith.constant 0.000000e+00 : f32
    %516 = vector.shape_cast %42 : vector<1x256xi1> to vector<1x256xi1>
    %517 = vector.broadcast %516 : vector<1x256xi1> to vector<8x256xi1>
    %518 = vector.broadcast %cst_327 : f32 to vector<8x256xf32>
    %519 = arith.select %517, %515, %518 : vector<8x256xi1>, vector<8x256xf32>
    %c56_328 = arith.constant 56 : index
    %c0_329 = arith.constant 0 : index
    %520 = vector.load %arg5[%c56_328, %c0_329] : memref<256x256xf32, #tpu.memory_space<vmem>>, vector<8x256xf32>
    tpu.vector_store %arg5[%c56_328, %c0_329], %519 {strides = array<i32>} : memref<256x256xf32, #tpu.memory_space<vmem>>, vector<8x256xf32>,
    %c239_i32_330 = arith.constant 239 : i32
    %521 = tpu.dynamic_rotate %477 by %c239_i32_330 dim 1 : vector<8x256xf32>, i32 -> vector<8x256xf32>
    %cst_331 = arith.constant 0.000000e+00 : f32
    %522 = vector.shape_cast %51 : vector<1x256xi1> to vector<1x256xi1>
    %523 = vector.broadcast %522 : vector<1x256xi1> to vector<8x256xi1>
    %524 = vector.broadcast %cst_331 : f32 to vector<8x256xf32>
    %525 = arith.select %523, %521, %524 : vector<8x256xi1>, vector<8x256xf32>
    %c64_332 = arith.constant 64 : index
    %c0_333 = arith.constant 0 : index
    %526 = vector.load %arg5[%c64_332, %c0_333] : memref<256x256xf32, #tpu.memory_space<vmem>>, vector<8x256xf32>
    tpu.vector_store %arg5[%c64_332, %c0_333], %525 {strides = array<i32>} : memref<256x256xf32, #tpu.memory_space<vmem>>, vector<8x256xf32>,
    %c7 = arith.constant 7 : index
    %c0_334 = arith.constant 0 : index
    %c0_335 = arith.constant 0 : index
    %527 = vector.load %arg2[%c7, %c0_334, %c0_335] : memref<11x16x256xf32, #tpu.memory_space<vmem>>, vector<1x16x72xf32>
    %528 = vector.shape_cast %527 : vector<1x16x72xf32> to vector<16x72xf32>
    %c0_336 = arith.constant 0 : index
    %c0_337 = arith.constant 0 : index
    %529 = vector.load %arg5[%c0_336, %c0_337] : memref<256x256xf32, #tpu.memory_space<vmem>>, vector<72x256xf32>
    %cst_338 = arith.constant dense<0.000000e+00> : vector<16x256xf32>
    %530 = tpu.matmul %528, %529, %cst_338 {dimension_numbers = #tpu.dot_dimension_numbers<[1], [0], [0], [1], [0, 0, 1, 1], [], []>} : vector<16x72xf32>, vector<72x256xf32>, vector<16x256xf32> -> vector<16x256xf32>
    %c7_339 = arith.constant 7 : index
    %c0_340 = arith.constant 0 : index
    %c0_341 = arith.constant 0 : index
    %531 = vector.load %arg3[%c7_339, %c0_340, %c0_341] : memref<11x16x1xf32, #tpu.memory_space<vmem>>, vector<1x16x1xf32>
    %532 = vector.shape_cast %531 : vector<1x16x1xf32> to vector<16x1xf32>
    %533 = vector.broadcast %532 : vector<16x1xf32> to vector<16x256xf32>
    %534 = arith.addf %530, %533 : vector<16x256xf32>
    %cst_342 = arith.constant 0.000000e+00 : f32
    %535 = vector.broadcast %cst_342 : f32 to vector<16x256xf32>
    %536 = arith.maximumf %534, %535 : vector<16x256xf32>
    %c17_i32_343 = arith.constant 17 : i32
    %537 = tpu.dynamic_rotate %536 by %c17_i32_343 dim 1 : vector<16x256xf32>, i32 -> vector<16x256xf32>
    %cst_344 = arith.constant 0.000000e+00 : f32
    %538 = vector.shape_cast %26 : vector<1x256xi1> to vector<1x256xi1>
    %539 = vector.broadcast %538 : vector<1x256xi1> to vector<16x256xi1>
    %540 = vector.broadcast %cst_344 : f32 to vector<16x256xf32>
    %541 = arith.select %539, %537, %540 : vector<16x256xi1>, vector<16x256xf32>
    %c0_345 = arith.constant 0 : index
    %c0_346 = arith.constant 0 : index
    %542 = vector.load %arg5[%c0_345, %c0_346] : memref<256x256xf32, #tpu.memory_space<vmem>>, vector<16x256xf32>
    tpu.vector_store %arg5[%c0_345, %c0_346], %541 {strides = array<i32>} : memref<256x256xf32, #tpu.memory_space<vmem>>, vector<16x256xf32>,
    %c16_i32_347 = arith.constant 16 : i32
    %543 = tpu.dynamic_rotate %536 by %c16_i32_347 dim 1 : vector<16x256xf32>, i32 -> vector<16x256xf32>
    %cst_348 = arith.constant 0.000000e+00 : f32
    %544 = vector.shape_cast %20 : vector<1x256xi1> to vector<1x256xi1>
    %545 = vector.broadcast %544 : vector<1x256xi1> to vector<16x256xi1>
    %546 = vector.broadcast %cst_348 : f32 to vector<16x256xf32>
    %547 = arith.select %545, %543, %546 : vector<16x256xi1>, vector<16x256xf32>
    %c16_349 = arith.constant 16 : index
    %c0_350 = arith.constant 0 : index
    %548 = vector.load %arg5[%c16_349, %c0_350] : memref<256x256xf32, #tpu.memory_space<vmem>>, vector<16x256xf32>
    tpu.vector_store %arg5[%c16_349, %c0_350], %547 {strides = array<i32>} : memref<256x256xf32, #tpu.memory_space<vmem>>, vector<16x256xf32>,
    %c15_i32_351 = arith.constant 15 : i32
    %549 = tpu.dynamic_rotate %536 by %c15_i32_351 dim 1 : vector<16x256xf32>, i32 -> vector<16x256xf32>
    %cst_352 = arith.constant 0.000000e+00 : f32
    %550 = vector.shape_cast %29 : vector<1x256xi1> to vector<1x256xi1>
    %551 = vector.broadcast %550 : vector<1x256xi1> to vector<16x256xi1>
    %552 = vector.broadcast %cst_352 : f32 to vector<16x256xf32>
    %553 = arith.select %551, %549, %552 : vector<16x256xi1>, vector<16x256xf32>
    %c32_353 = arith.constant 32 : index
    %c0_354 = arith.constant 0 : index
    %554 = vector.load %arg5[%c32_353, %c0_354] : memref<256x256xf32, #tpu.memory_space<vmem>>, vector<16x256xf32>
    tpu.vector_store %arg5[%c32_353, %c0_354], %553 {strides = array<i32>} : memref<256x256xf32, #tpu.memory_space<vmem>>, vector<16x256xf32>,
    %c1_i32_355 = arith.constant 1 : i32
    %555 = tpu.dynamic_rotate %536 by %c1_i32_355 dim 1 : vector<16x256xf32>, i32 -> vector<16x256xf32>
    %cst_356 = arith.constant 0.000000e+00 : f32
    %556 = vector.shape_cast %36 : vector<1x256xi1> to vector<1x256xi1>
    %557 = vector.broadcast %556 : vector<1x256xi1> to vector<16x256xi1>
    %558 = vector.broadcast %cst_356 : f32 to vector<16x256xf32>
    %559 = arith.select %557, %555, %558 : vector<16x256xi1>, vector<16x256xf32>
    %c48_357 = arith.constant 48 : index
    %c0_358 = arith.constant 0 : index
    %560 = vector.load %arg5[%c48_357, %c0_358] : memref<256x256xf32, #tpu.memory_space<vmem>>, vector<16x256xf32>
    tpu.vector_store %arg5[%c48_357, %c0_358], %559 {strides = array<i32>} : memref<256x256xf32, #tpu.memory_space<vmem>>, vector<16x256xf32>,
    %c64_359 = arith.constant 64 : index
    %c0_360 = arith.constant 0 : index
    %561 = vector.load %arg5[%c64_359, %c0_360] : memref<256x256xf32, #tpu.memory_space<vmem>>, vector<16x256xf32>
    tpu.vector_store %arg5[%c64_359, %c0_360], %536 {strides = array<i32>} : memref<256x256xf32, #tpu.memory_space<vmem>>, vector<16x256xf32>,
    %c255_i32_361 = arith.constant 255 : i32
    %562 = tpu.dynamic_rotate %536 by %c255_i32_361 dim 1 : vector<16x256xf32>, i32 -> vector<16x256xf32>
    %cst_362 = arith.constant 0.000000e+00 : f32
    %563 = vector.shape_cast %38 : vector<1x256xi1> to vector<1x256xi1>
    %564 = vector.broadcast %563 : vector<1x256xi1> to vector<16x256xi1>
    %565 = vector.broadcast %cst_362 : f32 to vector<16x256xf32>
    %566 = arith.select %564, %562, %565 : vector<16x256xi1>, vector<16x256xf32>
    %c80_363 = arith.constant 80 : index
    %c0_364 = arith.constant 0 : index
    %567 = vector.load %arg5[%c80_363, %c0_364] : memref<256x256xf32, #tpu.memory_space<vmem>>, vector<16x256xf32>
    tpu.vector_store %arg5[%c80_363, %c0_364], %566 {strides = array<i32>} : memref<256x256xf32, #tpu.memory_space<vmem>>, vector<16x256xf32>,
    %c241_i32_365 = arith.constant 241 : i32
    %568 = tpu.dynamic_rotate %536 by %c241_i32_365 dim 1 : vector<16x256xf32>, i32 -> vector<16x256xf32>
    %cst_366 = arith.constant 0.000000e+00 : f32
    %569 = vector.shape_cast %48 : vector<1x256xi1> to vector<1x256xi1>
    %570 = vector.broadcast %569 : vector<1x256xi1> to vector<16x256xi1>
    %571 = vector.broadcast %cst_366 : f32 to vector<16x256xf32>
    %572 = arith.select %570, %568, %571 : vector<16x256xi1>, vector<16x256xf32>
    %c96_367 = arith.constant 96 : index
    %c0_368 = arith.constant 0 : index
    %573 = vector.load %arg5[%c96_367, %c0_368] : memref<256x256xf32, #tpu.memory_space<vmem>>, vector<16x256xf32>
    tpu.vector_store %arg5[%c96_367, %c0_368], %572 {strides = array<i32>} : memref<256x256xf32, #tpu.memory_space<vmem>>, vector<16x256xf32>,
    %c240_i32_369 = arith.constant 240 : i32
    %574 = tpu.dynamic_rotate %536 by %c240_i32_369 dim 1 : vector<16x256xf32>, i32 -> vector<16x256xf32>
    %cst_370 = arith.constant 0.000000e+00 : f32
    %575 = vector.shape_cast %42 : vector<1x256xi1> to vector<1x256xi1>
    %576 = vector.broadcast %575 : vector<1x256xi1> to vector<16x256xi1>
    %577 = vector.broadcast %cst_370 : f32 to vector<16x256xf32>
    %578 = arith.select %576, %574, %577 : vector<16x256xi1>, vector<16x256xf32>
    %c112_371 = arith.constant 112 : index
    %c0_372 = arith.constant 0 : index
    %579 = vector.load %arg5[%c112_371, %c0_372] : memref<256x256xf32, #tpu.memory_space<vmem>>, vector<16x256xf32>
    tpu.vector_store %arg5[%c112_371, %c0_372], %578 {strides = array<i32>} : memref<256x256xf32, #tpu.memory_space<vmem>>, vector<16x256xf32>,
    %c239_i32_373 = arith.constant 239 : i32
    %580 = tpu.dynamic_rotate %536 by %c239_i32_373 dim 1 : vector<16x256xf32>, i32 -> vector<16x256xf32>
    %cst_374 = arith.constant 0.000000e+00 : f32
    %581 = vector.shape_cast %51 : vector<1x256xi1> to vector<1x256xi1>
    %582 = vector.broadcast %581 : vector<1x256xi1> to vector<16x256xi1>
    %583 = vector.broadcast %cst_374 : f32 to vector<16x256xf32>
    %584 = arith.select %582, %580, %583 : vector<16x256xi1>, vector<16x256xf32>
    %c128_375 = arith.constant 128 : index
    %c0_376 = arith.constant 0 : index
    %585 = vector.load %arg5[%c128_375, %c0_376] : memref<256x256xf32, #tpu.memory_space<vmem>>, vector<16x256xf32>
    tpu.vector_store %arg5[%c128_375, %c0_376], %584 {strides = array<i32>} : memref<256x256xf32, #tpu.memory_space<vmem>>, vector<16x256xf32>,
    %c8_377 = arith.constant 8 : index
    %c0_378 = arith.constant 0 : index
    %c0_379 = arith.constant 0 : index
    %586 = vector.load %arg2[%c8_377, %c0_378, %c0_379] : memref<11x16x256xf32, #tpu.memory_space<vmem>>, vector<1x8x144xf32>
    %587 = vector.shape_cast %586 : vector<1x8x144xf32> to vector<8x144xf32>
    %c0_380 = arith.constant 0 : index
    %c0_381 = arith.constant 0 : index
    %588 = vector.load %arg5[%c0_380, %c0_381] : memref<256x256xf32, #tpu.memory_space<vmem>>, vector<144x256xf32>
    %cst_382 = arith.constant dense<0.000000e+00> : vector<8x256xf32>
    %589 = tpu.matmul %587, %588, %cst_382 {dimension_numbers = #tpu.dot_dimension_numbers<[1], [0], [0], [1], [0, 0, 1, 1], [], []>} : vector<8x144xf32>, vector<144x256xf32>, vector<8x256xf32> -> vector<8x256xf32>
    %c8_383 = arith.constant 8 : index
    %c0_384 = arith.constant 0 : index
    %c0_385 = arith.constant 0 : index
    %590 = vector.load %arg3[%c8_383, %c0_384, %c0_385] : memref<11x16x1xf32, #tpu.memory_space<vmem>>, vector<1x8x1xf32>
    %591 = vector.shape_cast %590 : vector<1x8x1xf32> to vector<8x1xf32>
    %592 = vector.broadcast %591 : vector<8x1xf32> to vector<8x256xf32>
    %593 = arith.addf %589, %592 : vector<8x256xf32>
    %594 = arith.addf %593, %477 : vector<8x256xf32>
    %c17_i32_386 = arith.constant 17 : i32
    %595 = tpu.dynamic_rotate %594 by %c17_i32_386 dim 1 : vector<8x256xf32>, i32 -> vector<8x256xf32>
    %cst_387 = arith.constant 0.000000e+00 : f32
    %596 = vector.shape_cast %26 : vector<1x256xi1> to vector<1x256xi1>
    %597 = vector.broadcast %596 : vector<1x256xi1> to vector<8x256xi1>
    %598 = vector.broadcast %cst_387 : f32 to vector<8x256xf32>
    %599 = arith.select %597, %595, %598 : vector<8x256xi1>, vector<8x256xf32>
    %c0_388 = arith.constant 0 : index
    %c0_389 = arith.constant 0 : index
    %600 = vector.load %arg5[%c0_388, %c0_389] : memref<256x256xf32, #tpu.memory_space<vmem>>, vector<8x256xf32>
    tpu.vector_store %arg5[%c0_388, %c0_389], %599 {strides = array<i32>} : memref<256x256xf32, #tpu.memory_space<vmem>>, vector<8x256xf32>,
    %c16_i32_390 = arith.constant 16 : i32
    %601 = tpu.dynamic_rotate %594 by %c16_i32_390 dim 1 : vector<8x256xf32>, i32 -> vector<8x256xf32>
    %cst_391 = arith.constant 0.000000e+00 : f32
    %602 = vector.shape_cast %20 : vector<1x256xi1> to vector<1x256xi1>
    %603 = vector.broadcast %602 : vector<1x256xi1> to vector<8x256xi1>
    %604 = vector.broadcast %cst_391 : f32 to vector<8x256xf32>
    %605 = arith.select %603, %601, %604 : vector<8x256xi1>, vector<8x256xf32>
    %c8_392 = arith.constant 8 : index
    %c0_393 = arith.constant 0 : index
    %606 = vector.load %arg5[%c8_392, %c0_393] : memref<256x256xf32, #tpu.memory_space<vmem>>, vector<8x256xf32>
    tpu.vector_store %arg5[%c8_392, %c0_393], %605 {strides = array<i32>} : memref<256x256xf32, #tpu.memory_space<vmem>>, vector<8x256xf32>,
    %c15_i32_394 = arith.constant 15 : i32
    %607 = tpu.dynamic_rotate %594 by %c15_i32_394 dim 1 : vector<8x256xf32>, i32 -> vector<8x256xf32>
    %cst_395 = arith.constant 0.000000e+00 : f32
    %608 = vector.shape_cast %29 : vector<1x256xi1> to vector<1x256xi1>
    %609 = vector.broadcast %608 : vector<1x256xi1> to vector<8x256xi1>
    %610 = vector.broadcast %cst_395 : f32 to vector<8x256xf32>
    %611 = arith.select %609, %607, %610 : vector<8x256xi1>, vector<8x256xf32>
    %c16_396 = arith.constant 16 : index
    %c0_397 = arith.constant 0 : index
    %612 = vector.load %arg5[%c16_396, %c0_397] : memref<256x256xf32, #tpu.memory_space<vmem>>, vector<8x256xf32>
    tpu.vector_store %arg5[%c16_396, %c0_397], %611 {strides = array<i32>} : memref<256x256xf32, #tpu.memory_space<vmem>>, vector<8x256xf32>,
    %c1_i32_398 = arith.constant 1 : i32
    %613 = tpu.dynamic_rotate %594 by %c1_i32_398 dim 1 : vector<8x256xf32>, i32 -> vector<8x256xf32>
    %cst_399 = arith.constant 0.000000e+00 : f32
    %614 = vector.shape_cast %36 : vector<1x256xi1> to vector<1x256xi1>
    %615 = vector.broadcast %614 : vector<1x256xi1> to vector<8x256xi1>
    %616 = vector.broadcast %cst_399 : f32 to vector<8x256xf32>
    %617 = arith.select %615, %613, %616 : vector<8x256xi1>, vector<8x256xf32>
    %c24_400 = arith.constant 24 : index
    %c0_401 = arith.constant 0 : index
    %618 = vector.load %arg5[%c24_400, %c0_401] : memref<256x256xf32, #tpu.memory_space<vmem>>, vector<8x256xf32>
    tpu.vector_store %arg5[%c24_400, %c0_401], %617 {strides = array<i32>} : memref<256x256xf32, #tpu.memory_space<vmem>>, vector<8x256xf32>,
    %c32_402 = arith.constant 32 : index
    %c0_403 = arith.constant 0 : index
    %619 = vector.load %arg5[%c32_402, %c0_403] : memref<256x256xf32, #tpu.memory_space<vmem>>, vector<8x256xf32>
    tpu.vector_store %arg5[%c32_402, %c0_403], %594 {strides = array<i32>} : memref<256x256xf32, #tpu.memory_space<vmem>>, vector<8x256xf32>,
    %c255_i32_404 = arith.constant 255 : i32
    %620 = tpu.dynamic_rotate %594 by %c255_i32_404 dim 1 : vector<8x256xf32>, i32 -> vector<8x256xf32>
    %cst_405 = arith.constant 0.000000e+00 : f32
    %621 = vector.shape_cast %38 : vector<1x256xi1> to vector<1x256xi1>
    %622 = vector.broadcast %621 : vector<1x256xi1> to vector<8x256xi1>
    %623 = vector.broadcast %cst_405 : f32 to vector<8x256xf32>
    %624 = arith.select %622, %620, %623 : vector<8x256xi1>, vector<8x256xf32>
    %c40_406 = arith.constant 40 : index
    %c0_407 = arith.constant 0 : index
    %625 = vector.load %arg5[%c40_406, %c0_407] : memref<256x256xf32, #tpu.memory_space<vmem>>, vector<8x256xf32>
    tpu.vector_store %arg5[%c40_406, %c0_407], %624 {strides = array<i32>} : memref<256x256xf32, #tpu.memory_space<vmem>>, vector<8x256xf32>,
    %c241_i32_408 = arith.constant 241 : i32
    %626 = tpu.dynamic_rotate %594 by %c241_i32_408 dim 1 : vector<8x256xf32>, i32 -> vector<8x256xf32>
    %cst_409 = arith.constant 0.000000e+00 : f32
    %627 = vector.shape_cast %48 : vector<1x256xi1> to vector<1x256xi1>
    %628 = vector.broadcast %627 : vector<1x256xi1> to vector<8x256xi1>
    %629 = vector.broadcast %cst_409 : f32 to vector<8x256xf32>
    %630 = arith.select %628, %626, %629 : vector<8x256xi1>, vector<8x256xf32>
    %c48_410 = arith.constant 48 : index
    %c0_411 = arith.constant 0 : index
    %631 = vector.load %arg5[%c48_410, %c0_411] : memref<256x256xf32, #tpu.memory_space<vmem>>, vector<8x256xf32>
    tpu.vector_store %arg5[%c48_410, %c0_411], %630 {strides = array<i32>} : memref<256x256xf32, #tpu.memory_space<vmem>>, vector<8x256xf32>,
    %c240_i32_412 = arith.constant 240 : i32
    %632 = tpu.dynamic_rotate %594 by %c240_i32_412 dim 1 : vector<8x256xf32>, i32 -> vector<8x256xf32>
    %cst_413 = arith.constant 0.000000e+00 : f32
    %633 = vector.shape_cast %42 : vector<1x256xi1> to vector<1x256xi1>
    %634 = vector.broadcast %633 : vector<1x256xi1> to vector<8x256xi1>
    %635 = vector.broadcast %cst_413 : f32 to vector<8x256xf32>
    %636 = arith.select %634, %632, %635 : vector<8x256xi1>, vector<8x256xf32>
    %c56_414 = arith.constant 56 : index
    %c0_415 = arith.constant 0 : index
    %637 = vector.load %arg5[%c56_414, %c0_415] : memref<256x256xf32, #tpu.memory_space<vmem>>, vector<8x256xf32>
    tpu.vector_store %arg5[%c56_414, %c0_415], %636 {strides = array<i32>} : memref<256x256xf32, #tpu.memory_space<vmem>>, vector<8x256xf32>,
    %c239_i32_416 = arith.constant 239 : i32
    %638 = tpu.dynamic_rotate %594 by %c239_i32_416 dim 1 : vector<8x256xf32>, i32 -> vector<8x256xf32>
    %cst_417 = arith.constant 0.000000e+00 : f32
    %639 = vector.shape_cast %51 : vector<1x256xi1> to vector<1x256xi1>
    %640 = vector.broadcast %639 : vector<1x256xi1> to vector<8x256xi1>
    %641 = vector.broadcast %cst_417 : f32 to vector<8x256xf32>
    %642 = arith.select %640, %638, %641 : vector<8x256xi1>, vector<8x256xf32>
    %c64_418 = arith.constant 64 : index
    %c0_419 = arith.constant 0 : index
    %643 = vector.load %arg5[%c64_418, %c0_419] : memref<256x256xf32, #tpu.memory_space<vmem>>, vector<8x256xf32>
    tpu.vector_store %arg5[%c64_418, %c0_419], %642 {strides = array<i32>} : memref<256x256xf32, #tpu.memory_space<vmem>>, vector<8x256xf32>,
    %c9 = arith.constant 9 : index
    %c0_420 = arith.constant 0 : index
    %c0_421 = arith.constant 0 : index
    %644 = vector.load %arg2[%c9, %c0_420, %c0_421] : memref<11x16x256xf32, #tpu.memory_space<vmem>>, vector<1x16x72xf32>
    %645 = vector.shape_cast %644 : vector<1x16x72xf32> to vector<16x72xf32>
    %c0_422 = arith.constant 0 : index
    %c0_423 = arith.constant 0 : index
    %646 = vector.load %arg5[%c0_422, %c0_423] : memref<256x256xf32, #tpu.memory_space<vmem>>, vector<72x256xf32>
    %cst_424 = arith.constant dense<0.000000e+00> : vector<16x256xf32>
    %647 = tpu.matmul %645, %646, %cst_424 {dimension_numbers = #tpu.dot_dimension_numbers<[1], [0], [0], [1], [0, 0, 1, 1], [], []>} : vector<16x72xf32>, vector<72x256xf32>, vector<16x256xf32> -> vector<16x256xf32>
    %c9_425 = arith.constant 9 : index
    %c0_426 = arith.constant 0 : index
    %c0_427 = arith.constant 0 : index
    %648 = vector.load %arg3[%c9_425, %c0_426, %c0_427] : memref<11x16x1xf32, #tpu.memory_space<vmem>>, vector<1x16x1xf32>
    %649 = vector.shape_cast %648 : vector<1x16x1xf32> to vector<16x1xf32>
    %650 = vector.broadcast %649 : vector<16x1xf32> to vector<16x256xf32>
    %651 = arith.addf %647, %650 : vector<16x256xf32>
    %c34_i32 = arith.constant 34 : i32
    %652 = tpu.dynamic_rotate %69 by %c34_i32 dim 1 : vector<8x256xf32>, i32 -> vector<8x256xf32>
    %cst_428 = arith.constant 0.000000e+00 : f32
    %653 = vector.shape_cast %9 : vector<1x256xi1> to vector<1x256xi1>
    %654 = vector.broadcast %653 : vector<1x256xi1> to vector<8x256xi1>
    %655 = vector.broadcast %cst_428 : f32 to vector<8x256xf32>
    %656 = arith.select %654, %652, %655 : vector<8x256xi1>, vector<8x256xf32>
    %c0_429 = arith.constant 0 : index
    %c0_430 = arith.constant 0 : index
    %657 = vector.load %arg5[%c0_429, %c0_430] : memref<256x256xf32, #tpu.memory_space<vmem>>, vector<8x256xf32>
    tpu.vector_store %arg5[%c0_429, %c0_430], %656 {strides = array<i32>} : memref<256x256xf32, #tpu.memory_space<vmem>>, vector<8x256xf32>,
    %c33_i32 = arith.constant 33 : i32
    %658 = tpu.dynamic_rotate %69 by %c33_i32 dim 1 : vector<8x256xf32>, i32 -> vector<8x256xf32>
    %cst_431 = arith.constant 0.000000e+00 : f32
    %659 = vector.shape_cast %12 : vector<1x256xi1> to vector<1x256xi1>
    %660 = vector.broadcast %659 : vector<1x256xi1> to vector<8x256xi1>
    %661 = vector.broadcast %cst_431 : f32 to vector<8x256xf32>
    %662 = arith.select %660, %658, %661 : vector<8x256xi1>, vector<8x256xf32>
    %c8_432 = arith.constant 8 : index
    %c0_433 = arith.constant 0 : index
    %663 = vector.load %arg5[%c8_432, %c0_433] : memref<256x256xf32, #tpu.memory_space<vmem>>, vector<8x256xf32>
    tpu.vector_store %arg5[%c8_432, %c0_433], %662 {strides = array<i32>} : memref<256x256xf32, #tpu.memory_space<vmem>>, vector<8x256xf32>,
    %c32_i32_434 = arith.constant 32 : i32
    %664 = tpu.dynamic_rotate %69 by %c32_i32_434 dim 1 : vector<8x256xf32>, i32 -> vector<8x256xf32>
    %cst_435 = arith.constant 0.000000e+00 : f32
    %665 = vector.shape_cast %6 : vector<1x256xi1> to vector<1x256xi1>
    %666 = vector.broadcast %665 : vector<1x256xi1> to vector<8x256xi1>
    %667 = vector.broadcast %cst_435 : f32 to vector<8x256xf32>
    %668 = arith.select %666, %664, %667 : vector<8x256xi1>, vector<8x256xf32>
    %c16_436 = arith.constant 16 : index
    %c0_437 = arith.constant 0 : index
    %669 = vector.load %arg5[%c16_436, %c0_437] : memref<256x256xf32, #tpu.memory_space<vmem>>, vector<8x256xf32>
    tpu.vector_store %arg5[%c16_436, %c0_437], %668 {strides = array<i32>} : memref<256x256xf32, #tpu.memory_space<vmem>>, vector<8x256xf32>,
    %c31_i32 = arith.constant 31 : i32
    %670 = tpu.dynamic_rotate %69 by %c31_i32 dim 1 : vector<8x256xf32>, i32 -> vector<8x256xf32>
    %cst_438 = arith.constant 0.000000e+00 : f32
    %671 = vector.shape_cast %15 : vector<1x256xi1> to vector<1x256xi1>
    %672 = vector.broadcast %671 : vector<1x256xi1> to vector<8x256xi1>
    %673 = vector.broadcast %cst_438 : f32 to vector<8x256xf32>
    %674 = arith.select %672, %670, %673 : vector<8x256xi1>, vector<8x256xf32>
    %c24_439 = arith.constant 24 : index
    %c0_440 = arith.constant 0 : index
    %675 = vector.load %arg5[%c24_439, %c0_440] : memref<256x256xf32, #tpu.memory_space<vmem>>, vector<8x256xf32>
    tpu.vector_store %arg5[%c24_439, %c0_440], %674 {strides = array<i32>} : memref<256x256xf32, #tpu.memory_space<vmem>>, vector<8x256xf32>,
    %c30_i32 = arith.constant 30 : i32
    %676 = tpu.dynamic_rotate %69 by %c30_i32 dim 1 : vector<8x256xf32>, i32 -> vector<8x256xf32>
    %cst_441 = arith.constant 0.000000e+00 : f32
    %677 = vector.shape_cast %18 : vector<1x256xi1> to vector<1x256xi1>
    %678 = vector.broadcast %677 : vector<1x256xi1> to vector<8x256xi1>
    %679 = vector.broadcast %cst_441 : f32 to vector<8x256xf32>
    %680 = arith.select %678, %676, %679 : vector<8x256xi1>, vector<8x256xf32>
    %c32_442 = arith.constant 32 : index
    %c0_443 = arith.constant 0 : index
    %681 = vector.load %arg5[%c32_442, %c0_443] : memref<256x256xf32, #tpu.memory_space<vmem>>, vector<8x256xf32>
    tpu.vector_store %arg5[%c32_442, %c0_443], %680 {strides = array<i32>} : memref<256x256xf32, #tpu.memory_space<vmem>>, vector<8x256xf32>,
    %c18_i32 = arith.constant 18 : i32
    %682 = tpu.dynamic_rotate %69 by %c18_i32 dim 1 : vector<8x256xf32>, i32 -> vector<8x256xf32>
    %cst_444 = arith.constant 0.000000e+00 : f32
    %683 = vector.shape_cast %23 : vector<1x256xi1> to vector<1x256xi1>
    %684 = vector.broadcast %683 : vector<1x256xi1> to vector<8x256xi1>
    %685 = vector.broadcast %cst_444 : f32 to vector<8x256xf32>
    %686 = arith.select %684, %682, %685 : vector<8x256xi1>, vector<8x256xf32>
    %c40_445 = arith.constant 40 : index
    %c0_446 = arith.constant 0 : index
    %687 = vector.load %arg5[%c40_445, %c0_446] : memref<256x256xf32, #tpu.memory_space<vmem>>, vector<8x256xf32>
    tpu.vector_store %arg5[%c40_445, %c0_446], %686 {strides = array<i32>} : memref<256x256xf32, #tpu.memory_space<vmem>>, vector<8x256xf32>,
    %c17_i32_447 = arith.constant 17 : i32
    %688 = tpu.dynamic_rotate %69 by %c17_i32_447 dim 1 : vector<8x256xf32>, i32 -> vector<8x256xf32>
    %cst_448 = arith.constant 0.000000e+00 : f32
    %689 = vector.shape_cast %26 : vector<1x256xi1> to vector<1x256xi1>
    %690 = vector.broadcast %689 : vector<1x256xi1> to vector<8x256xi1>
    %691 = vector.broadcast %cst_448 : f32 to vector<8x256xf32>
    %692 = arith.select %690, %688, %691 : vector<8x256xi1>, vector<8x256xf32>
    %c48_449 = arith.constant 48 : index
    %c0_450 = arith.constant 0 : index
    %693 = vector.load %arg5[%c48_449, %c0_450] : memref<256x256xf32, #tpu.memory_space<vmem>>, vector<8x256xf32>
    tpu.vector_store %arg5[%c48_449, %c0_450], %692 {strides = array<i32>} : memref<256x256xf32, #tpu.memory_space<vmem>>, vector<8x256xf32>,
    %c16_i32_451 = arith.constant 16 : i32
    %694 = tpu.dynamic_rotate %69 by %c16_i32_451 dim 1 : vector<8x256xf32>, i32 -> vector<8x256xf32>
    %cst_452 = arith.constant 0.000000e+00 : f32
    %695 = vector.shape_cast %20 : vector<1x256xi1> to vector<1x256xi1>
    %696 = vector.broadcast %695 : vector<1x256xi1> to vector<8x256xi1>
    %697 = vector.broadcast %cst_452 : f32 to vector<8x256xf32>
    %698 = arith.select %696, %694, %697 : vector<8x256xi1>, vector<8x256xf32>
    %c56_453 = arith.constant 56 : index
    %c0_454 = arith.constant 0 : index
    %699 = vector.load %arg5[%c56_453, %c0_454] : memref<256x256xf32, #tpu.memory_space<vmem>>, vector<8x256xf32>
    tpu.vector_store %arg5[%c56_453, %c0_454], %698 {strides = array<i32>} : memref<256x256xf32, #tpu.memory_space<vmem>>, vector<8x256xf32>,
    %c15_i32_455 = arith.constant 15 : i32
    %700 = tpu.dynamic_rotate %69 by %c15_i32_455 dim 1 : vector<8x256xf32>, i32 -> vector<8x256xf32>
    %cst_456 = arith.constant 0.000000e+00 : f32
    %701 = vector.shape_cast %29 : vector<1x256xi1> to vector<1x256xi1>
    %702 = vector.broadcast %701 : vector<1x256xi1> to vector<8x256xi1>
    %703 = vector.broadcast %cst_456 : f32 to vector<8x256xf32>
    %704 = arith.select %702, %700, %703 : vector<8x256xi1>, vector<8x256xf32>
    %c64_457 = arith.constant 64 : index
    %c0_458 = arith.constant 0 : index
    %705 = vector.load %arg5[%c64_457, %c0_458] : memref<256x256xf32, #tpu.memory_space<vmem>>, vector<8x256xf32>
    tpu.vector_store %arg5[%c64_457, %c0_458], %704 {strides = array<i32>} : memref<256x256xf32, #tpu.memory_space<vmem>>, vector<8x256xf32>,
    %c14_i32_459 = arith.constant 14 : i32
    %706 = tpu.dynamic_rotate %69 by %c14_i32_459 dim 1 : vector<8x256xf32>, i32 -> vector<8x256xf32>
    %cst_460 = arith.constant 0.000000e+00 : f32
    %707 = vector.shape_cast %32 : vector<1x256xi1> to vector<1x256xi1>
    %708 = vector.broadcast %707 : vector<1x256xi1> to vector<8x256xi1>
    %709 = vector.broadcast %cst_460 : f32 to vector<8x256xf32>
    %710 = arith.select %708, %706, %709 : vector<8x256xi1>, vector<8x256xf32>
    %c72 = arith.constant 72 : index
    %c0_461 = arith.constant 0 : index
    %711 = vector.load %arg5[%c72, %c0_461] : memref<256x256xf32, #tpu.memory_space<vmem>>, vector<8x256xf32>
    tpu.vector_store %arg5[%c72, %c0_461], %710 {strides = array<i32>} : memref<256x256xf32, #tpu.memory_space<vmem>>, vector<8x256xf32>,
    %c2_i32_462 = arith.constant 2 : i32
    %712 = tpu.dynamic_rotate %69 by %c2_i32_462 dim 1 : vector<8x256xf32>, i32 -> vector<8x256xf32>
    %cst_463 = arith.constant 0.000000e+00 : f32
    %713 = vector.shape_cast %34 : vector<1x256xi1> to vector<1x256xi1>
    %714 = vector.broadcast %713 : vector<1x256xi1> to vector<8x256xi1>
    %715 = vector.broadcast %cst_463 : f32 to vector<8x256xf32>
    %716 = arith.select %714, %712, %715 : vector<8x256xi1>, vector<8x256xf32>
    %c80_464 = arith.constant 80 : index
    %c0_465 = arith.constant 0 : index
    %717 = vector.load %arg5[%c80_464, %c0_465] : memref<256x256xf32, #tpu.memory_space<vmem>>, vector<8x256xf32>
    tpu.vector_store %arg5[%c80_464, %c0_465], %716 {strides = array<i32>} : memref<256x256xf32, #tpu.memory_space<vmem>>, vector<8x256xf32>,
    %c1_i32_466 = arith.constant 1 : i32
    %718 = tpu.dynamic_rotate %69 by %c1_i32_466 dim 1 : vector<8x256xf32>, i32 -> vector<8x256xf32>
    %cst_467 = arith.constant 0.000000e+00 : f32
    %719 = vector.shape_cast %36 : vector<1x256xi1> to vector<1x256xi1>
    %720 = vector.broadcast %719 : vector<1x256xi1> to vector<8x256xi1>
    %721 = vector.broadcast %cst_467 : f32 to vector<8x256xf32>
    %722 = arith.select %720, %718, %721 : vector<8x256xi1>, vector<8x256xf32>
    %c88 = arith.constant 88 : index
    %c0_468 = arith.constant 0 : index
    %723 = vector.load %arg5[%c88, %c0_468] : memref<256x256xf32, #tpu.memory_space<vmem>>, vector<8x256xf32>
    tpu.vector_store %arg5[%c88, %c0_468], %722 {strides = array<i32>} : memref<256x256xf32, #tpu.memory_space<vmem>>, vector<8x256xf32>,
    %c96_469 = arith.constant 96 : index
    %c0_470 = arith.constant 0 : index
    %724 = vector.load %arg5[%c96_469, %c0_470] : memref<256x256xf32, #tpu.memory_space<vmem>>, vector<8x256xf32>
    tpu.vector_store %arg5[%c96_469, %c0_470], %69 {strides = array<i32>} : memref<256x256xf32, #tpu.memory_space<vmem>>, vector<8x256xf32>,
    %c255_i32_471 = arith.constant 255 : i32
    %725 = tpu.dynamic_rotate %69 by %c255_i32_471 dim 1 : vector<8x256xf32>, i32 -> vector<8x256xf32>
    %cst_472 = arith.constant 0.000000e+00 : f32
    %726 = vector.shape_cast %38 : vector<1x256xi1> to vector<1x256xi1>
    %727 = vector.broadcast %726 : vector<1x256xi1> to vector<8x256xi1>
    %728 = vector.broadcast %cst_472 : f32 to vector<8x256xf32>
    %729 = arith.select %727, %725, %728 : vector<8x256xi1>, vector<8x256xf32>
    %c104 = arith.constant 104 : index
    %c0_473 = arith.constant 0 : index
    %730 = vector.load %arg5[%c104, %c0_473] : memref<256x256xf32, #tpu.memory_space<vmem>>, vector<8x256xf32>
    tpu.vector_store %arg5[%c104, %c0_473], %729 {strides = array<i32>} : memref<256x256xf32, #tpu.memory_space<vmem>>, vector<8x256xf32>,
    %c254_i32 = arith.constant 254 : i32
    %731 = tpu.dynamic_rotate %69 by %c254_i32 dim 1 : vector<8x256xf32>, i32 -> vector<8x256xf32>
    %cst_474 = arith.constant 0.000000e+00 : f32
    %732 = vector.shape_cast %40 : vector<1x256xi1> to vector<1x256xi1>
    %733 = vector.broadcast %732 : vector<1x256xi1> to vector<8x256xi1>
    %734 = vector.broadcast %cst_474 : f32 to vector<8x256xf32>
    %735 = arith.select %733, %731, %734 : vector<8x256xi1>, vector<8x256xf32>
    %c112_475 = arith.constant 112 : index
    %c0_476 = arith.constant 0 : index
    %736 = vector.load %arg5[%c112_475, %c0_476] : memref<256x256xf32, #tpu.memory_space<vmem>>, vector<8x256xf32>
    tpu.vector_store %arg5[%c112_475, %c0_476], %735 {strides = array<i32>} : memref<256x256xf32, #tpu.memory_space<vmem>>, vector<8x256xf32>,
    %c242_i32 = arith.constant 242 : i32
    %737 = tpu.dynamic_rotate %69 by %c242_i32 dim 1 : vector<8x256xf32>, i32 -> vector<8x256xf32>
    %cst_477 = arith.constant 0.000000e+00 : f32
    %738 = vector.shape_cast %45 : vector<1x256xi1> to vector<1x256xi1>
    %739 = vector.broadcast %738 : vector<1x256xi1> to vector<8x256xi1>
    %740 = vector.broadcast %cst_477 : f32 to vector<8x256xf32>
    %741 = arith.select %739, %737, %740 : vector<8x256xi1>, vector<8x256xf32>
    %c120 = arith.constant 120 : index
    %c0_478 = arith.constant 0 : index
    %742 = vector.load %arg5[%c120, %c0_478] : memref<256x256xf32, #tpu.memory_space<vmem>>, vector<8x256xf32>
    tpu.vector_store %arg5[%c120, %c0_478], %741 {strides = array<i32>} : memref<256x256xf32, #tpu.memory_space<vmem>>, vector<8x256xf32>,
    %c241_i32_479 = arith.constant 241 : i32
    %743 = tpu.dynamic_rotate %69 by %c241_i32_479 dim 1 : vector<8x256xf32>, i32 -> vector<8x256xf32>
    %cst_480 = arith.constant 0.000000e+00 : f32
    %744 = vector.shape_cast %48 : vector<1x256xi1> to vector<1x256xi1>
    %745 = vector.broadcast %744 : vector<1x256xi1> to vector<8x256xi1>
    %746 = vector.broadcast %cst_480 : f32 to vector<8x256xf32>
    %747 = arith.select %745, %743, %746 : vector<8x256xi1>, vector<8x256xf32>
    %c128_481 = arith.constant 128 : index
    %c0_482 = arith.constant 0 : index
    %748 = vector.load %arg5[%c128_481, %c0_482] : memref<256x256xf32, #tpu.memory_space<vmem>>, vector<8x256xf32>
    tpu.vector_store %arg5[%c128_481, %c0_482], %747 {strides = array<i32>} : memref<256x256xf32, #tpu.memory_space<vmem>>, vector<8x256xf32>,
    %c240_i32_483 = arith.constant 240 : i32
    %749 = tpu.dynamic_rotate %69 by %c240_i32_483 dim 1 : vector<8x256xf32>, i32 -> vector<8x256xf32>
    %cst_484 = arith.constant 0.000000e+00 : f32
    %750 = vector.shape_cast %42 : vector<1x256xi1> to vector<1x256xi1>
    %751 = vector.broadcast %750 : vector<1x256xi1> to vector<8x256xi1>
    %752 = vector.broadcast %cst_484 : f32 to vector<8x256xf32>
    %753 = arith.select %751, %749, %752 : vector<8x256xi1>, vector<8x256xf32>
    %c136 = arith.constant 136 : index
    %c0_485 = arith.constant 0 : index
    %754 = vector.load %arg5[%c136, %c0_485] : memref<256x256xf32, #tpu.memory_space<vmem>>, vector<8x256xf32>
    tpu.vector_store %arg5[%c136, %c0_485], %753 {strides = array<i32>} : memref<256x256xf32, #tpu.memory_space<vmem>>, vector<8x256xf32>,
    %c239_i32_486 = arith.constant 239 : i32
    %755 = tpu.dynamic_rotate %69 by %c239_i32_486 dim 1 : vector<8x256xf32>, i32 -> vector<8x256xf32>
    %cst_487 = arith.constant 0.000000e+00 : f32
    %756 = vector.shape_cast %51 : vector<1x256xi1> to vector<1x256xi1>
    %757 = vector.broadcast %756 : vector<1x256xi1> to vector<8x256xi1>
    %758 = vector.broadcast %cst_487 : f32 to vector<8x256xf32>
    %759 = arith.select %757, %755, %758 : vector<8x256xi1>, vector<8x256xf32>
    %c144 = arith.constant 144 : index
    %c0_488 = arith.constant 0 : index
    %760 = vector.load %arg5[%c144, %c0_488] : memref<256x256xf32, #tpu.memory_space<vmem>>, vector<8x256xf32>
    tpu.vector_store %arg5[%c144, %c0_488], %759 {strides = array<i32>} : memref<256x256xf32, #tpu.memory_space<vmem>>, vector<8x256xf32>,
    %c238_i32 = arith.constant 238 : i32
    %761 = tpu.dynamic_rotate %69 by %c238_i32 dim 1 : vector<8x256xf32>, i32 -> vector<8x256xf32>
    %cst_489 = arith.constant 0.000000e+00 : f32
    %762 = vector.shape_cast %54 : vector<1x256xi1> to vector<1x256xi1>
    %763 = vector.broadcast %762 : vector<1x256xi1> to vector<8x256xi1>
    %764 = vector.broadcast %cst_489 : f32 to vector<8x256xf32>
    %765 = arith.select %763, %761, %764 : vector<8x256xi1>, vector<8x256xf32>
    %c152 = arith.constant 152 : index
    %c0_490 = arith.constant 0 : index
    %766 = vector.load %arg5[%c152, %c0_490] : memref<256x256xf32, #tpu.memory_space<vmem>>, vector<8x256xf32>
    tpu.vector_store %arg5[%c152, %c0_490], %765 {strides = array<i32>} : memref<256x256xf32, #tpu.memory_space<vmem>>, vector<8x256xf32>,
    %c226_i32 = arith.constant 226 : i32
    %767 = tpu.dynamic_rotate %69 by %c226_i32 dim 1 : vector<8x256xf32>, i32 -> vector<8x256xf32>
    %cst_491 = arith.constant 0.000000e+00 : f32
    %768 = vector.shape_cast %59 : vector<1x256xi1> to vector<1x256xi1>
    %769 = vector.broadcast %768 : vector<1x256xi1> to vector<8x256xi1>
    %770 = vector.broadcast %cst_491 : f32 to vector<8x256xf32>
    %771 = arith.select %769, %767, %770 : vector<8x256xi1>, vector<8x256xf32>
    %c160 = arith.constant 160 : index
    %c0_492 = arith.constant 0 : index
    %772 = vector.load %arg5[%c160, %c0_492] : memref<256x256xf32, #tpu.memory_space<vmem>>, vector<8x256xf32>
    tpu.vector_store %arg5[%c160, %c0_492], %771 {strides = array<i32>} : memref<256x256xf32, #tpu.memory_space<vmem>>, vector<8x256xf32>,
    %c225_i32 = arith.constant 225 : i32
    %773 = tpu.dynamic_rotate %69 by %c225_i32 dim 1 : vector<8x256xf32>, i32 -> vector<8x256xf32>
    %cst_493 = arith.constant 0.000000e+00 : f32
    %774 = vector.shape_cast %62 : vector<1x256xi1> to vector<1x256xi1>
    %775 = vector.broadcast %774 : vector<1x256xi1> to vector<8x256xi1>
    %776 = vector.broadcast %cst_493 : f32 to vector<8x256xf32>
    %777 = arith.select %775, %773, %776 : vector<8x256xi1>, vector<8x256xf32>
    %c168 = arith.constant 168 : index
    %c0_494 = arith.constant 0 : index
    %778 = vector.load %arg5[%c168, %c0_494] : memref<256x256xf32, #tpu.memory_space<vmem>>, vector<8x256xf32>
    tpu.vector_store %arg5[%c168, %c0_494], %777 {strides = array<i32>} : memref<256x256xf32, #tpu.memory_space<vmem>>, vector<8x256xf32>,
    %c224_i32_495 = arith.constant 224 : i32
    %779 = tpu.dynamic_rotate %69 by %c224_i32_495 dim 1 : vector<8x256xf32>, i32 -> vector<8x256xf32>
    %cst_496 = arith.constant 0.000000e+00 : f32
    %780 = vector.shape_cast %56 : vector<1x256xi1> to vector<1x256xi1>
    %781 = vector.broadcast %780 : vector<1x256xi1> to vector<8x256xi1>
    %782 = vector.broadcast %cst_496 : f32 to vector<8x256xf32>
    %783 = arith.select %781, %779, %782 : vector<8x256xi1>, vector<8x256xf32>
    %c176 = arith.constant 176 : index
    %c0_497 = arith.constant 0 : index
    %784 = vector.load %arg5[%c176, %c0_497] : memref<256x256xf32, #tpu.memory_space<vmem>>, vector<8x256xf32>
    tpu.vector_store %arg5[%c176, %c0_497], %783 {strides = array<i32>} : memref<256x256xf32, #tpu.memory_space<vmem>>, vector<8x256xf32>,
    %c223_i32 = arith.constant 223 : i32
    %785 = tpu.dynamic_rotate %69 by %c223_i32 dim 1 : vector<8x256xf32>, i32 -> vector<8x256xf32>
    %cst_498 = arith.constant 0.000000e+00 : f32
    %786 = vector.shape_cast %65 : vector<1x256xi1> to vector<1x256xi1>
    %787 = vector.broadcast %786 : vector<1x256xi1> to vector<8x256xi1>
    %788 = vector.broadcast %cst_498 : f32 to vector<8x256xf32>
    %789 = arith.select %787, %785, %788 : vector<8x256xi1>, vector<8x256xf32>
    %c184 = arith.constant 184 : index
    %c0_499 = arith.constant 0 : index
    %790 = vector.load %arg5[%c184, %c0_499] : memref<256x256xf32, #tpu.memory_space<vmem>>, vector<8x256xf32>
    tpu.vector_store %arg5[%c184, %c0_499], %789 {strides = array<i32>} : memref<256x256xf32, #tpu.memory_space<vmem>>, vector<8x256xf32>,
    %c222_i32 = arith.constant 222 : i32
    %791 = tpu.dynamic_rotate %69 by %c222_i32 dim 1 : vector<8x256xf32>, i32 -> vector<8x256xf32>
    %cst_500 = arith.constant 0.000000e+00 : f32
    %792 = vector.shape_cast %68 : vector<1x256xi1> to vector<1x256xi1>
    %793 = vector.broadcast %792 : vector<1x256xi1> to vector<8x256xi1>
    %794 = vector.broadcast %cst_500 : f32 to vector<8x256xf32>
    %795 = arith.select %793, %791, %794 : vector<8x256xi1>, vector<8x256xf32>
    %c192 = arith.constant 192 : index
    %c0_501 = arith.constant 0 : index
    %796 = vector.load %arg5[%c192, %c0_501] : memref<256x256xf32, #tpu.memory_space<vmem>>, vector<8x256xf32>
    tpu.vector_store %arg5[%c192, %c0_501], %795 {strides = array<i32>} : memref<256x256xf32, #tpu.memory_space<vmem>>, vector<8x256xf32>,
    %c10 = arith.constant 10 : index
    %c0_502 = arith.constant 0 : index
    %c0_503 = arith.constant 0 : index
    %797 = vector.load %arg2[%c10, %c0_502, %c0_503] : memref<11x16x256xf32, #tpu.memory_space<vmem>>, vector<1x16x200xf32>
    %798 = vector.shape_cast %797 : vector<1x16x200xf32> to vector<16x200xf32>
    %c0_504 = arith.constant 0 : index
    %c0_505 = arith.constant 0 : index
    %799 = vector.load %arg5[%c0_504, %c0_505] : memref<256x256xf32, #tpu.memory_space<vmem>>, vector<200x256xf32>
    %cst_506 = arith.constant dense<0.000000e+00> : vector<16x256xf32>
    %800 = tpu.matmul %798, %799, %cst_506 {dimension_numbers = #tpu.dot_dimension_numbers<[1], [0], [0], [1], [0, 0, 1, 1], [], []>} : vector<16x200xf32>, vector<200x256xf32>, vector<16x256xf32> -> vector<16x256xf32>
    %c10_507 = arith.constant 10 : index
    %c0_508 = arith.constant 0 : index
    %c0_509 = arith.constant 0 : index
    %801 = vector.load %arg3[%c10_507, %c0_508, %c0_509] : memref<11x16x1xf32, #tpu.memory_space<vmem>>, vector<1x16x1xf32>
    %802 = vector.shape_cast %801 : vector<1x16x1xf32> to vector<16x1xf32>
    %803 = vector.broadcast %802 : vector<16x1xf32> to vector<16x256xf32>
    %804 = arith.addf %800, %803 : vector<16x256xf32>
    %805 = arith.addf %651, %804 : vector<16x256xf32>
    %c0_510 = arith.constant 0 : index
    %c0_511 = arith.constant 0 : index
    %806 = vector.load %arg4[%c0_510, %c0_511] : memref<16x256xf32, #tpu.memory_space<vmem>>, vector<16x256xf32>
    tpu.vector_store %arg4[%c0_510, %c0_511], %805 {strides = array<i32>} : memref<16x256xf32, #tpu.memory_space<vmem>>, vector<16x256xf32>,
    return
  }
  func.func @transform_0(%arg0: i32) -> (i32, i32) {
    %c0_i32 = arith.constant 0 : i32
    %c0_i32_0 = arith.constant 0 : i32
    return %c0_i32, %arg0 : i32, i32
  }
  func.func @transform_1(%arg0: i32) -> (i32, i32, i32) {
    %c0_i32 = arith.constant 0 : i32
    %c0_i32_0 = arith.constant 0 : i32
    %c0_i32_1 = arith.constant 0 : i32
    %c0_i32_2 = arith.constant 0 : i32
    return %c0_i32, %c0_i32_0, %c0_i32_1 : i32, i32, i32
  }
  func.func @transform_2(%arg0: i32) -> (i32, i32, i32) {
    %c0_i32 = arith.constant 0 : i32
    %c0_i32_0 = arith.constant 0 : i32
    %c0_i32_1 = arith.constant 0 : i32
    %c0_i32_2 = arith.constant 0 : i32
    return %c0_i32, %c0_i32_0, %c0_i32_1 : i32, i32, i32
  }
  func.func @transform_3(%arg0: i32) -> (i32, i32) {
    %c0_i32 = arith.constant 0 : i32
    %c0_i32_0 = arith.constant 0 : i32
    return %c0_i32, %arg0 : i32, i32
  }
}

</mosaic_0001>

<bundles_post_ra>
// kernel: dyna_model_forward.1
= control target key start
LH: loop header
LB: loop body
LE: loop exit
PB: predicated region body
PF: predicated region fallthrough
CT: control target
= control target key end

     0   :  { %s3536_s12 = smov 0   ;;  %s3538_s13 = smov 0   ;;  %s5500_s0 = inlined_call_operand.vmem [shape: f32[8,512], index: 0, kind: input, shape index: {}]   ;;  %s5501_s1 = inlined_call_operand.vmem [shape: f32[11,16,256], index: 1, kind: input, shape index: {}]   ;;  %s5502_s2 = inlined_call_operand.vmem [shape: f32[11,16,1], index: 2, kind: input, shape index: {}]   ;;  %s5503_s3 = inlined_call_operand.vmem [shape: f32[16,512], index: 3, kind: output, shape index: {}]  }
   0x1   :  { %s3540_s14 = smov 0  }
   0x2 LB: > { %s3549_s15 = sadd.s32 4294967295, %s3488_s14   ;;  %s3551_s16 = sadd.s32 1, %s3488_s14   ;;  %s3488_s14 = sphi %s3540_s14, %s5721_s14   ;;  %s3484_s13 = sphi %s3538_s13, %s5720_s13   ;;  %s3480_s12 = sphi %s3536_s12, %s5719_s12  }
   0x3   : > { %s85_s17 = ssub.s32 %s3488_s14, %s3551_s16  ;;  %s88_s18 = sadd.s32 1, %s3484_s13 }
   0x4   : > { %p86_p0 = scmp.eq.s32.totalorder %s85_s17, 0  ;;  %p98_p1 = scmp.ne.s32.totalorder %s3484_s13, %s3480_s12 }
   0x5   : > { %p99_p2 = scmp.eq.s32.totalorder %s3549_s15, 1  ;;  %p3107_p3 = scmp.ge.s32.totalorder %s3488_s14, 1 }
   0x6   : > { %s3559_s19 = scalar_select %p86_p0, %s3484_s13, %s88_s18  }
   0x7   : > { %p3561_p4 = por %p99_p2, %p98_p1  ;;  %p138_p5 = scmp.lt.s32.totalorder %s3488_s14, 3 }
   0x9   : > { %p139_p6 = pnand %p3107_p3, %p138_p5 }
   0xa   : > { %s3109_s21 = sshll.u32 (!%p139_p6), %s3549_s15, 1  ;;  %s3490_s26 = smov (!%p139_p6), 112  }
   0xb   : > { %142 = sbr.rel (%p139_p6) target bundleno = 3661 (0xe4d), region = 32  ;;  %p162_p7 = scmp.lt.s32.totalorder (!%p139_p6), %s3109_s21, 3 }
   0xc   : > { %s3491_s27 = smov (!%p139_p6), 111   ;;  %s3492_s28 = smov (!%p139_p6), 113  }
   0xd   : > { %s3493_s29 = smov (!%p139_p6), 127   ;;  %s3494_s30 = smov (!%p139_p6), 1  }
   0xe   : > { %s3497_s4 = smov (!%p139_p6), 15   ;;  %s3498_s5 = smov (!%p139_p6), 16  }
   0xf   : > { %s3499_s6 = smov (!%p139_p6), 17   ;;  %s3500_s23 = smov (!%p139_p6), 114  }
  0x10   : > { %s5723_s21 = smov (!%p162_p7, %s3109_s21), 3  ;;  %v3495_v2 = vmov 0.0   ;;  %v3496_v3 = vmov 0   ;;  %v366_v4 = vld [vmem:[%s5502_s2] sm:$0xff]  ;;  %v168_v5 = vlaneseq  ;;  %v3115_v54 = vld [vmem:[%s5502_s2 + $0x18] sm:$0xff]  ;;  %v3114_v55 = vld [vmem:[%s5502_s2 + $0x10] sm:$0xff] }
  0x11   : > { %s3110_s22 = sshll.u32 %s5723_s21, 3  ;;  %440 = vmatprep.mubr.f32.mxu1 %v3495_v2  ;;  %3462 = vset.pattern.permute.xlu0 %v3496_v3  ;;  %v347_v48 = vld [vmem:[%s5501_s1] sm:$0xff]  ;;  %s3501_s24 = smov 126  }
  0x12   : > { %s3569_s25 = scalar_lea.vmem %s5500_s0, %s3110_s22  ;;  %3463 = vset.pattern.permute.xlu1 %v3496_v3  ;;  %v3613_v6 = vand.u32 127, %v168_v5  ;;  %s3502_s7 = smov 2  }
  0x13   : > { %v3572_v0 = vld [vmem:[%s3569_s25] sm:$0xff]  ;;  %v3579_v1 = vld [vmem:[%s3569_s25 + $0x8] sm:$0xff]  ;;  %s3503_s8 = smov 14   ;;  %s3504_s10 = smov 18  }
  0x14   : > { %317 = vrot.lane.b32.xlu1 %v3572_v0, %s3490_s26  ;;  %332 = vrot.lane.b32.xlu0 %v3572_v0, %s3491_s27  ;;  %v170_v7 = vadd.s32 128, %v3613_v6  ;;  %v3622_v10 = vand.u32 255, %v3613_v6  ;;  %vm5507_vm2 = vcmp.lt.s32.totalorder %v3613_v6, 111  ;;  %vm321_vm6 = vcmp.lt.s32.totalorder %v3613_v6, 112  ;;  %s3513_s11 = smov 97   ;;  %s3514_s14 = smov 98  }
  0x15   : > { %vm5508_vm7 = vcmp.lt.s32.totalorder %v3613_v6, 113  ;;  %vm5510_vm10 = vcmp.lt.s32.totalorder %v3613_v6, 127  ;;  %vm5505_vm11 = vcmp.lt.s32.totalorder %v3613_v6, 1  ;;  %vm5504_vm13 = vcmp.lt.s32.totalorder %v3613_v6, 15  ;;  %s3515_s17 = smov 110  }
  0x16   : > { %v3616_v8 = vand.u32 255, %v170_v7  ;;  %v3627_v13 = vand.u32 15, %v3622_v10  ;;  %vm193_vm12 = vcmp.ge.s32.totalorder %v3622_v10, 16  ;;  %vm5506_vm15 = vcmp.lt.s32.totalorder %v3613_v6, 16 }
  0x18   : > { %319 = vrot.lane.b32.xlu1 %v3579_v1, %s3490_s26  ;;  %334 = vrot.lane.b32.xlu0 %v3579_v1, %s3491_s27  ;;  %v3619_v9 = vand.u32 15, %v3616_v8  ;;  %vm5513_vm1 = vcmp.lt.s32.totalorder %v3616_v8, 240  ;;  %vm5509_vm5 = vcmp.lt.s32.totalorder %v3627_v13, 15  ;;  %vm181_vm9 = vcmp.ge.s32.totalorder %v3627_v13, 1 }
  0x19   : > { %vm3729_vm14 = vmand %vm193_vm12, %vm5509_vm5 }
  0x1a   : > { %vm186_vm0 = vcmp.lt.s32.totalorder %v3619_v9, 15  ;;  %vm182_vm4 = vcmp.ge.s32.totalorder %v3619_v9, 1 }
  0x1b   : > { %vm3634_vm3 = vmand %vm5513_vm1, %vm186_vm0 }
  0x1c   : > { %304 = vrot.lane.b32.xlu1 %v3579_v1, %s3492_s28  ;;  %302 = vrot.lane.b32.xlu0 %v3572_v0, %s3492_s28  ;;  %vm3664_vm8 = vmand %vm5513_vm1, %vm182_vm4 }
  0x20   : > { %289 = vrot.lane.b32.xlu1 %v3579_v1, %s3493_s29  ;;  %287 = vrot.lane.b32.xlu0 %v3572_v0, %s3493_s29 }
  0x24   : > { %272 = vrot.lane.b32.xlu1 %v3579_v1, %s3494_s30  ;;  %270 = vrot.lane.b32.xlu0 %v3572_v0, %s3494_s30 }
  0x28   : > { %257 = vrot.lane.b32.xlu1 %v3579_v1, %s3497_s4  ;;  %255 = vrot.lane.b32.xlu0 %v3572_v0, %s3497_s4 }
  0x2c   : > { %242 = vrot.lane.b32.xlu1 %v3579_v1, %s3498_s5  ;;  %240 = vrot.lane.b32.xlu0 %v3572_v0, %s3498_s5 }
  0x30   : > { %227 = vrot.lane.b32.xlu1 %v3579_v1, %s3499_s6  ;;  %225 = vrot.lane.b32.xlu0 %v3572_v0, %s3499_s6 }
  0x34   : > { %369 = vperm.xlu0 %3462, %v366_v4  }
  0x86   : > { %v318_v11 = vpop.permute.xlu1 %317  ;;  %v333_v12 = vpop.permute.xlu0 %332 }
  0x8a   : > { %v320_v15 = vpop.permute.xlu1 %319  ;;  %v335_v16 = vpop.permute.xlu0 %334 }
  0x8b   : > { %v3643_v17 = vsel %vm5507_vm2, %v335_v16, %v333_v12  ;;  %v3647_v18 = vsel %vm5507_vm2, %v333_v12, %v335_v16  ;;  %v3658_v19 = vsel %vm321_vm6, %v320_v15, %v318_v11  ;;  %v3673_v23 = vsel %vm321_vm6, %v318_v11, %v320_v15 }
  0x8c   : > { %3172 = vmatprep.subr.msk.mxu1 %vm3634_vm3, %v3643_v17 }
  0x8d   : > { %3173 = vmatpush1.msk.msra.mxu1 %vm5509_vm5, %v3647_v18 }
  0x8e   : > { %v305_v21 = vpop.permute.xlu1 %304  ;;  %3174 = vmatprep.subr.msk.mxu1 %vm5513_vm1, %v3658_v19  ;;  %v303_v22 = vpop.permute.xlu0 %302 }
  0x8f   : > { %393 = vmatpush1.msra.mxu1 %v3673_v23  ;;  %v3679_v24 = vsel %vm5508_vm7, %v305_v21, %v303_v22  ;;  %v3683_v25 = vsel %vm5508_vm7, %v303_v22, %v305_v21 }
  0x90   : > { %3175 = vmatprep.subr.msk.mxu1 %vm3664_vm8, %v3679_v24 }
  0x91   : > { %3176 = vmatpush1.msk.msra.mxu1 %vm181_vm9, %v3683_v25 }
  0x92   : > { %v290_v26 = vpop.permute.xlu1 %289  ;;  %v288_v27 = vpop.permute.xlu0 %287 }
  0x93   : > { %v3694_v28 = vsel %vm5510_vm10, %v290_v26, %v288_v27  ;;  %v3698_v29 = vsel %vm5510_vm10, %v288_v27, %v290_v26 }
  0x94   : > { %3177 = vmatprep.subr.msk.mxu1 %vm186_vm0, %v3694_v28 }
  0x95   : > { %3178 = vmatpush1.msk.msra.mxu1 %vm5509_vm5, %v3698_v29 }
  0x96   : > { %v273_v30 = vpop.permute.xlu1 %272  ;;  %398 = vmatprep.subr.mxu1 %v3579_v1  ;;  %v271_v31 = vpop.permute.xlu0 %270 }
  0x97   : > { %399 = vmatpush1.msra.mxu1 %v3572_v0  ;;  %v3711_v32 = vsel %vm5505_vm11, %v271_v31, %v273_v30  ;;  %v3715_v33 = vsel %vm5505_vm11, %v273_v30, %v271_v31  ;;  %vm3765_vm11 = vmand %vm193_vm12, %vm181_vm9 }
  0x98   : > { %3179 = vmatprep.subr.msk.mxu1 %vm182_vm4, %v3711_v32 }
  0x99   : > { %3180 = vmatpush1.msk.msra.mxu1 %vm181_vm9, %v3715_v33 }
  0x9a   : > { %v258_v34 = vpop.permute.xlu1 %257  ;;  %v256_v35 = vpop.permute.xlu0 %255 }
  0x9b   : > { %v3735_v37 = vsel %vm5504_vm13, %v256_v35, %v258_v34  ;;  %v3739_v38 = vsel %vm5504_vm13, %v258_v34, %v256_v35  ;;  %vm229_vm13 = vcmp.lt.s32.totalorder %v3613_v6, 17 }
  0x9c   : > { %3181 = vmatprep.subr.msk.mxu1 %vm186_vm0, %v3735_v37 }
  0x9d   : > { %3182 = vmatpush1.msk.msra.mxu1 %vm3729_vm14, %v3739_v38 }
  0x9e   : > { %v243_v39 = vpop.permute.xlu1 %242  ;;  %v241_v40 = vpop.permute.xlu0 %240 }
  0x9f   : > { %v3750_v41 = vsel %vm5506_vm15, %v241_v40, %v243_v39  ;;  %v3754_v42 = vsel %vm5506_vm15, %v243_v39, %v241_v40  ;;  %vm5512_vm15 = vcmask 588800  }
  0xa0   : > { %404 = vmatprep.subr.mxu1 %v3750_v41 }
  0xa1   : > { %3183 = vmatpush1.msk.msra.mxu1 %vm193_vm12, %v3754_v42 }
  0xa2   : > { %v228_v43 = vpop.permute.xlu1 %227  ;;  %v226_v44 = vpop.permute.xlu0 %225 }
  0xa3   : > { %v3771_v46 = vsel %vm229_vm13, %v226_v44, %v228_v43  ;;  %v3775_v47 = vsel %vm229_vm13, %v228_v43, %v226_v44 }
  0xa4   : > { %3184 = vmatprep.subr.msk.mxu1 %vm182_vm4, %v3771_v46 }
  0xa5   : > { %3185 = vmatpush1.msk.msra.mxu1 %vm3765_vm11, %v3775_v47 }
  0xa6   : > { %3111 = vmatmul.mubr.msk.f32.vlgmr.msra.gmra.mxu1 %vm5512_vm15, %v347_v48 }
  0xa7   : > { %633 = vmatprep.mubr.f32.mxu1 %v3495_v2 }
  0xaf   : > { %v370_v49 = vpop.permute.xlu0 %369 }
 0x166   : > { %v442_v50 = vpop.f32.mrf.mxu1 }
 0x167   : > { %v3788_v51 = vadd.f32 %v442_v50, %v370_v49  ;;  %v3112_v50 = vld [vmem:[%s5501_s1 + $0x20] sm:$0xff] }
 0x168   : > { %v444_v52 = vpop.f32.mrf.mxu1 }
 0x169   : > { %509 = vrot.lane.b32.xlu0 %v3788_v51, %s3490_s26  ;;  %519 = vrot.lane.b32.xlu1 %v3788_v51, %s3491_s27  ;;  %v3794_v53 = vadd.f32 %v444_v52, %v370_v49  ;;  %v3113_v52 = vld [vmem:[%s5501_s1 + $0x30] sm:$0xff] }
 0x16d   : > { %499 = vrot.lane.b32.xlu0 %v3788_v51, %s3492_s28  ;;  %521 = vrot.lane.b32.xlu1 %v3794_v53, %s3491_s27 }
 0x171   : > { %489 = vrot.lane.b32.xlu0 %v3788_v51, %s3493_s29  ;;  %511 = vrot.lane.b32.xlu1 %v3794_v53, %s3490_s26 }
 0x175   : > { %477 = vrot.lane.b32.xlu0 %v3788_v51, %s3494_s30  ;;  %501 = vrot.lane.b32.xlu1 %v3794_v53, %s3492_s28 }
 0x179   : > { %467 = vrot.lane.b32.xlu0 %v3788_v51, %s3497_s4  ;;  %491 = vrot.lane.b32.xlu1 %v3794_v53, %s3493_s29 }
 0x17d   : > { %457 = vrot.lane.b32.xlu0 %v3788_v51, %s3498_s5  ;;  %479 = vrot.lane.b32.xlu1 %v3794_v53, %s3494_s30 }
 0x181   : > { %447 = vrot.lane.b32.xlu0 %v3788_v51, %s3499_s6  ;;  %469 = vrot.lane.b32.xlu1 %v3794_v53, %s3497_s4 }
 0x185   : > { %560 = vperm.xlu0 %3462, %v3115_v54   ;;  %459 = vrot.lane.b32.xlu1 %v3794_v53, %s3498_s5 }
 0x189   : > { %449 = vrot.lane.b32.xlu1 %v3794_v53, %s3499_s6 }
 0x18d   : > { %555 = vperm.xlu1 %3463, %v3114_v55  }
 0x1db   : > { %v510_v56 = vpop.permute.xlu0 %509  ;;  %v520_v57 = vpop.permute.xlu1 %519 }
 0x1df   : > { %v500_v58 = vpop.permute.xlu0 %499  ;;  %v522_v59 = vpop.permute.xlu1 %521 }
 0x1e0   : > { %v523_v60 = vsel %vm5507_vm2, %v520_v57, %v522_v59  ;;  %v524_v61 = vsel %vm5507_vm2, %v522_v59, %v520_v57  ;;  %vm5525_vm2 = vcmp.lt.s32.totalorder %v3613_v6, 1 }
 0x1e1   : > { %3186 = vmatprep.subr.msk.mxu1 %vm3634_vm3, %v524_v61 }
 0x1e2   : > { %3187 = vmatpush1.msk.msra.mxu1 %vm5509_vm5, %v523_v60 }
 0x1e3   : > { %v490_v62 = vpop.permute.xlu0 %489  ;;  %v512_v63 = vpop.permute.xlu1 %511 }
 0x1e4   : > { %v514_v0 = vsel %vm321_vm6, %v512_v63, %v510_v56  ;;  %v513_v1 = vsel %vm321_vm6, %v510_v56, %v512_v63 }
 0x1e5   : > { %3188 = vmatprep.subr.msk.mxu1 %vm5513_vm1, %v514_v0 }
 0x1e6   : > { %586 = vmatpush1.msra.mxu1 %v513_v1 }
 0x1e7   : > { %v502_v3 = vpop.permute.xlu1 %501  ;;  %v478_v7 = vpop.permute.xlu0 %477 }
 0x1e8   : > { %v503_v4 = vsel %vm5508_vm7, %v500_v58, %v502_v3  ;;  %v504_v5 = vsel %vm5508_vm7, %v502_v3, %v500_v58  ;;  %vm5526_vm7 = vmmov %vm5525_vm2 }
 0x1e9   : > { %3189 = vmatprep.subr.msk.mxu1 %vm3664_vm8, %v504_v5  ;;  %v3119_v5 = vld [vmem:[%s5501_s1 + $0x48] sm:$0xff] }
 0x1ea   : > { %3190 = vmatpush1.msk.msra.mxu1 %vm181_vm9, %v503_v4 }
 0x1eb   : > { %v492_v11 = vpop.permute.xlu1 %491  ;;  %v468_v16 = vpop.permute.xlu0 %467 }
 0x1ec   : > { %v493_v12 = vsel %vm5510_vm10, %v490_v62, %v492_v11  ;;  %v494_v15 = vsel %vm5510_vm10, %v492_v11, %v490_v62 }
 0x1ed   : > { %3191 = vmatprep.subr.msk.mxu1 %vm186_vm0, %v494_v15 }
 0x1ee   : > { %3192 = vmatpush1.msk.msra.mxu1 %vm5509_vm5, %v493_v12  ;;  %vm5527_vm5 = vcmp.lt.s32.totalorder %v3613_v6, 15 }
 0x1ef   : > { %591 = vmatprep.subr.mxu1 %v3794_v53  ;;  %v480_v21 = vpop.permute.xlu1 %479  ;;  %vm5528_vm10 = vmmov %vm5527_vm5  ;;  %v458_v34 = vpop.permute.xlu0 %457 }
 0x1f0   : > { %v482_v22 = vsel %vm5525_vm2, %v480_v21, %v478_v7  ;;  %592 = vmatpush1.msra.mxu1 %v3788_v51  ;;  %v481_v26 = vsel %vm5526_vm7, %v478_v7, %v480_v21  ;;  %vm5529_vm2 = vcmp.lt.s32.totalorder %v3613_v6, 16  ;;  %v3120_v7 = vld [vmem:[%s5502_s2 + $0x20] sm:$0xff] }
 0x1f1   : > { %3193 = vmatprep.subr.msk.mxu1 %vm182_vm4, %v481_v26  ;;  %vm5530_vm7 = vmmov %vm5529_vm2 }
 0x1f2   : > { %3194 = vmatpush1.msk.msra.mxu1 %vm181_vm9, %v482_v22 }
 0x1f3   : > { %v470_v27 = vpop.permute.xlu1 %469  ;;  %v448_v43 = vpop.permute.xlu0 %447 }
 0x1f4   : > { %v472_v30 = vsel %vm5527_vm5, %v470_v27, %v468_v16  ;;  %v471_v31 = vsel %vm5528_vm10, %v468_v16, %v470_v27  ;;  %vm5511_vm5 = vcmask 130048   ;;  %vm5531_vm10 = vcmp.lt.s32.totalorder %v3613_v6, 113 }
 0x1f5   : > { %3195 = vmatprep.subr.msk.mxu1 %vm186_vm0, %v471_v31  ;;  %3121 = vmatprep.mubr.msk.f32.mxu0 %vm5511_vm5, %v3119_v5 }
 0x1f6   : > { %3196 = vmatpush1.msk.msra.mxu1 %vm3729_vm14, %v472_v30 }
 0x1f7   : > { %v460_v35 = vpop.permute.xlu1 %459 }
 0x1f8   : > { %v462_v39 = vsel %vm5529_vm2, %v460_v35, %v458_v34  ;;  %v461_v40 = vsel %vm5530_vm7, %v458_v34, %v460_v35  ;;  %vm5532_vm2 = vmmov %vm5531_vm10 }
 0x1f9   : > { %597 = vmatprep.subr.mxu1 %v461_v40  ;;  %vm5533_vm7 = vmmov %vm5532_vm2 }
 0x1fa   : > { %3197 = vmatpush1.msk.msra.mxu1 %vm193_vm12, %v462_v39  ;;  %vm5534_vm5 = vmmov %vm5532_vm2 }
 0x1fb   : > { %v450_v44 = vpop.permute.xlu1 %449 }
 0x1fc   : > { %v452_v48 = vsel %vm229_vm13, %v450_v44, %v448_v43  ;;  %v451_v49 = vsel %vm229_vm13, %v448_v43, %v450_v44 }
 0x1fd   : > { %3198 = vmatprep.subr.msk.mxu1 %vm182_vm4, %v451_v49 }
 0x1fe   : > { %3199 = vmatpush1.msk.msra.mxu1 %vm3765_vm11, %v452_v48 }
 0x1ff   : > { %3116 = vmatmul.mubr.msk.f32.vlgmr.msra.gmra.mxu1 %vm5512_vm15, %v3112_v50 }
 0x200   : > { %639 = vmatprep.mubr.f32.mxu1 %v3495_v2  ;;  %v561_v62 = vpop.permute.xlu0 %560 }
 0x203   : > { %3117 = vmatmul.mubr.msk.f32.gmra.mxu1 %vm5512_vm15, %v3113_v52 }
 0x204   : > { %1123 = vmatprep.mubr.f32.mxu1 %v3495_v2 }
 0x208   : > { %v556_v54 = vpop.permute.xlu1 %555 }
 0x2bf   : > { %v635_v55 = vpop.f32.mrf.mxu1 }
 0x2c0   : > { %v636_v56 = vadd.f32 %v635_v55, %v556_v54 }
 0x2c1   : > { %v637_v57 = vpop.f32.mrf.mxu1 }
 0x2c2   : > { %v3902_v58 = vmax.f32 %v636_v56, 0.0  ;;  %v638_v59 = vadd.f32 %v637_v57, %v556_v54 }
 0x2c3   : > { %v641_v61 = vpop.f32.mrf.mxu1 }
 0x2c4   : > { %v3904_v60 = vmax.f32 %v638_v59, 0.0  ;;  %774 = vrot.lane.b32.xlu0 %v3902_v58, %s3490_s26  ;;  %v642_v0 = vadd.f32 %v641_v61, %v561_v62 }
 0x2c5   : > { %v643_v63 = vpop.f32.mrf.mxu1 }
 0x2c6   : > { %778 = vrot.lane.b32.xlu1 %v3904_v60, %s3490_s26  ;;  %v644_v1 = vadd.f32 %v643_v63, %v561_v62  ;;  %v3928_v3 = vmax.f32 %v642_v0, 0.0 }
 0x2c8   : > { %754 = vrot.lane.b32.xlu0 %v3902_v58, %s3492_s28  ;;  %v3932_v4 = vmax.f32 %v644_v1, 0.0 }
 0x2ca   : > { %758 = vrot.lane.b32.xlu1 %v3904_v60, %s3492_s28 }
 0x2cc   : > { %734 = vrot.lane.b32.xlu0 %v3902_v58, %s3493_s29 }
 0x2ce   : > { %738 = vrot.lane.b32.xlu1 %v3904_v60, %s3493_s29 }
 0x2d0   : > { %710 = vrot.lane.b32.xlu0 %v3902_v58, %s3494_s30 }
 0x2d2   : > { %714 = vrot.lane.b32.xlu1 %v3904_v60, %s3494_s30 }
 0x2d4   : > { %690 = vrot.lane.b32.xlu0 %v3902_v58, %s3497_s4 }
 0x2d6   : > { %694 = vrot.lane.b32.xlu1 %v3904_v60, %s3497_s4 }
 0x2d8   : > { %670 = vrot.lane.b32.xlu0 %v3902_v58, %s3498_s5 }
 0x2da   : > { %674 = vrot.lane.b32.xlu1 %v3904_v60, %s3498_s5 }
 0x2dc   : > { %776 = vrot.lane.b32.xlu0 %v3928_v3, %s3490_s26 }
 0x2de   : > { %780 = vrot.lane.b32.xlu1 %v3932_v4, %s3490_s26 }
 0x2e0   : > { %756 = vrot.lane.b32.xlu0 %v3928_v3, %s3492_s28 }
 0x2e2   : > { %760 = vrot.lane.b32.xlu1 %v3932_v4, %s3492_s28 }
 0x2e4   : > { %736 = vrot.lane.b32.xlu0 %v3928_v3, %s3493_s29 }
 0x2e6   : > { %740 = vrot.lane.b32.xlu1 %v3932_v4, %s3493_s29 }
 0x2e8   : > { %650 = vrot.lane.b32.xlu0 %v3902_v58, %s3499_s6 }
 0x2ea   : > { %654 = vrot.lane.b32.xlu1 %v3904_v60, %s3499_s6 }
 0x2ec   : > { %712 = vrot.lane.b32.xlu0 %v3928_v3, %s3494_s30 }
 0x2ee   : > { %716 = vrot.lane.b32.xlu1 %v3932_v4, %s3494_s30 }
 0x2f0   : > { %692 = vrot.lane.b32.xlu0 %v3928_v3, %s3497_s4 }
 0x2f2   : > { %696 = vrot.lane.b32.xlu1 %v3932_v4, %s3497_s4 }
 0x2f4   : > { %672 = vrot.lane.b32.xlu0 %v3928_v3, %s3498_s5 }
 0x2f6   : > { %676 = vrot.lane.b32.xlu1 %v3932_v4, %s3498_s5 }
 0x2f8   : > { %652 = vrot.lane.b32.xlu0 %v3928_v3, %s3499_s6 }
 0x2fa   : > { %656 = vrot.lane.b32.xlu1 %v3932_v4, %s3499_s6 }
 0x2fc   : > { %796 = vrot.lane.b32.xlu0 %v3928_v3, %s3491_s27 }
 0x2fe   : > { %800 = vrot.lane.b32.xlu1 %v3932_v4, %s3491_s27 }
 0x300   : > { %794 = vrot.lane.b32.xlu0 %v3902_v58, %s3491_s27 }
 0x302   : > { %798 = vrot.lane.b32.xlu1 %v3904_v60, %s3491_s27 }
 0x304   : > { %857 = vperm.xlu0 %3462, %v3120_v7  }
 0x336   : > { %v775_v11 = vpop.permute.xlu0 %774 }
 0x338   : > { %v779_v12 = vpop.permute.xlu1 %778 }
 0x339   : > { %v784_v49 = vsel %vm321_vm6, %v779_v12, %v775_v11  ;;  %v782_v52 = vsel %vm321_vm6, %v775_v11, %v779_v12 }
 0x33a   : > { %v755_v15 = vpop.permute.xlu0 %754 }
 0x33c   : > { %v759_v16 = vpop.permute.xlu1 %758 }
 0x33d   : > { %v764_v57 = vsel %vm5533_vm7, %v759_v16, %v755_v15  ;;  %v762_v61 = vsel %vm5534_vm5, %v755_v15, %v759_v16  ;;  %vm5537_vm7 = vcmp.lt.s32.totalorder %v3627_v13, 15 }
 0x33e   : > { %v735_v21 = vpop.permute.xlu0 %734 }
 0x340   : > { %v739_v22 = vpop.permute.xlu1 %738 }
 0x342   : > { %v711_v26 = vpop.permute.xlu0 %710 }
 0x344   : > { %v715_v27 = vpop.permute.xlu1 %714 }
 0x346   : > { %v691_v30 = vpop.permute.xlu0 %690 }
 0x348   : > { %v695_v31 = vpop.permute.xlu1 %694 }
 0x34a   : > { %v3981_v34 = vpop.permute.xlu0 %670 }
 0x34c   : > { %v3983_v35 = vpop.permute.xlu1 %674 }
 0x34e   : > { %v777_v39 = vpop.permute.xlu0 %776 }
 0x350   : > { %v781_v40 = vpop.permute.xlu1 %780 }
 0x351   : > { %v785_v43 = vsel %vm321_vm6, %v781_v40, %v777_v39  ;;  %v783_v44 = vsel %vm321_vm6, %v777_v39, %v781_v40 }
 0x352   : > { %3200 = vmatprep.subr.msk.mxu0 %vm5513_vm1, %v785_v43  ;;  %v757_v48 = vpop.permute.xlu0 %756 }
 0x353   : > { %865 = vmatpush1.msra.mxu0 %v783_v44 }
 0x354   : > { %v761_v50 = vpop.permute.xlu1 %760  ;;  %3201 = vmatprep.subr.msk.mxu0 %vm5513_vm1, %v784_v49 }
 0x355   : > { %867 = vmatpush1.msra.mxu0 %v782_v52  ;;  %v765_v54 = vsel %vm5531_vm10, %v761_v50, %v757_v48  ;;  %v763_v55 = vsel %vm5532_vm2, %v757_v48, %v761_v50  ;;  %vm5535_vm10 = vcmp.lt.s32.totalorder %v3613_v6, 127 }
 0x356   : > { %3202 = vmatprep.subr.msk.mxu0 %vm3664_vm8, %v765_v54  ;;  %v737_v56 = vpop.permute.xlu0 %736  ;;  %vm5536_vm2 = vmmov %vm5535_vm10 }
 0x357   : > { %3203 = vmatpush1.msk.msra.mxu0 %vm181_vm9, %v763_v55  ;;  %vm5538_vm15 = vmmov %vm5536_vm2 }
 0x358   : > { %v741_v59 = vpop.permute.xlu1 %740  ;;  %3204 = vmatprep.subr.msk.mxu0 %vm3664_vm8, %v764_v57  ;;  %v744_v1 = vsel %vm5538_vm15, %v739_v22, %v735_v21  ;;  %vm5539_vm5 = vmmov %vm5536_vm2  ;;  %vm5541_vm15 = vcmp.lt.s32.totalorder %v3613_v6, 1 }
 0x359   : > { %3205 = vmatpush1.msk.msra.mxu0 %vm181_vm9, %v762_v61  ;;  %v745_v62 = vsel %vm5535_vm10, %v741_v59, %v737_v56  ;;  %v743_v63 = vsel %vm5536_vm2, %v737_v56, %v741_v59  ;;  %v742_v7 = vsel %vm5539_vm5, %v735_v21, %v739_v22  ;;  %vm5540_vm10 = vmmov %vm5537_vm7 }
 0x35a   : > { %3206 = vmatprep.subr.msk.mxu0 %vm186_vm0, %v745_v62  ;;  %v651_v0 = vpop.permute.xlu0 %650  ;;  %vm5542_vm2 = vmmov %vm5541_vm15 }
 0x35b   : > { %3207 = vmatpush1.msk.msra.mxu0 %vm5537_vm7, %v743_v63  ;;  %vm5543_vm7 = vmmov %vm5542_vm2 }
 0x35c   : > { %v655_v5 = vpop.permute.xlu1 %654  ;;  %3208 = vmatprep.subr.msk.mxu0 %vm186_vm0, %v744_v1  ;;  %vm5544_vm5 = vmmov %vm5542_vm2 }
 0x35d   : > { %3209 = vmatpush1.msk.msra.mxu0 %vm5540_vm10, %v742_v7  ;;  %vm5545_vm10 = vcmp.lt.s32.totalorder %v3613_v6, 15  ;;  %v658_v55 = vsel %vm229_vm13, %v651_v0, %v655_v5 }
 0x35e   : > { %876 = vmatprep.subr.mxu0 %v3932_v4  ;;  %v713_v11 = vpop.permute.xlu0 %712 }
 0x35f   : > { %877 = vmatpush1.msra.mxu0 %v3928_v3  ;;  %v718_v3 = vsel %vm5543_vm7, %v711_v26, %v715_v27 }
 0x360   : > { %v717_v12 = vpop.permute.xlu1 %716  ;;  %878 = vmatprep.subr.mxu0 %v3904_v60 }
 0x361   : > { %879 = vmatpush1.msra.mxu0 %v3902_v58  ;;  %v719_v15 = vsel %vm5541_vm15, %v713_v11, %v717_v12  ;;  %v721_v16 = vsel %vm5542_vm2, %v717_v12, %v713_v11  ;;  %v720_v58 = vsel %vm5544_vm5, %v715_v27, %v711_v26  ;;  %vm5546_vm15 = vmmov %vm5545_vm10  ;;  %vm5549_vm5 = vcmp.lt.s32.totalorder %v3613_v6, 16 }
 0x362   : > { %3210 = vmatprep.subr.msk.mxu0 %vm182_vm4, %v719_v15  ;;  %v693_v21 = vpop.permute.xlu0 %692  ;;  %vm5547_vm2 = vmmov %vm5545_vm10 }
 0x363   : > { %3211 = vmatpush1.msk.msra.mxu0 %vm181_vm9, %v721_v16  ;;  %v698_v40 = vsel %vm5547_vm2, %v691_v30, %v695_v31  ;;  %vm5548_vm7 = vmmov %vm5547_vm2 }
 0x364   : > { %v697_v4 = vpop.permute.xlu1 %696  ;;  %3212 = vmatprep.subr.msk.mxu0 %vm182_vm4, %v718_v3  ;;  %v700_v27 = vsel %vm5548_vm7, %v695_v31, %v691_v30  ;;  %vm5552_vm2 = vmmov %vm5549_vm5  ;;  %vm5553_vm7 = vcmp.lt.s32.totalorder %v3613_v6, 111 }
 0x365   : > { %3213 = vmatpush1.msk.msra.mxu0 %vm181_vm9, %v720_v58  ;;  %v699_v60 = vsel %vm5545_vm10, %v693_v21, %v697_v4  ;;  %v701_v22 = vsel %vm5546_vm15, %v697_v4, %v693_v21  ;;  %vm5550_vm10 = vmmov %vm5549_vm5  ;;  %v680_v31 = vsel %vm5552_vm2, %v3983_v35, %v3981_v34 }
 0x366   : > { %3214 = vmatprep.subr.msk.mxu0 %vm186_vm0, %v699_v60  ;;  %v673_v39 = vpop.permute.xlu0 %672  ;;  %vm5551_vm15 = vmmov %vm5549_vm5 }
 0x367   : > { %3215 = vmatpush1.msk.msra.mxu0 %vm3729_vm14, %v701_v22  ;;  %v678_v49 = vsel %vm5551_vm15, %v3981_v34, %v3983_v35  ;;  %v660_v35 = vsel %vm229_vm13, %v655_v5, %v651_v0  ;;  %v3118_v0 = vld [vmem:[%s5501_s1 + $0x40] sm:$0xff] }
 0x368   : > { %v677_v26 = vpop.permute.xlu1 %676  ;;  %3216 = vmatprep.subr.msk.mxu0 %vm186_vm0, %v698_v40 }
 0x369   : > { %3217 = vmatpush1.msk.msra.mxu0 %vm3729_vm14, %v700_v27  ;;  %v679_v43 = vsel %vm5549_vm5, %v673_v39, %v677_v26  ;;  %v681_v44 = vsel %vm5550_vm10, %v677_v26, %v673_v39  ;;  %vm5554_vm5 = vmmov %vm5553_vm7  ;;  %vm5555_vm10 = vcmp.lt.s32.totalorder %v3627_v13, 15 }
 0x36a   : > { %888 = vmatprep.subr.mxu0 %v679_v43  ;;  %v653_v48 = vpop.permute.xlu0 %652  ;;  %vm5556_vm15 = vmmov %vm5554_vm5 }
 0x36b   : > { %3218 = vmatpush1.msk.msra.mxu0 %vm193_vm12, %v681_v44  ;;  %vm5557_vm2 = vmmov %vm5554_vm5 }
 0x36c   : > { %v657_v30 = vpop.permute.xlu1 %656  ;;  %890 = vmatprep.subr.mxu0 %v678_v49 }
 0x36d   : > { %3219 = vmatpush1.msk.msra.mxu0 %vm193_vm12, %v680_v31  ;;  %v659_v50 = vsel %vm229_vm13, %v653_v48, %v657_v30  ;;  %v661_v52 = vsel %vm229_vm13, %v657_v30, %v653_v48 }
 0x36e   : > { %3220 = vmatprep.subr.msk.mxu0 %vm182_vm4, %v659_v50  ;;  %v797_v54 = vpop.permute.xlu0 %796 }
 0x36f   : > { %3221 = vmatpush1.msk.msra.mxu0 %vm3765_vm11, %v661_v52 }
 0x370   : > { %v801_v34 = vpop.permute.xlu1 %800  ;;  %3222 = vmatprep.subr.msk.mxu0 %vm182_vm4, %v658_v55 }
 0x371   : > { %3223 = vmatpush1.msk.msra.mxu0 %vm3765_vm11, %v660_v35  ;;  %v805_v56 = vsel %vm5553_vm7, %v801_v34, %v797_v54  ;;  %v803_v57 = vsel %vm5554_vm5, %v797_v54, %v801_v34  ;;  %vm5558_vm7 = vmmov %vm5555_vm10 }
 0x372   : > { %3224 = vmatprep.subr.msk.mxu0 %vm3634_vm3, %v805_v56  ;;  %v795_v59 = vpop.permute.xlu0 %794  ;;  %vm5559_vm5 = vmmov %vm5557_vm2 }
 0x373   : > { %3225 = vmatpush2.msk.msra.mxu0 %vm5555_vm10, %v803_v57  ;;  %vm5560_vm10 = vmmov %vm5557_vm2 }
 0x374   : > { %v799_v61 = vpop.permute.xlu1 %798 }
 0x375   : > { %v804_v62 = vsel %vm5556_vm15, %v799_v61, %v795_v59  ;;  %v802_v63 = vsel %vm5557_vm2, %v795_v59, %v799_v61  ;;  %vm5561_vm15 = vmmov %vm5558_vm7  ;;  %vm5562_vm2 = vcmp.lt.s32.totalorder %v3613_v6, 113 }
 0x376   : > { %3226 = vmatprep.subr.msk.mxu0 %vm3634_vm3, %v804_v62 }
 0x377   : > { %3227 = vmatpush2.msk.msra.mxu0 %vm5558_vm7, %v802_v63  ;;  %vm5563_vm7 = vmmov %vm5562_vm2 }
 0x378   : > { %929 = vmatmul.mubr.f32.vlgmr.msra.gmra.mxu0 %v3118_v0 }
 0x379   : > { %1612 = vmatprep.mubr.f32.mxu0 %v3495_v2 }
 0x37f   : > { %v858_v1 = vpop.permute.xlu0 %857 }
 0x438   : > { %v930_v5 = vpop.f32.mrf.mxu0 }
 0x439   : > { %v931_v7 = vadd.f32 %v930_v5, %v858_v1 }
 0x43a   : > { %v932_v11 = vpop.f32.mrf.mxu0 }
 0x43b   : > { %v4118_v12 = vadd.f32 %v931_v7, %v3788_v51  ;;  %v933_v15 = vadd.f32 %v932_v11, %v858_v1  ;;  %v3125_v51 = vld [vmem:[%s5502_s2 + $0x38] sm:$0xff]  ;;  %v3122_v11 = vld [vmem:[%s5501_s1 + $0x60] sm:$0xff] }
 0x43d   : > { %v4121_v16 = vadd.f32 %v933_v15, %v3794_v53  ;;  %1009 = vrot.lane.b32.xlu1 %v4118_v12, %s3491_s27  ;;  %v3124_v53 = vld [vmem:[%s5502_s2 + $0x30] sm:$0xff] }
 0x43e   : > { %v3123_v15 = vld [vmem:[%s5501_s1 + $0x70] sm:$0xff] }
 0x43f   : > { %1011 = vrot.lane.b32.xlu0 %v4121_v16, %s3491_s27 }
 0x441   : > { %999 = vrot.lane.b32.xlu1 %v4118_v12, %s3490_s26 }
 0x443   : > { %1001 = vrot.lane.b32.xlu0 %v4121_v16, %s3490_s26 }
 0x445   : > { %989 = vrot.lane.b32.xlu1 %v4118_v12, %s3492_s28 }
 0x447   : > { %991 = vrot.lane.b32.xlu0 %v4121_v16, %s3492_s28 }
 0x449   : > { %979 = vrot.lane.b32.xlu1 %v4118_v12, %s3493_s29 }
 0x44b   : > { %981 = vrot.lane.b32.xlu0 %v4121_v16, %s3493_s29 }
 0x44d   : > { %967 = vrot.lane.b32.xlu1 %v4118_v12, %s3494_s30 }
 0x44f   : > { %969 = vrot.lane.b32.xlu0 %v4121_v16, %s3494_s30 }
 0x451   : > { %957 = vrot.lane.b32.xlu1 %v4118_v12, %s3497_s4 }
 0x453   : > { %959 = vrot.lane.b32.xlu0 %v4121_v16, %s3497_s4 }
 0x455   : > { %947 = vrot.lane.b32.xlu1 %v4118_v12, %s3498_s5 }
 0x457   : > { %949 = vrot.lane.b32.xlu0 %v4121_v16, %s3498_s5 }
 0x459   : > { %937 = vrot.lane.b32.xlu1 %v4118_v12, %s3499_s6 }
 0x45b   : > { %939 = vrot.lane.b32.xlu0 %v4121_v16, %s3499_s6 }
 0x45d   : > { %1050 = vperm.xlu1 %3463, %v3125_v51  }
 0x45f   : > { %1045 = vperm.xlu0 %3462, %v3124_v53  }
 0x4af   : > { %v1010_v21 = vpop.permute.xlu1 %1009 }
 0x4b1   : > { %v1012_v3 = vpop.permute.xlu0 %1011 }
 0x4b2   : > { %v1013_v4 = vsel %vm5559_vm5, %v1010_v21, %v1012_v3  ;;  %v1014_v58 = vsel %vm5560_vm10, %v1012_v3, %v1010_v21  ;;  %vm5564_vm5 = vcmp.lt.s32.totalorder %v3613_v6, 127 }
 0x4b3   : > { %3228 = vmatprep.subr.msk.mxu1 %vm3634_vm3, %v1014_v58  ;;  %v1000_v60 = vpop.permute.xlu1 %999  ;;  %vm5565_vm10 = vmmov %vm5564_vm5 }
 0x4b4   : > { %3229 = vmatpush1.msk.msra.mxu1 %vm5561_vm15, %v1013_v4 }
 0x4b5   : > { %v1002_v22 = vpop.permute.xlu0 %1001 }
 0x4b6   : > { %v1004_v39 = vsel %vm321_vm6, %v1002_v22, %v1000_v60  ;;  %v1003_v40 = vsel %vm321_vm6, %v1000_v60, %v1002_v22 }
 0x4b7   : > { %3230 = vmatprep.subr.msk.mxu1 %vm5513_vm1, %v1004_v39  ;;  %v990_v26 = vpop.permute.xlu1 %989 }
 0x4b8   : > { %1076 = vmatpush1.msra.mxu1 %v1003_v40 }
 0x4b9   : > { %v992_v27 = vpop.permute.xlu0 %991 }
 0x4ba   : > { %v993_v43 = vsel %vm5562_vm2, %v990_v26, %v992_v27  ;;  %v994_v44 = vsel %vm5563_vm7, %v992_v27, %v990_v26  ;;  %vm5566_vm2 = vcmp.lt.s32.totalorder %v3613_v6, 1 }
 0x4bb   : > { %3231 = vmatprep.subr.msk.mxu1 %vm3664_vm8, %v994_v44  ;;  %v980_v48 = vpop.permute.xlu1 %979  ;;  %vm5567_vm7 = vmmov %vm5566_vm2 }
 0x4bc   : > { %3232 = vmatpush1.msk.msra.mxu1 %vm181_vm9, %v993_v43 }
 0x4bd   : > { %v982_v49 = vpop.permute.xlu0 %981 }
 0x4be   : > { %v983_v30 = vsel %vm5564_vm5, %v980_v48, %v982_v49  ;;  %v984_v31 = vsel %vm5565_vm10, %v982_v49, %v980_v48  ;;  %vm5568_vm5 = vcmp.lt.s32.totalorder %v3613_v6, 15  ;;  %v3129_v48 = vld [vmem:[%s5501_s1 + $0x88] sm:$0xff]  ;;  %v3130_v49 = vld [vmem:[%s5502_s2 + $0x40] sm:$0xff] }
 0x4bf   : > { %3233 = vmatprep.subr.msk.mxu1 %vm186_vm0, %v984_v31  ;;  %v968_v50 = vpop.permute.xlu1 %967  ;;  %vm5569_vm10 = vmmov %vm5568_vm5 }
 0x4c0   : > { %3234 = vmatpush1.msk.msra.mxu1 %vm5561_vm15, %v983_v30  ;;  %vm5570_vm15 = vcmp.lt.s32.totalorder %v3613_v6, 16 }
 0x4c1   : > { %v970_v52 = vpop.permute.xlu0 %969  ;;  %1081 = vmatprep.subr.mxu1 %v4121_v16 }
 0x4c2   : > { %v972_v54 = vsel %vm5566_vm2, %v970_v52, %v968_v50  ;;  %1082 = vmatpush1.msra.mxu1 %v4118_v12  ;;  %v971_v55 = vsel %vm5567_vm7, %v968_v50, %v970_v52  ;;  %vm5571_vm2 = vmmov %vm5570_vm15  ;;  %vm5572_vm7 = vcmask 588800  }
 0x4c3   : > { %3235 = vmatprep.subr.msk.mxu1 %vm182_vm4, %v971_v55  ;;  %v958_v34 = vpop.permute.xlu1 %957 }
 0x4c4   : > { %3236 = vmatpush1.msk.msra.mxu1 %vm181_vm9, %v972_v54 }
 0x4c5   : > { %v960_v35 = vpop.permute.xlu0 %959 }
 0x4c6   : > { %v962_v56 = vsel %vm5568_vm5, %v960_v35, %v958_v34  ;;  %v961_v57 = vsel %vm5569_vm10, %v958_v34, %v960_v35  ;;  %vm5573_vm5 = vmmov %vm5572_vm7  ;;  %vm5574_vm10 = vcmask 130048  }
 0x4c7   : > { %3237 = vmatprep.subr.msk.mxu1 %vm186_vm0, %v961_v57  ;;  %v948_v59 = vpop.permute.xlu1 %947 }
 0x4c8   : > { %3238 = vmatpush1.msk.msra.mxu1 %vm3729_vm14, %v962_v56 }
 0x4c9   : > { %v950_v61 = vpop.permute.xlu0 %949 }
 0x4ca   : > { %v952_v62 = vsel %vm5570_vm15, %v950_v61, %v948_v59  ;;  %v951_v63 = vsel %vm5571_vm2, %v948_v59, %v950_v61  ;;  %vm5575_vm15 = vcmp.lt.s32.totalorder %v3613_v6, 113 }
 0x4cb   : > { %1087 = vmatprep.subr.mxu1 %v951_v63  ;;  %v938_v0 = vpop.permute.xlu1 %937  ;;  %vm5576_vm2 = vmmov %vm5575_vm15 }
 0x4cc   : > { %3239 = vmatpush1.msk.msra.mxu1 %vm193_vm12, %v952_v62 }
 0x4cd   : > { %v940_v1 = vpop.permute.xlu0 %939 }
 0x4ce   : > { %v942_v5 = vsel %vm229_vm13, %v940_v1, %v938_v0  ;;  %v941_v7 = vsel %vm229_vm13, %v938_v0, %v940_v1 }
 0x4cf   : > { %3240 = vmatprep.subr.msk.mxu1 %vm182_vm4, %v941_v7 }
 0x4d0   : > { %3241 = vmatpush1.msk.msra.mxu1 %vm3765_vm11, %v942_v5 }
 0x4d1   : > { %3126 = vmatmul.mubr.msk.f32.vlgmr.msra.gmra.mxu1 %vm5572_vm7, %v3122_v11  ;;  %vm5577_vm7 = vmmov %vm5576_vm2 }
 0x4d2   : > { %1129 = vmatprep.mubr.f32.mxu1 %v3495_v2 }
 0x4d5   : > { %3127 = vmatmul.mubr.msk.f32.gmra.mxu1 %vm5573_vm5, %v3123_v15  ;;  %vm5578_vm5 = vmmov %vm5576_vm2 }
 0x4d6   : > { %3131 = vmatprep.mubr.msk.f32.mxu1 %vm5574_vm10, %v3129_v48  ;;  %vm5579_vm10 = vcmp.lt.s32.totalorder %v3613_v6, 127 }
 0x4d8   : > { %v1051_v39 = vpop.permute.xlu1 %1050 }
 0x4da   : > { %v1046_v51 = vpop.permute.xlu0 %1045 }
 0x591   : > { %v1125_v53 = vpop.f32.mrf.mxu1 }
 0x592   : > { %v1126_v21 = vadd.f32 %v1125_v53, %v1046_v51 }
 0x593   : > { %v1127_v3 = vpop.f32.mrf.mxu1 }
 0x594   : > { %v4232_v4 = vmax.f32 %v1126_v21, 0.0  ;;  %v1128_v58 = vadd.f32 %v1127_v3, %v1046_v51 }
 0x595   : > { %v1131_v22 = vpop.f32.mrf.mxu1 }
 0x596   : > { %v4234_v60 = vmax.f32 %v1128_v58, 0.0  ;;  %1264 = vrot.lane.b32.xlu1 %v4232_v4, %s3490_s26  ;;  %v1132_v26 = vadd.f32 %v1131_v22, %v1051_v39 }
 0x597   : > { %v1133_v40 = vpop.f32.mrf.mxu1 }
 0x598   : > { %1268 = vrot.lane.b32.xlu0 %v4234_v60, %s3490_s26  ;;  %v1134_v27 = vadd.f32 %v1133_v40, %v1051_v39  ;;  %v4258_v43 = vmax.f32 %v1132_v26, 0.0 }
 0x59a   : > { %1244 = vrot.lane.b32.xlu1 %v4232_v4, %s3492_s28  ;;  %v4262_v44 = vmax.f32 %v1134_v27, 0.0 }
 0x59c   : > { %1248 = vrot.lane.b32.xlu0 %v4234_v60, %s3492_s28 }
 0x59e   : > { %1224 = vrot.lane.b32.xlu1 %v4232_v4, %s3493_s29 }
 0x5a0   : > { %1228 = vrot.lane.b32.xlu0 %v4234_v60, %s3493_s29 }
 0x5a2   : > { %1200 = vrot.lane.b32.xlu1 %v4232_v4, %s3494_s30 }
 0x5a4   : > { %1204 = vrot.lane.b32.xlu0 %v4234_v60, %s3494_s30 }
 0x5a6   : > { %1180 = vrot.lane.b32.xlu1 %v4232_v4, %s3497_s4 }
 0x5a8   : > { %1184 = vrot.lane.b32.xlu0 %v4234_v60, %s3497_s4 }
 0x5aa   : > { %1160 = vrot.lane.b32.xlu1 %v4232_v4, %s3498_s5 }
 0x5ac   : > { %1164 = vrot.lane.b32.xlu0 %v4234_v60, %s3498_s5 }
 0x5ae   : > { %1266 = vrot.lane.b32.xlu1 %v4258_v43, %s3490_s26 }
 0x5b0   : > { %1270 = vrot.lane.b32.xlu0 %v4262_v44, %s3490_s26 }
 0x5b2   : > { %1246 = vrot.lane.b32.xlu1 %v4258_v43, %s3492_s28 }
 0x5b4   : > { %1250 = vrot.lane.b32.xlu0 %v4262_v44, %s3492_s28 }
 0x5b6   : > { %1226 = vrot.lane.b32.xlu1 %v4258_v43, %s3493_s29 }
 0x5b8   : > { %1230 = vrot.lane.b32.xlu0 %v4262_v44, %s3493_s29 }
 0x5ba   : > { %1140 = vrot.lane.b32.xlu1 %v4232_v4, %s3499_s6 }
 0x5bc   : > { %1144 = vrot.lane.b32.xlu0 %v4234_v60, %s3499_s6 }
 0x5be   : > { %1202 = vrot.lane.b32.xlu1 %v4258_v43, %s3494_s30 }
 0x5c0   : > { %1206 = vrot.lane.b32.xlu0 %v4262_v44, %s3494_s30 }
 0x5c2   : > { %1182 = vrot.lane.b32.xlu1 %v4258_v43, %s3497_s4 }
 0x5c4   : > { %1186 = vrot.lane.b32.xlu0 %v4262_v44, %s3497_s4 }
 0x5c6   : > { %1162 = vrot.lane.b32.xlu1 %v4258_v43, %s3498_s5 }
 0x5c8   : > { %1166 = vrot.lane.b32.xlu0 %v4262_v44, %s3498_s5 }
 0x5ca   : > { %1142 = vrot.lane.b32.xlu1 %v4258_v43, %s3499_s6 }
 0x5cc   : > { %1146 = vrot.lane.b32.xlu0 %v4262_v44, %s3499_s6 }
 0x5ce   : > { %1286 = vrot.lane.b32.xlu1 %v4258_v43, %s3491_s27 }
 0x5d0   : > { %1290 = vrot.lane.b32.xlu0 %v4262_v44, %s3491_s27 }
 0x5d2   : > { %1284 = vrot.lane.b32.xlu1 %v4232_v4, %s3491_s27 }
 0x5d4   : > { %1288 = vrot.lane.b32.xlu0 %v4234_v60, %s3491_s27 }
 0x5d6   : > { %1347 = vperm.xlu1 %3463, %v3130_v49  }
 0x608   : > { %v1265_v30 = vpop.permute.xlu1 %1264 }
 0x60a   : > { %v1269_v31 = vpop.permute.xlu0 %1268 }
 0x60b   : > { %v1274_v7 = vsel %vm321_vm6, %v1269_v31, %v1265_v30  ;;  %v1272_v15 = vsel %vm321_vm6, %v1265_v30, %v1269_v31 }
 0x60c   : > { %v1245_v50 = vpop.permute.xlu1 %1244 }
 0x60e   : > { %v1249_v52 = vpop.permute.xlu0 %1248 }
 0x60f   : > { %v1254_v3 = vsel %vm5577_vm7, %v1249_v52, %v1245_v50  ;;  %v1252_v58 = vsel %vm5578_vm5, %v1245_v50, %v1249_v52  ;;  %vm5582_vm7 = vmmov %vm5579_vm10 }
 0x610   : > { %v1225_v54 = vpop.permute.xlu1 %1224  ;;  %vm5583_vm5 = vmmov %vm5582_vm7 }
 0x612   : > { %v1229_v55 = vpop.permute.xlu0 %1228 }
 0x613   : > { %v1234_v27 = vsel %vm5582_vm7, %v1229_v55, %v1225_v54  ;;  %v1232_v48 = vsel %vm5583_vm5, %v1225_v54, %v1229_v55 }
 0x614   : > { %v1201_v34 = vpop.permute.xlu1 %1200 }
 0x616   : > { %v1205_v35 = vpop.permute.xlu0 %1204 }
 0x618   : > { %v1181_v56 = vpop.permute.xlu1 %1180 }
 0x61a   : > { %v1185_v57 = vpop.permute.xlu0 %1184 }
 0x61c   : > { %v4311_v59 = vpop.permute.xlu1 %1160 }
 0x61e   : > { %v4313_v61 = vpop.permute.xlu0 %1164 }
 0x620   : > { %v1267_v62 = vpop.permute.xlu1 %1266 }
 0x622   : > { %v1271_v63 = vpop.permute.xlu0 %1270 }
 0x623   : > { %v1275_v0 = vsel %vm321_vm6, %v1271_v63, %v1267_v62  ;;  %v1273_v1 = vsel %vm321_vm6, %v1267_v62, %v1271_v63 }
 0x624   : > { %3242 = vmatprep.subr.msk.mxu1 %vm5513_vm1, %v1275_v0  ;;  %v1247_v5 = vpop.permute.xlu1 %1246 }
 0x625   : > { %1354 = vmatpush1.msra.mxu1 %v1273_v1 }
 0x626   : > { %v1251_v11 = vpop.permute.xlu0 %1250  ;;  %3243 = vmatprep.subr.msk.mxu1 %vm5513_vm1, %v1274_v7 }
 0x627   : > { %v1253_v51 = vsel %vm5575_vm15, %v1247_v5, %v1251_v11  ;;  %1356 = vmatpush1.msra.mxu1 %v1272_v15  ;;  %v1255_v53 = vsel %vm5576_vm2, %v1251_v11, %v1247_v5  ;;  %vm5580_vm15 = vmmov %vm5579_vm10  ;;  %vm5581_vm2 = vcmp.lt.s32.totalorder %v3627_v13, 15 }
 0x628   : > { %3244 = vmatprep.subr.msk.mxu1 %vm3664_vm8, %v1255_v53  ;;  %v1227_v21 = vpop.permute.xlu1 %1226 }
 0x629   : > { %3245 = vmatpush1.msk.msra.mxu1 %vm181_vm9, %v1253_v51 }
 0x62a   : > { %v1231_v22 = vpop.permute.xlu0 %1230  ;;  %3246 = vmatprep.subr.msk.mxu1 %vm3664_vm8, %v1254_v3 }
 0x62b   : > { %v1233_v39 = vsel %vm5579_vm10, %v1227_v21, %v1231_v22  ;;  %3247 = vmatpush1.msk.msra.mxu1 %vm181_vm9, %v1252_v58  ;;  %v1235_v40 = vsel %vm5580_vm15, %v1231_v22, %v1227_v21  ;;  %vm5584_vm10 = vmmov %vm5581_vm2  ;;  %vm5585_vm15 = vcmp.lt.s32.totalorder %v3613_v6, 1 }
 0x62c   : > { %3248 = vmatprep.subr.msk.mxu1 %vm186_vm0, %v1235_v40  ;;  %v1141_v26 = vpop.permute.xlu1 %1140 }
 0x62d   : > { %3249 = vmatpush1.msk.msra.mxu1 %vm5581_vm2, %v1233_v39  ;;  %vm5586_vm2 = vmmov %vm5585_vm15 }
 0x62e   : > { %v1145_v49 = vpop.permute.xlu0 %1144  ;;  %3250 = vmatprep.subr.msk.mxu1 %vm186_vm0, %v1234_v27  ;;  %vm5587_vm7 = vmmov %vm5586_vm2 }
 0x62f   : > { %3251 = vmatpush1.msk.msra.mxu1 %vm5584_vm10, %v1232_v48  ;;  %vm5588_vm5 = vmmov %vm5586_vm2  ;;  %vm5589_vm10 = vcmp.lt.s32.totalorder %v3613_v6, 15 }
 0x630   : > { %1365 = vmatprep.subr.mxu1 %v4262_v44  ;;  %v1203_v30 = vpop.permute.xlu1 %1202 }
 0x631   : > { %1366 = vmatpush1.msra.mxu1 %v4258_v43  ;;  %v1208_v43 = vsel %vm5587_vm7, %v1201_v34, %v1205_v35 }
 0x632   : > { %v1207_v31 = vpop.permute.xlu0 %1206  ;;  %1367 = vmatprep.subr.mxu1 %v4234_v60  ;;  %v1210_v60 = vsel %vm5588_vm5, %v1205_v35, %v1201_v34  ;;  %vm5593_vm5 = vcmp.lt.s32.totalorder %v3613_v6, 16 }
 0x633   : > { %v1211_v50 = vsel %vm5585_vm15, %v1207_v31, %v1203_v30  ;;  %1368 = vmatpush1.msra.mxu1 %v4232_v4  ;;  %v1209_v52 = vsel %vm5586_vm2, %v1203_v30, %v1207_v31  ;;  %vm5590_vm15 = vmmov %vm5589_vm10 }
 0x634   : > { %3252 = vmatprep.subr.msk.mxu1 %vm182_vm4, %v1209_v52  ;;  %v1183_v54 = vpop.permute.xlu1 %1182  ;;  %vm5591_vm2 = vmmov %vm5589_vm10 }
 0x635   : > { %3253 = vmatpush1.msk.msra.mxu1 %vm181_vm9, %v1211_v50  ;;  %v1188_v34 = vsel %vm5591_vm2, %v1181_v56, %v1185_v57  ;;  %vm5592_vm7 = vmmov %vm5591_vm2 }
 0x636   : > { %v1187_v44 = vpop.permute.xlu0 %1186  ;;  %3254 = vmatprep.subr.msk.mxu1 %vm182_vm4, %v1208_v43  ;;  %v1190_v35 = vsel %vm5592_vm7, %v1185_v57, %v1181_v56  ;;  %vm5596_vm2 = vmmov %vm5593_vm5  ;;  %vm5597_vm7 = vcmp.lt.s32.totalorder %v3613_v6, 111 }
 0x637   : > { %v1191_v4 = vsel %vm5589_vm10, %v1187_v44, %v1183_v54  ;;  %3255 = vmatpush1.msk.msra.mxu1 %vm181_vm9, %v1210_v60  ;;  %v1189_v55 = vsel %vm5590_vm15, %v1183_v54, %v1187_v44  ;;  %vm5594_vm10 = vmmov %vm5593_vm5  ;;  %v1170_v57 = vsel %vm5596_vm2, %v4313_v61, %v4311_v59 }
 0x638   : > { %3256 = vmatprep.subr.msk.mxu1 %vm186_vm0, %v1189_v55  ;;  %v1163_v62 = vpop.permute.xlu1 %1162  ;;  %vm5595_vm15 = vmmov %vm5593_vm5 }
 0x639   : > { %3257 = vmatpush1.msk.msra.mxu1 %vm3729_vm14, %v1191_v4  ;;  %v1168_v56 = vsel %vm5595_vm15, %v4311_v59, %v4313_v61  ;;  %v1148_v59 = vsel %vm229_vm13, %v1141_v26, %v1145_v49  ;;  %v1150_v61 = vsel %vm229_vm13, %v1145_v49, %v1141_v26  ;;  %v3128_v26 = vld [vmem:[%s5501_s1 + $0x80] sm:$0xff] }
 0x63a   : > { %v1167_v63 = vpop.permute.xlu0 %1166  ;;  %3258 = vmatprep.subr.msk.mxu1 %vm186_vm0, %v1188_v34 }
 0x63b   : > { %v1171_v0 = vsel %vm5593_vm5, %v1167_v63, %v1163_v62  ;;  %3259 = vmatpush1.msk.msra.mxu1 %vm3729_vm14, %v1190_v35  ;;  %v1169_v1 = vsel %vm5594_vm10, %v1163_v62, %v1167_v63  ;;  %vm5598_vm5 = vmmov %vm5597_vm7  ;;  %vm5599_vm10 = vcmp.lt.s32.totalorder %v3627_v13, 15 }
 0x63c   : > { %1377 = vmatprep.subr.mxu1 %v1169_v1  ;;  %v1143_v5 = vpop.permute.xlu1 %1142  ;;  %vm5600_vm15 = vmmov %vm5598_vm5 }
 0x63d   : > { %3260 = vmatpush1.msk.msra.mxu1 %vm193_vm12, %v1171_v0  ;;  %vm5601_vm2 = vmmov %vm5598_vm5 }
 0x63e   : > { %v1147_v7 = vpop.permute.xlu0 %1146  ;;  %1379 = vmatprep.subr.mxu1 %v1168_v56 }
 0x63f   : > { %v1151_v11 = vsel %vm229_vm13, %v1147_v7, %v1143_v5  ;;  %3261 = vmatpush1.msk.msra.mxu1 %vm193_vm12, %v1170_v57  ;;  %v1149_v15 = vsel %vm229_vm13, %v1143_v5, %v1147_v7 }
 0x640   : > { %3262 = vmatprep.subr.msk.mxu1 %vm182_vm4, %v1149_v15  ;;  %v1287_v51 = vpop.permute.xlu1 %1286 }
 0x641   : > { %3263 = vmatpush1.msk.msra.mxu1 %vm3765_vm11, %v1151_v11 }
 0x642   : > { %v1291_v53 = vpop.permute.xlu0 %1290  ;;  %3264 = vmatprep.subr.msk.mxu1 %vm182_vm4, %v1148_v59 }
 0x643   : > { %v1293_v21 = vsel %vm5597_vm7, %v1287_v51, %v1291_v53  ;;  %3265 = vmatpush1.msk.msra.mxu1 %vm3765_vm11, %v1150_v61  ;;  %v1295_v3 = vsel %vm5598_vm5, %v1291_v53, %v1287_v51  ;;  %vm5602_vm7 = vmmov %vm5599_vm10 }
 0x644   : > { %3266 = vmatprep.subr.msk.mxu1 %vm3634_vm3, %v1295_v3  ;;  %v1285_v58 = vpop.permute.xlu1 %1284  ;;  %vm5603_vm5 = vmmov %vm5601_vm2 }
 0x645   : > { %3267 = vmatpush2.msk.msra.mxu1 %vm5599_vm10, %v1293_v21  ;;  %vm5604_vm10 = vmmov %vm5601_vm2 }
 0x646   : > { %v1289_v22 = vpop.permute.xlu0 %1288 }
 0x647   : > { %v1292_v39 = vsel %vm5600_vm15, %v1285_v58, %v1289_v22  ;;  %v1294_v40 = vsel %vm5601_vm2, %v1289_v22, %v1285_v58  ;;  %vm5605_vm15 = vmmov %vm5602_vm7  ;;  %vm5606_vm2 = vcmp.lt.s32.totalorder %v3613_v6, 113 }
 0x648   : > { %3268 = vmatprep.subr.msk.mxu1 %vm3634_vm3, %v1294_v40 }
 0x649   : > { %3269 = vmatpush2.msk.msra.mxu1 %vm5602_vm7, %v1292_v39  ;;  %vm5607_vm7 = vmmov %vm5606_vm2 }
 0x64a   : > { %1418 = vmatmul.mubr.f32.vlgmr.msra.gmra.mxu1 %v3128_v26 }
 0x64b   : > { %2101 = vmatprep.mubr.f32.mxu1 %v3495_v2 }
 0x651   : > { %v1348_v27 = vpop.permute.xlu1 %1347 }
 0x70a   : > { %v1419_v48 = vpop.f32.mrf.mxu1 }
 0x70b   : > { %v1420_v49 = vadd.f32 %v1419_v48, %v1348_v27 }
 0x70c   : > { %v1421_v30 = vpop.f32.mrf.mxu1 }
 0x70d   : > { %v4448_v31 = vadd.f32 %v1420_v49, %v4118_v12  ;;  %v1422_v50 = vadd.f32 %v1421_v30, %v1348_v27  ;;  %v3135_v12 = vld [vmem:[%s5502_s2 + $0x58] sm:$0xff]  ;;  %v3132_v30 = vld [vmem:[%s5501_s1 + $0xa0] sm:$0xff] }
 0x70f   : > { %v4451_v52 = vadd.f32 %v1422_v50, %v4121_v16  ;;  %1498 = vrot.lane.b32.xlu0 %v4448_v31, %s3491_s27  ;;  %v3134_v16 = vld [vmem:[%s5502_s2 + $0x50] sm:$0xff] }
 0x710   : > { %v3133_v50 = vld [vmem:[%s5501_s1 + $0xb0] sm:$0xff] }
 0x711   : > { %1500 = vrot.lane.b32.xlu1 %v4451_v52, %s3491_s27 }
 0x713   : > { %1488 = vrot.lane.b32.xlu0 %v4448_v31, %s3490_s26 }
 0x715   : > { %1490 = vrot.lane.b32.xlu1 %v4451_v52, %s3490_s26 }
 0x717   : > { %1478 = vrot.lane.b32.xlu0 %v4448_v31, %s3492_s28 }
 0x719   : > { %1480 = vrot.lane.b32.xlu1 %v4451_v52, %s3492_s28 }
 0x71b   : > { %1468 = vrot.lane.b32.xlu0 %v4448_v31, %s3493_s29 }
 0x71d   : > { %1470 = vrot.lane.b32.xlu1 %v4451_v52, %s3493_s29 }
 0x71f   : > { %1456 = vrot.lane.b32.xlu0 %v4448_v31, %s3494_s30 }
 0x721   : > { %1458 = vrot.lane.b32.xlu1 %v4451_v52, %s3494_s30 }
 0x723   : > { %1446 = vrot.lane.b32.xlu0 %v4448_v31, %s3497_s4 }
 0x725   : > { %1448 = vrot.lane.b32.xlu1 %v4451_v52, %s3497_s4 }
 0x727   : > { %1436 = vrot.lane.b32.xlu0 %v4448_v31, %s3498_s5 }
 0x729   : > { %1438 = vrot.lane.b32.xlu1 %v4451_v52, %s3498_s5 }
 0x72b   : > { %1426 = vrot.lane.b32.xlu0 %v4448_v31, %s3499_s6 }
 0x72d   : > { %1428 = vrot.lane.b32.xlu1 %v4451_v52, %s3499_s6 }
 0x72f   : > { %1539 = vperm.xlu0 %3462, %v3135_v12  }
 0x731   : > { %1534 = vperm.xlu1 %3463, %v3134_v16  }
 0x781   : > { %v1499_v54 = vpop.permute.xlu0 %1498 }
 0x783   : > { %v1501_v43 = vpop.permute.xlu1 %1500 }
 0x784   : > { %v1502_v60 = vsel %vm5603_vm5, %v1499_v54, %v1501_v43  ;;  %v1503_v44 = vsel %vm5604_vm10, %v1501_v43, %v1499_v54  ;;  %vm5608_vm5 = vcmp.lt.s32.totalorder %v3613_v6, 127 }
 0x785   : > { %3270 = vmatprep.subr.msk.mxu0 %vm3634_vm3, %v1503_v44  ;;  %v1489_v4 = vpop.permute.xlu0 %1488  ;;  %vm5609_vm10 = vmmov %vm5608_vm5 }
 0x786   : > { %3271 = vmatpush1.msk.msra.mxu0 %vm5605_vm15, %v1502_v60 }
 0x787   : > { %v1491_v55 = vpop.permute.xlu1 %1490 }
 0x788   : > { %v1493_v62 = vsel %vm321_vm6, %v1491_v55, %v1489_v4  ;;  %v1492_v34 = vsel %vm321_vm6, %v1489_v4, %v1491_v55 }
 0x789   : > { %3272 = vmatprep.subr.msk.mxu0 %vm5513_vm1, %v1493_v62  ;;  %v1479_v35 = vpop.permute.xlu0 %1478 }
 0x78a   : > { %1565 = vmatpush1.msra.mxu0 %v1492_v34 }
 0x78b   : > { %v1481_v63 = vpop.permute.xlu1 %1480 }
 0x78c   : > { %v1482_v0 = vsel %vm5606_vm2, %v1479_v35, %v1481_v63  ;;  %v1483_v1 = vsel %vm5607_vm7, %v1481_v63, %v1479_v35  ;;  %vm5610_vm2 = vcmp.lt.s32.totalorder %v3613_v6, 1 }
 0x78d   : > { %3273 = vmatprep.subr.msk.mxu0 %vm3664_vm8, %v1483_v1  ;;  %v1469_v5 = vpop.permute.xlu0 %1468  ;;  %vm5611_vm7 = vmmov %vm5610_vm2 }
 0x78e   : > { %3274 = vmatpush1.msk.msra.mxu0 %vm181_vm9, %v1482_v0 }
 0x78f   : > { %v1471_v56 = vpop.permute.xlu1 %1470 }
 0x790   : > { %v1472_v57 = vsel %vm5608_vm5, %v1469_v5, %v1471_v56  ;;  %v1473_v7 = vsel %vm5609_vm10, %v1471_v56, %v1469_v5  ;;  %vm5612_vm5 = vcmp.lt.s32.totalorder %v3613_v6, 15  ;;  %v3139_v5 = vld [vmem:[%s5501_s1 + $0xc8] sm:$0xff]  ;;  %v3140_v56 = vld [vmem:[%s5502_s2 + $0x60] sm:$0xff] }
 0x791   : > { %3275 = vmatprep.subr.msk.mxu0 %vm186_vm0, %v1473_v7  ;;  %v1457_v11 = vpop.permute.xlu0 %1456  ;;  %vm5613_vm10 = vmmov %vm5612_vm5 }
 0x792   : > { %3276 = vmatpush1.msk.msra.mxu0 %vm5605_vm15, %v1472_v57  ;;  %vm5614_vm15 = vcmp.lt.s32.totalorder %v3613_v6, 16 }
 0x793   : > { %v1459_v15 = vpop.permute.xlu1 %1458  ;;  %1570 = vmatprep.subr.mxu0 %v4451_v52 }
 0x794   : > { %v1461_v51 = vsel %vm5610_vm2, %v1459_v15, %v1457_v11  ;;  %1571 = vmatpush1.msra.mxu0 %v4448_v31  ;;  %v1460_v59 = vsel %vm5611_vm7, %v1457_v11, %v1459_v15  ;;  %vm5615_vm2 = vmmov %vm5614_vm15  ;;  %vm5616_vm7 = vcmask 588800  }
 0x795   : > { %3277 = vmatprep.subr.msk.mxu0 %vm182_vm4, %v1460_v59  ;;  %v1447_v61 = vpop.permute.xlu0 %1446 }
 0x796   : > { %3278 = vmatpush1.msk.msra.mxu0 %vm181_vm9, %v1461_v51 }
 0x797   : > { %v1449_v53 = vpop.permute.xlu1 %1448 }
 0x798   : > { %v1451_v21 = vsel %vm5612_vm5, %v1449_v53, %v1447_v61  ;;  %v1450_v3 = vsel %vm5613_vm10, %v1447_v61, %v1449_v53  ;;  %vm5617_vm5 = vmmov %vm5616_vm7  ;;  %vm5618_vm10 = vcmask 130048  }
 0x799   : > { %3279 = vmatprep.subr.msk.mxu0 %vm186_vm0, %v1450_v3  ;;  %v1437_v58 = vpop.permute.xlu0 %1436 }
 0x79a   : > { %3280 = vmatpush1.msk.msra.mxu0 %vm3729_vm14, %v1451_v21 }
 0x79b   : > { %v1439_v22 = vpop.permute.xlu1 %1438 }
 0x79c   : > { %v1441_v39 = vsel %vm5614_vm15, %v1439_v22, %v1437_v58  ;;  %v1440_v40 = vsel %vm5615_vm2, %v1437_v58, %v1439_v22  ;;  %vm5619_vm15 = vcmp.lt.s32.totalorder %v3613_v6, 113 }
 0x79d   : > { %1576 = vmatprep.subr.mxu0 %v1440_v40  ;;  %v1427_v26 = vpop.permute.xlu0 %1426  ;;  %vm5620_vm2 = vmmov %vm5619_vm15 }
 0x79e   : > { %3281 = vmatpush1.msk.msra.mxu0 %vm193_vm12, %v1441_v39 }
 0x79f   : > { %v1429_v27 = vpop.permute.xlu1 %1428 }
 0x7a0   : > { %v1431_v48 = vsel %vm229_vm13, %v1429_v27, %v1427_v26  ;;  %v1430_v49 = vsel %vm229_vm13, %v1427_v26, %v1429_v27 }
 0x7a1   : > { %3282 = vmatprep.subr.msk.mxu0 %vm182_vm4, %v1430_v49 }
 0x7a2   : > { %3283 = vmatpush1.msk.msra.mxu0 %vm3765_vm11, %v1431_v48 }
 0x7a3   : > { %3136 = vmatmul.mubr.msk.f32.vlgmr.msra.gmra.mxu0 %vm5616_vm7, %v3132_v30  ;;  %vm5621_vm7 = vmmov %vm5620_vm2 }
 0x7a4   : > { %1618 = vmatprep.mubr.f32.mxu0 %v3495_v2 }
 0x7a7   : > { %3137 = vmatmul.mubr.msk.f32.gmra.mxu0 %vm5617_vm5, %v3133_v50  ;;  %vm5622_vm5 = vmmov %vm5620_vm2 }
 0x7a8   : > { %3141 = vmatprep.mubr.msk.f32.mxu0 %vm5618_vm10, %v3139_v5  ;;  %vm5623_vm10 = vcmp.lt.s32.totalorder %v3613_v6, 127 }
 0x7aa   : > { %v1540_v62 = vpop.permute.xlu0 %1539 }
 0x7ac   : > { %v1535_v12 = vpop.permute.xlu1 %1534 }
 0x863   : > { %v1614_v16 = vpop.f32.mrf.mxu0 }
 0x864   : > { %v1615_v54 = vadd.f32 %v1614_v16, %v1535_v12 }
 0x865   : > { %v1616_v43 = vpop.f32.mrf.mxu0 }
 0x866   : > { %v4562_v60 = vmax.f32 %v1615_v54, 0.0  ;;  %v1617_v44 = vadd.f32 %v1616_v43, %v1535_v12 }
 0x867   : > { %v1620_v55 = vpop.f32.mrf.mxu0 }
 0x868   : > { %v4564_v4 = vmax.f32 %v1617_v44, 0.0  ;;  %1753 = vrot.lane.b32.xlu0 %v4562_v60, %s3490_s26  ;;  %v1621_v35 = vadd.f32 %v1620_v55, %v1540_v62 }
 0x869   : > { %v1622_v34 = vpop.f32.mrf.mxu0 }
 0x86a   : > { %1757 = vrot.lane.b32.xlu1 %v4564_v4, %s3490_s26  ;;  %v1623_v63 = vadd.f32 %v1622_v34, %v1540_v62  ;;  %v4588_v0 = vmax.f32 %v1621_v35, 0.0 }
 0x86c   : > { %1733 = vrot.lane.b32.xlu0 %v4562_v60, %s3492_s28  ;;  %v4592_v1 = vmax.f32 %v1623_v63, 0.0 }
 0x86e   : > { %1737 = vrot.lane.b32.xlu1 %v4564_v4, %s3492_s28 }
 0x870   : > { %1713 = vrot.lane.b32.xlu0 %v4562_v60, %s3493_s29 }
 0x872   : > { %1717 = vrot.lane.b32.xlu1 %v4564_v4, %s3493_s29 }
 0x874   : > { %1689 = vrot.lane.b32.xlu0 %v4562_v60, %s3494_s30 }
 0x876   : > { %1693 = vrot.lane.b32.xlu1 %v4564_v4, %s3494_s30 }
 0x878   : > { %1669 = vrot.lane.b32.xlu0 %v4562_v60, %s3497_s4 }
 0x87a   : > { %1673 = vrot.lane.b32.xlu1 %v4564_v4, %s3497_s4 }
 0x87c   : > { %1649 = vrot.lane.b32.xlu0 %v4562_v60, %s3498_s5 }
 0x87e   : > { %1653 = vrot.lane.b32.xlu1 %v4564_v4, %s3498_s5 }
 0x880   : > { %1755 = vrot.lane.b32.xlu0 %v4588_v0, %s3490_s26 }
 0x882   : > { %1759 = vrot.lane.b32.xlu1 %v4592_v1, %s3490_s26 }
 0x884   : > { %1735 = vrot.lane.b32.xlu0 %v4588_v0, %s3492_s28 }
 0x886   : > { %1739 = vrot.lane.b32.xlu1 %v4592_v1, %s3492_s28 }
 0x888   : > { %1715 = vrot.lane.b32.xlu0 %v4588_v0, %s3493_s29 }
 0x88a   : > { %1719 = vrot.lane.b32.xlu1 %v4592_v1, %s3493_s29 }
 0x88c   : > { %1629 = vrot.lane.b32.xlu0 %v4562_v60, %s3499_s6 }
 0x88e   : > { %1633 = vrot.lane.b32.xlu1 %v4564_v4, %s3499_s6 }
 0x890   : > { %1691 = vrot.lane.b32.xlu0 %v4588_v0, %s3494_s30 }
 0x892   : > { %1695 = vrot.lane.b32.xlu1 %v4592_v1, %s3494_s30 }
 0x894   : > { %1671 = vrot.lane.b32.xlu0 %v4588_v0, %s3497_s4 }
 0x896   : > { %1675 = vrot.lane.b32.xlu1 %v4592_v1, %s3497_s4 }
 0x898   : > { %1651 = vrot.lane.b32.xlu0 %v4588_v0, %s3498_s5 }
 0x89a   : > { %1655 = vrot.lane.b32.xlu1 %v4592_v1, %s3498_s5 }
 0x89c   : > { %1631 = vrot.lane.b32.xlu0 %v4588_v0, %s3499_s6 }
 0x89e   : > { %1635 = vrot.lane.b32.xlu1 %v4592_v1, %s3499_s6 }
 0x8a0   : > { %1775 = vrot.lane.b32.xlu0 %v4588_v0, %s3491_s27 }
 0x8a2   : > { %1779 = vrot.lane.b32.xlu1 %v4592_v1, %s3491_s27 }
 0x8a4   : > { %1773 = vrot.lane.b32.xlu0 %v4562_v60, %s3491_s27 }
 0x8a6   : > { %1777 = vrot.lane.b32.xlu1 %v4564_v4, %s3491_s27 }
 0x8a8   : > { %1836 = vperm.xlu0 %3462, %v3140_v56  }
 0x8da   : > { %v1754_v57 = vpop.permute.xlu0 %1753 }
 0x8dc   : > { %v1758_v7 = vpop.permute.xlu1 %1757 }
 0x8dd   : > { %v1763_v49 = vsel %vm321_vm6, %v1758_v7, %v1754_v57  ;;  %v1761_v50 = vsel %vm321_vm6, %v1754_v57, %v1758_v7 }
 0x8de   : > { %v1734_v11 = vpop.permute.xlu0 %1733 }
 0x8e0   : > { %v1738_v15 = vpop.permute.xlu1 %1737 }
 0x8e1   : > { %v1743_v43 = vsel %vm5621_vm7, %v1738_v15, %v1734_v11  ;;  %v1741_v44 = vsel %vm5622_vm5, %v1734_v11, %v1738_v15  ;;  %vm5626_vm7 = vmmov %vm5623_vm10 }
 0x8e2   : > { %v1714_v51 = vpop.permute.xlu0 %1713  ;;  %vm5627_vm5 = vmmov %vm5626_vm7 }
 0x8e4   : > { %v1718_v59 = vpop.permute.xlu1 %1717 }
 0x8e5   : > { %v1723_v63 = vsel %vm5626_vm7, %v1718_v59, %v1714_v51  ;;  %v1721_v5 = vsel %vm5627_vm5, %v1714_v51, %v1718_v59 }
 0x8e6   : > { %v1690_v61 = vpop.permute.xlu0 %1689 }
 0x8e8   : > { %v1694_v53 = vpop.permute.xlu1 %1693 }
 0x8ea   : > { %v1670_v21 = vpop.permute.xlu0 %1669 }
 0x8ec   : > { %v1674_v3 = vpop.permute.xlu1 %1673 }
 0x8ee   : > { %v4641_v58 = vpop.permute.xlu0 %1649 }
 0x8f0   : > { %v4643_v22 = vpop.permute.xlu1 %1653 }
 0x8f2   : > { %v1756_v39 = vpop.permute.xlu0 %1755 }
 0x8f4   : > { %v1760_v40 = vpop.permute.xlu1 %1759 }
 0x8f5   : > { %v1764_v26 = vsel %vm321_vm6, %v1760_v40, %v1756_v39  ;;  %v1762_v27 = vsel %vm321_vm6, %v1756_v39, %v1760_v40 }
 0x8f6   : > { %3284 = vmatprep.subr.msk.mxu0 %vm5513_vm1, %v1764_v26  ;;  %v1736_v48 = vpop.permute.xlu0 %1735 }
 0x8f7   : > { %1843 = vmatpush1.msra.mxu0 %v1762_v27 }
 0x8f8   : > { %v1740_v30 = vpop.permute.xlu1 %1739  ;;  %3285 = vmatprep.subr.msk.mxu0 %vm5513_vm1, %v1763_v49 }
 0x8f9   : > { %v1742_v12 = vsel %vm5619_vm15, %v1736_v48, %v1740_v30  ;;  %1845 = vmatpush1.msra.mxu0 %v1761_v50  ;;  %v1744_v16 = vsel %vm5620_vm2, %v1740_v30, %v1736_v48  ;;  %vm5624_vm15 = vmmov %vm5623_vm10  ;;  %vm5625_vm2 = vcmp.lt.s32.totalorder %v3627_v13, 15 }
 0x8fa   : > { %3286 = vmatprep.subr.msk.mxu0 %vm3664_vm8, %v1744_v16  ;;  %v1716_v54 = vpop.permute.xlu0 %1715 }
 0x8fb   : > { %3287 = vmatpush1.msk.msra.mxu0 %vm181_vm9, %v1742_v12 }
 0x8fc   : > { %v1720_v55 = vpop.permute.xlu1 %1719  ;;  %3288 = vmatprep.subr.msk.mxu0 %vm3664_vm8, %v1743_v43 }
 0x8fd   : > { %v1722_v62 = vsel %vm5623_vm10, %v1716_v54, %v1720_v55  ;;  %3289 = vmatpush1.msk.msra.mxu0 %vm181_vm9, %v1741_v44  ;;  %v1724_v34 = vsel %vm5624_vm15, %v1720_v55, %v1716_v54  ;;  %vm5628_vm10 = vmmov %vm5625_vm2  ;;  %vm5629_vm15 = vcmp.lt.s32.totalorder %v3613_v6, 1 }
 0x8fe   : > { %3290 = vmatprep.subr.msk.mxu0 %vm186_vm0, %v1724_v34  ;;  %v1630_v35 = vpop.permute.xlu0 %1629 }
 0x8ff   : > { %3291 = vmatpush1.msk.msra.mxu0 %vm5625_vm2, %v1722_v62  ;;  %vm5630_vm2 = vmmov %vm5629_vm15 }
 0x900   : > { %v1634_v56 = vpop.permute.xlu1 %1633  ;;  %3292 = vmatprep.subr.msk.mxu0 %vm186_vm0, %v1723_v63  ;;  %vm5631_vm7 = vmmov %vm5630_vm2 }
 0x901   : > { %3293 = vmatpush1.msk.msra.mxu0 %vm5628_vm10, %v1721_v5  ;;  %vm5632_vm5 = vmmov %vm5630_vm2  ;;  %vm5633_vm10 = vcmp.lt.s32.totalorder %v3613_v6, 15 }
 0x902   : > { %1854 = vmatprep.subr.mxu0 %v4592_v1  ;;  %v1692_v57 = vpop.permute.xlu0 %1691 }
 0x903   : > { %1855 = vmatpush1.msra.mxu0 %v4588_v0  ;;  %v1697_v0 = vsel %vm5631_vm7, %v1690_v61, %v1694_v53 }
 0x904   : > { %v1696_v7 = vpop.permute.xlu1 %1695  ;;  %1856 = vmatprep.subr.mxu0 %v4564_v4  ;;  %v1699_v4 = vsel %vm5632_vm5, %v1694_v53, %v1690_v61  ;;  %vm5637_vm5 = vcmp.lt.s32.totalorder %v3613_v6, 16 }
 0x905   : > { %v1700_v11 = vsel %vm5629_vm15, %v1696_v7, %v1692_v57  ;;  %1857 = vmatpush1.msra.mxu0 %v4562_v60  ;;  %v1698_v15 = vsel %vm5630_vm2, %v1692_v57, %v1696_v7  ;;  %vm5634_vm15 = vmmov %vm5633_vm10 }
 0x906   : > { %3294 = vmatprep.subr.msk.mxu0 %vm182_vm4, %v1698_v15  ;;  %v1672_v51 = vpop.permute.xlu0 %1671  ;;  %vm5635_vm2 = vmmov %vm5633_vm10 }
 0x907   : > { %3295 = vmatpush1.msk.msra.mxu0 %vm181_vm9, %v1700_v11  ;;  %v1677_v61 = vsel %vm5635_vm2, %v1670_v21, %v1674_v3  ;;  %vm5636_vm7 = vmmov %vm5635_vm2 }
 0x908   : > { %v1676_v1 = vpop.permute.xlu1 %1675  ;;  %3296 = vmatprep.subr.msk.mxu0 %vm182_vm4, %v1697_v0  ;;  %v1679_v53 = vsel %vm5636_vm7, %v1674_v3, %v1670_v21  ;;  %vm5640_vm2 = vmmov %vm5637_vm5  ;;  %vm5641_vm7 = vcmp.lt.s32.totalorder %v3613_v6, 111 }
 0x909   : > { %v1680_v60 = vsel %vm5633_vm10, %v1676_v1, %v1672_v51  ;;  %3297 = vmatpush1.msk.msra.mxu0 %vm181_vm9, %v1699_v4  ;;  %v1678_v59 = vsel %vm5634_vm15, %v1672_v51, %v1676_v1  ;;  %vm5638_vm10 = vmmov %vm5637_vm5  ;;  %v1659_v3 = vsel %vm5640_vm2, %v4643_v22, %v4641_v58 }
 0x90a   : > { %3298 = vmatprep.subr.msk.mxu0 %vm186_vm0, %v1678_v59  ;;  %v1652_v39 = vpop.permute.xlu0 %1651  ;;  %vm5639_vm15 = vmmov %vm5637_vm5 }
 0x90b   : > { %3299 = vmatpush1.msk.msra.mxu0 %vm3729_vm14, %v1680_v60  ;;  %v1657_v21 = vsel %vm5639_vm15, %v4641_v58, %v4643_v22  ;;  %v1637_v58 = vsel %vm229_vm13, %v1630_v35, %v1634_v56  ;;  %v1639_v22 = vsel %vm229_vm13, %v1634_v56, %v1630_v35  ;;  %v3138_v35 = vld [vmem:[%s5501_s1 + $0xc0] sm:$0xff] }
 0x90c   : > { %v1656_v40 = vpop.permute.xlu1 %1655  ;;  %3300 = vmatprep.subr.msk.mxu0 %vm186_vm0, %v1677_v61 }
 0x90d   : > { %v1660_v26 = vsel %vm5637_vm5, %v1656_v40, %v1652_v39  ;;  %3301 = vmatpush1.msk.msra.mxu0 %vm3729_vm14, %v1679_v53  ;;  %v1658_v27 = vsel %vm5638_vm10, %v1652_v39, %v1656_v40  ;;  %vm5642_vm5 = vmmov %vm5641_vm7  ;;  %vm5643_vm10 = vcmp.lt.s32.totalorder %v3627_v13, 15 }
 0x90e   : > { %1866 = vmatprep.subr.mxu0 %v1658_v27  ;;  %v1632_v48 = vpop.permute.xlu0 %1631  ;;  %vm5644_vm15 = vmmov %vm5642_vm5 }
 0x90f   : > { %3302 = vmatpush1.msk.msra.mxu0 %vm193_vm12, %v1660_v26  ;;  %vm5645_vm2 = vmmov %vm5642_vm5 }
 0x910   : > { %v1636_v49 = vpop.permute.xlu1 %1635  ;;  %1868 = vmatprep.subr.mxu0 %v1657_v21 }
 0x911   : > { %v1640_v30 = vsel %vm229_vm13, %v1636_v49, %v1632_v48  ;;  %3303 = vmatpush1.msk.msra.mxu0 %vm193_vm12, %v1659_v3  ;;  %v1638_v50 = vsel %vm229_vm13, %v1632_v48, %v1636_v49 }
 0x912   : > { %3304 = vmatprep.subr.msk.mxu0 %vm182_vm4, %v1638_v50  ;;  %v1776_v12 = vpop.permute.xlu0 %1775 }
 0x913   : > { %3305 = vmatpush1.msk.msra.mxu0 %vm3765_vm11, %v1640_v30 }
 0x914   : > { %v1780_v16 = vpop.permute.xlu1 %1779  ;;  %3306 = vmatprep.subr.msk.mxu0 %vm182_vm4, %v1637_v58 }
 0x915   : > { %v1782_v54 = vsel %vm5641_vm7, %v1776_v12, %v1780_v16  ;;  %3307 = vmatpush1.msk.msra.mxu0 %vm3765_vm11, %v1639_v22  ;;  %v1784_v43 = vsel %vm5642_vm5, %v1780_v16, %v1776_v12  ;;  %vm5646_vm7 = vmmov %vm5643_vm10 }
 0x916   : > { %3308 = vmatprep.subr.msk.mxu0 %vm3634_vm3, %v1784_v43  ;;  %v1774_v44 = vpop.permute.xlu0 %1773  ;;  %vm5647_vm5 = vmmov %vm5645_vm2 }
 0x917   : > { %3309 = vmatpush2.msk.msra.mxu0 %vm5643_vm10, %v1782_v54  ;;  %vm5648_vm10 = vmmov %vm5645_vm2 }
 0x918   : > { %v1778_v55 = vpop.permute.xlu1 %1777 }
 0x919   : > { %v1781_v62 = vsel %vm5644_vm15, %v1774_v44, %v1778_v55  ;;  %v1783_v34 = vsel %vm5645_vm2, %v1778_v55, %v1774_v44  ;;  %vm5649_vm15 = vmmov %vm5646_vm7  ;;  %vm5650_vm2 = vcmp.lt.s32.totalorder %v3613_v6, 113 }
 0x91a   : > { %3310 = vmatprep.subr.msk.mxu0 %vm3634_vm3, %v1783_v34 }
 0x91b   : > { %3311 = vmatpush2.msk.msra.mxu0 %vm5646_vm7, %v1781_v62  ;;  %vm5651_vm7 = vmmov %vm5650_vm2 }
 0x91c   : > { %1907 = vmatmul.mubr.f32.vlgmr.msra.gmra.mxu0 %v3138_v35 }
 0x91d   : > { %2590 = vmatprep.mubr.f32.mxu0 %v3495_v2 }
 0x923   : > { %v1837_v63 = vpop.permute.xlu0 %1836 }
 0x9dc   : > { %v1908_v5 = vpop.f32.mrf.mxu0 }
 0x9dd   : > { %v1909_v56 = vadd.f32 %v1908_v5, %v1837_v63 }
 0x9de   : > { %v1910_v57 = vpop.f32.mrf.mxu0 }
 0x9df   : > { %v4778_v7 = vadd.f32 %v1909_v56, %v4448_v31  ;;  %v1911_v11 = vadd.f32 %v1910_v57, %v1837_v63  ;;  %v3145_v31 = vld [vmem:[%s5502_s2 + $0x78] sm:$0xff]  ;;  %v3142_v57 = vld [vmem:[%s5501_s1 + $0xe0] sm:$0xff] }
 0x9e1   : > { %v4781_v15 = vadd.f32 %v1911_v11, %v4451_v52  ;;  %1987 = vrot.lane.b32.xlu1 %v4778_v7, %s3491_s27  ;;  %v3144_v52 = vld [vmem:[%s5502_s2 + $0x70] sm:$0xff] }
 0x9e2   : > { %v3143_v11 = vld [vmem:[%s5501_s1 + $0xf0] sm:$0xff] }
 0x9e3   : > { %1989 = vrot.lane.b32.xlu0 %v4781_v15, %s3491_s27 }
 0x9e5   : > { %1977 = vrot.lane.b32.xlu1 %v4778_v7, %s3490_s26 }
 0x9e7   : > { %1979 = vrot.lane.b32.xlu0 %v4781_v15, %s3490_s26 }
 0x9e9   : > { %1967 = vrot.lane.b32.xlu1 %v4778_v7, %s3492_s28 }
 0x9eb   : > { %1969 = vrot.lane.b32.xlu0 %v4781_v15, %s3492_s28 }
 0x9ed   : > { %1957 = vrot.lane.b32.xlu1 %v4778_v7, %s3493_s29 }
 0x9ef   : > { %1959 = vrot.lane.b32.xlu0 %v4781_v15, %s3493_s29 }
 0x9f1   : > { %1945 = vrot.lane.b32.xlu1 %v4778_v7, %s3494_s30 }
 0x9f3   : > { %1947 = vrot.lane.b32.xlu0 %v4781_v15, %s3494_s30 }
 0x9f5   : > { %1935 = vrot.lane.b32.xlu1 %v4778_v7, %s3497_s4 }
 0x9f7   : > { %1937 = vrot.lane.b32.xlu0 %v4781_v15, %s3497_s4 }
 0x9f9   : > { %1925 = vrot.lane.b32.xlu1 %v4778_v7, %s3498_s5 }
 0x9fb   : > { %1927 = vrot.lane.b32.xlu0 %v4781_v15, %s3498_s5 }
 0x9fd   : > { %1915 = vrot.lane.b32.xlu1 %v4778_v7, %s3499_s6 }
 0x9ff   : > { %1917 = vrot.lane.b32.xlu0 %v4781_v15, %s3499_s6 }
 0xa01   : > { %2028 = vperm.xlu1 %3463, %v3145_v31  }
 0xa03   : > { %2023 = vperm.xlu0 %3462, %v3144_v52  }
 0xa53   : > { %v1988_v51 = vpop.permute.xlu1 %1987 }
 0xa55   : > { %v1990_v0 = vpop.permute.xlu0 %1989 }
 0xa56   : > { %v1991_v4 = vsel %vm5647_vm5, %v1988_v51, %v1990_v0  ;;  %v1992_v1 = vsel %vm5648_vm10, %v1990_v0, %v1988_v51  ;;  %vm5652_vm5 = vcmp.lt.s32.totalorder %v3613_v6, 127 }
 0xa57   : > { %3312 = vmatprep.subr.msk.mxu1 %vm3634_vm3, %v1992_v1  ;;  %v1978_v60 = vpop.permute.xlu1 %1977  ;;  %vm5653_vm10 = vmmov %vm5652_vm5 }
 0xa58   : > { %3313 = vmatpush1.msk.msra.mxu1 %vm5649_vm15, %v1991_v4 }
 0xa59   : > { %v1980_v59 = vpop.permute.xlu0 %1979 }
 0xa5a   : > { %v1982_v39 = vsel %vm321_vm6, %v1980_v59, %v1978_v60  ;;  %v1981_v61 = vsel %vm321_vm6, %v1978_v60, %v1980_v59 }
 0xa5b   : > { %3314 = vmatprep.subr.msk.mxu1 %vm5513_vm1, %v1982_v39  ;;  %v1968_v53 = vpop.permute.xlu1 %1967 }
 0xa5c   : > { %2054 = vmatpush1.msra.mxu1 %v1981_v61 }
 0xa5d   : > { %v1970_v40 = vpop.permute.xlu0 %1969 }
 0xa5e   : > { %v1971_v26 = vsel %vm5650_vm2, %v1968_v53, %v1970_v40  ;;  %v1972_v27 = vsel %vm5651_vm7, %v1970_v40, %v1968_v53  ;;  %vm5654_vm2 = vcmp.lt.s32.totalorder %v3613_v6, 1 }
 0xa5f   : > { %3315 = vmatprep.subr.msk.mxu1 %vm3664_vm8, %v1972_v27  ;;  %v1958_v48 = vpop.permute.xlu1 %1957  ;;  %vm5655_vm7 = vmmov %vm5654_vm2 }
 0xa60   : > { %3316 = vmatpush1.msk.msra.mxu1 %vm181_vm9, %v1971_v26 }
 0xa61   : > { %v1960_v21 = vpop.permute.xlu0 %1959 }
 0xa62   : > { %v1961_v3 = vsel %vm5652_vm5, %v1958_v48, %v1960_v21  ;;  %v1962_v49 = vsel %vm5653_vm10, %v1960_v21, %v1958_v48  ;;  %vm5656_vm5 = vcmp.lt.s32.totalorder %v3613_v6, 15  ;;  %v3149_v48 = vld [vmem:[%s5501_s1 + $0x108] sm:$0xff]  ;;  %v3150_v21 = vld [vmem:[%s5502_s2 + $0x80] sm:$0xff] }
 0xa63   : > { %3317 = vmatprep.subr.msk.mxu1 %vm186_vm0, %v1962_v49  ;;  %v1946_v30 = vpop.permute.xlu1 %1945  ;;  %vm5657_vm10 = vmmov %vm5656_vm5  ;;  %v4976_v49 = vld [vmem:[%s3569_s25 + $0x8] sm:$0xff] }
 0xa64   : > { %3318 = vmatpush1.msk.msra.mxu1 %vm5649_vm15, %v1961_v3  ;;  %vm5658_vm15 = vcmp.lt.s32.totalorder %v3613_v6, 16  ;;  %v4972_v3 = vld [vmem:[%s3569_s25] sm:$0xff] }
 0xa65   : > { %v1948_v50 = vpop.permute.xlu0 %1947  ;;  %2059 = vmatprep.subr.mxu1 %v4781_v15 }
 0xa66   : > { %v1949_v12 = vsel %vm5654_vm2, %v1946_v30, %v1948_v50  ;;  %v1950_v58 = vsel %vm5655_vm7, %v1948_v50, %v1946_v30  ;;  %2060 = vmatpush1.msra.mxu1 %v4778_v7  ;;  %vm5659_vm2 = vmmov %vm5658_vm15  ;;  %vm5660_vm7 = vcmask 588800  }
 0xa67   : > { %3319 = vmatprep.subr.msk.mxu1 %vm182_vm4, %v1949_v12  ;;  %v1936_v22 = vpop.permute.xlu1 %1935 }
 0xa68   : > { %3320 = vmatpush1.msk.msra.mxu1 %vm181_vm9, %v1950_v58 }
 0xa69   : > { %v1938_v16 = vpop.permute.xlu0 %1937 }
 0xa6a   : > { %v1939_v54 = vsel %vm5656_vm5, %v1936_v22, %v1938_v16  ;;  %v1940_v43 = vsel %vm5657_vm10, %v1938_v16, %v1936_v22  ;;  %vm5661_vm5 = vmmov %vm5660_vm7  ;;  %vm5662_vm10 = vcmask 130048  }
 0xa6b   : > { %3321 = vmatprep.subr.msk.mxu1 %vm186_vm0, %v1939_v54  ;;  %v1926_v44 = vpop.permute.xlu1 %1925 }
 0xa6c   : > { %3322 = vmatpush1.msk.msra.mxu1 %vm3729_vm14, %v1940_v43 }
 0xa6d   : > { %v1928_v55 = vpop.permute.xlu0 %1927 }
 0xa6e   : > { %v1930_v62 = vsel %vm5658_vm15, %v1928_v55, %v1926_v44  ;;  %v1929_v34 = vsel %vm5659_vm2, %v1926_v44, %v1928_v55  ;;  %vm5663_vm15 = vcmp.lt.s32.totalorder %v3613_v6, 113 }
 0xa6f   : > { %2065 = vmatprep.subr.mxu1 %v1929_v34  ;;  %v1916_v35 = vpop.permute.xlu1 %1915  ;;  %vm5664_vm2 = vmmov %vm5663_vm15 }
 0xa70   : > { %3323 = vmatpush1.msk.msra.mxu1 %vm193_vm12, %v1930_v62 }
 0xa71   : > { %v1918_v63 = vpop.permute.xlu0 %1917 }
 0xa72   : > { %v1919_v5 = vsel %vm229_vm13, %v1916_v35, %v1918_v63  ;;  %v1920_v56 = vsel %vm229_vm13, %v1918_v63, %v1916_v35 }
 0xa73   : > { %3324 = vmatprep.subr.msk.mxu1 %vm182_vm4, %v1919_v5 }
 0xa74   : > { %3325 = vmatpush1.msk.msra.mxu1 %vm3765_vm11, %v1920_v56 }
 0xa75   : > { %3146 = vmatmul.mubr.msk.f32.vlgmr.msra.gmra.mxu1 %vm5660_vm7, %v3142_v57  ;;  %vm5665_vm7 = vmmov %vm5664_vm2 }
 0xa76   : > { %2107 = vmatprep.mubr.f32.mxu1 %v3495_v2 }
 0xa79   : > { %3147 = vmatmul.mubr.msk.f32.gmra.mxu1 %vm5661_vm5, %v3143_v11  ;;  %vm5666_vm5 = vmmov %vm5664_vm2 }
 0xa7a   : > { %3151 = vmatprep.mubr.msk.f32.mxu1 %vm5662_vm10, %v3149_v48  ;;  %vm5667_vm10 = vcmp.lt.s32.totalorder %v3613_v6, 127 }
 0xa7c   : > { %v2029_v39 = vpop.permute.xlu1 %2028 }
 0xa7e   : > { %v2024_v31 = vpop.permute.xlu0 %2023 }
 0xb35   : > { %v2103_v52 = vpop.f32.mrf.mxu1 }
 0xb36   : > { %v2104_v51 = vadd.f32 %v2103_v52, %v2024_v31 }
 0xb37   : > { %v2105_v0 = vpop.f32.mrf.mxu1 }
 0xb38   : > { %v4892_v4 = vmax.f32 %v2104_v51, 0.0  ;;  %v2106_v1 = vadd.f32 %v2105_v0, %v2024_v31 }
 0xb39   : > { %v2109_v59 = vpop.f32.mrf.mxu1 }
 0xb3a   : > { %v4894_v60 = vmax.f32 %v2106_v1, 0.0  ;;  %2242 = vrot.lane.b32.xlu1 %v4892_v4, %s3490_s26  ;;  %v2110_v53 = vadd.f32 %v2109_v59, %v2029_v39 }
 0xb3b   : > { %v2111_v61 = vpop.f32.mrf.mxu1 }
 0xb3c   : > { %2246 = vrot.lane.b32.xlu0 %v4894_v60, %s3490_s26  ;;  %v2112_v40 = vadd.f32 %v2111_v61, %v2029_v39  ;;  %v4918_v26 = vmax.f32 %v2110_v53, 0.0 }
 0xb3e   : > { %2222 = vrot.lane.b32.xlu1 %v4892_v4, %s3492_s28  ;;  %v4922_v27 = vmax.f32 %v2112_v40, 0.0 }
 0xb40   : > { %2226 = vrot.lane.b32.xlu0 %v4894_v60, %s3492_s28 }
 0xb42   : > { %2202 = vrot.lane.b32.xlu1 %v4892_v4, %s3493_s29 }
 0xb44   : > { %2206 = vrot.lane.b32.xlu0 %v4894_v60, %s3493_s29 }
 0xb46   : > { %2178 = vrot.lane.b32.xlu1 %v4892_v4, %s3494_s30 }
 0xb48   : > { %2182 = vrot.lane.b32.xlu0 %v4894_v60, %s3494_s30 }
 0xb4a   : > { %2158 = vrot.lane.b32.xlu1 %v4892_v4, %s3497_s4 }
 0xb4c   : > { %2162 = vrot.lane.b32.xlu0 %v4894_v60, %s3497_s4 }
 0xb4e   : > { %2138 = vrot.lane.b32.xlu1 %v4892_v4, %s3498_s5 }
 0xb50   : > { %2142 = vrot.lane.b32.xlu0 %v4894_v60, %s3498_s5 }
 0xb52   : > { %2244 = vrot.lane.b32.xlu1 %v4918_v26, %s3490_s26 }
 0xb54   : > { %2248 = vrot.lane.b32.xlu0 %v4922_v27, %s3490_s26 }
 0xb56   : > { %2224 = vrot.lane.b32.xlu1 %v4918_v26, %s3492_s28 }
 0xb58   : > { %2228 = vrot.lane.b32.xlu0 %v4922_v27, %s3492_s28 }
 0xb5a   : > { %2204 = vrot.lane.b32.xlu1 %v4918_v26, %s3493_s29 }
 0xb5c   : > { %2208 = vrot.lane.b32.xlu0 %v4922_v27, %s3493_s29 }
 0xb5e   : > { %2118 = vrot.lane.b32.xlu1 %v4892_v4, %s3499_s6 }
 0xb60   : > { %2122 = vrot.lane.b32.xlu0 %v4894_v60, %s3499_s6 }
 0xb62   : > { %2180 = vrot.lane.b32.xlu1 %v4918_v26, %s3494_s30 }
 0xb64   : > { %2184 = vrot.lane.b32.xlu0 %v4922_v27, %s3494_s30 }
 0xb66   : > { %2160 = vrot.lane.b32.xlu1 %v4918_v26, %s3497_s4 }
 0xb68   : > { %2164 = vrot.lane.b32.xlu0 %v4922_v27, %s3497_s4 }
 0xb6a   : > { %2140 = vrot.lane.b32.xlu1 %v4918_v26, %s3498_s5 }
 0xb6c   : > { %2144 = vrot.lane.b32.xlu0 %v4922_v27, %s3498_s5 }
 0xb6e   : > { %2120 = vrot.lane.b32.xlu1 %v4918_v26, %s3499_s6 }
 0xb70   : > { %2124 = vrot.lane.b32.xlu0 %v4922_v27, %s3499_s6 }
 0xb72   : > { %2264 = vrot.lane.b32.xlu1 %v4918_v26, %s3491_s27 }
 0xb74   : > { %2268 = vrot.lane.b32.xlu0 %v4922_v27, %s3491_s27 }
 0xb76   : > { %2262 = vrot.lane.b32.xlu1 %v4892_v4, %s3491_s27 }
 0xb78   : > { %2266 = vrot.lane.b32.xlu0 %v4894_v60, %s3491_s27 }
 0xb7a   : > { %2325 = vperm.xlu1 %3463, %v3150_v21  }
 0xb7c   : > { %2750 = vrot.lane.b32.xlu0 %v4972_v3, %s3500_s23 }
 0xb7e   : > { %2752 = vrot.lane.b32.xlu1 %v4976_v49, %s3500_s23 }
 0xb80   : > { %2735 = vrot.lane.b32.xlu0 %v4972_v3, %s3501_s24 }
 0xb82   : > { %2737 = vrot.lane.b32.xlu1 %v4976_v49, %s3501_s24 }
 0xb84   : > { %2714 = vrot.lane.b32.xlu0 %v4972_v3, %s3502_s7 }
 0xb86   : > { %2716 = vrot.lane.b32.xlu1 %v4976_v49, %s3502_s7 }
 0xb88   : > { %2699 = vrot.lane.b32.xlu0 %v4972_v3, %s3503_s8 }
 0xb8a   : > { %2701 = vrot.lane.b32.xlu1 %v4976_v49, %s3503_s8 }
 0xb8c   : > { %2678 = vrot.lane.b32.xlu0 %v4972_v3, %s3504_s10 }
 0xb8e   : > { %2680 = vrot.lane.b32.xlu1 %v4976_v49, %s3504_s10 }
 0xbac   : > { %v2243_v30 = vpop.permute.xlu1 %2242 }
 0xbae   : > { %v2247_v50 = vpop.permute.xlu0 %2246 }
 0xbaf   : > { %v2252_v11 = vsel %vm321_vm6, %v2247_v50, %v2243_v30  ;;  %v2250_v31 = vsel %vm321_vm6, %v2243_v30, %v2247_v50 }
 0xbb0   : > { %v2223_v12 = vpop.permute.xlu1 %2222 }
 0xbb2   : > { %v2227_v58 = vpop.permute.xlu0 %2226 }
 0xbb3   : > { %v2232_v59 = vsel %vm5665_vm7, %v2227_v58, %v2223_v12  ;;  %v2230_v39 = vsel %vm5666_vm5, %v2223_v12, %v2227_v58  ;;  %vm5670_vm7 = vcmp.lt.s32.totalorder %v3627_v13, 15 }
 0xbb4   : > { %v2203_v22 = vpop.permute.xlu1 %2202 }
 0xbb6   : > { %v2207_v16 = vpop.permute.xlu0 %2206 }
 0xbb8   : > { %v2179_v54 = vpop.permute.xlu1 %2178 }
 0xbba   : > { %v2183_v43 = vpop.permute.xlu0 %2182 }
 0xbbc   : > { %v2159_v44 = vpop.permute.xlu1 %2158 }
 0xbbe   : > { %v2163_v55 = vpop.permute.xlu0 %2162 }
 0xbc0   : > { %v4985_v62 = vpop.permute.xlu1 %2138 }
 0xbc2   : > { %v4987_v34 = vpop.permute.xlu0 %2142 }
 0xbc4   : > { %v2245_v35 = vpop.permute.xlu1 %2244 }
 0xbc6   : > { %v2249_v63 = vpop.permute.xlu0 %2248 }
 0xbc7   : > { %v2251_v5 = vsel %vm321_vm6, %v2245_v35, %v2249_v63  ;;  %v2253_v56 = vsel %vm321_vm6, %v2249_v63, %v2245_v35 }
 0xbc8   : > { %3326 = vmatprep.subr.msk.mxu1 %vm5513_vm1, %v2253_v56  ;;  %v2225_v57 = vpop.permute.xlu1 %2224 }
 0xbc9   : > { %2332 = vmatpush1.msra.mxu1 %v2251_v5 }
 0xbca   : > { %v2229_v52 = vpop.permute.xlu0 %2228  ;;  %3327 = vmatprep.subr.msk.mxu1 %vm5513_vm1, %v2252_v11 }
 0xbcb   : > { %v2231_v51 = vsel %vm5663_vm15, %v2225_v57, %v2229_v52  ;;  %v2233_v0 = vsel %vm5664_vm2, %v2229_v52, %v2225_v57  ;;  %2334 = vmatpush1.msra.mxu1 %v2250_v31  ;;  %vm5668_vm15 = vmmov %vm5667_vm10 }
 0xbcc   : > { %3328 = vmatprep.subr.msk.mxu1 %vm3664_vm8, %v2233_v0  ;;  %v2205_v1 = vpop.permute.xlu1 %2204  ;;  %vm5669_vm2 = vmmov %vm5667_vm10 }
 0xbcd   : > { %3329 = vmatpush1.msk.msra.mxu1 %vm181_vm9, %v2231_v51  ;;  %v2212_v21 = vsel %vm5669_vm2, %v2207_v16, %v2203_v22  ;;  %vm5671_vm5 = vmmov %vm5669_vm2 }
 0xbce   : > { %v2209_v61 = vpop.permute.xlu0 %2208  ;;  %3330 = vmatprep.subr.msk.mxu1 %vm3664_vm8, %v2232_v59  ;;  %v2210_v30 = vsel %vm5671_vm5, %v2203_v22, %v2207_v16 }
 0xbcf   : > { %v2211_v53 = vsel %vm5667_vm10, %v2205_v1, %v2209_v61  ;;  %v2213_v40 = vsel %vm5668_vm15, %v2209_v61, %v2205_v1  ;;  %3331 = vmatpush1.msk.msra.mxu1 %vm181_vm9, %v2230_v39  ;;  %vm5672_vm10 = vmmov %vm5670_vm7  ;;  %vm5673_vm15 = vcmp.lt.s32.totalorder %v3613_v6, 1 }
 0xbd0   : > { %3332 = vmatprep.subr.msk.mxu1 %vm186_vm0, %v2213_v40  ;;  %v2119_v48 = vpop.permute.xlu1 %2118  ;;  %vm5674_vm2 = vmmov %vm5673_vm15 }
 0xbd1   : > { %3333 = vmatpush1.msk.msra.mxu1 %vm5670_vm7, %v2211_v53  ;;  %vm5675_vm7 = vmmov %vm5674_vm2 }
 0xbd2   : > { %v2123_v50 = vpop.permute.xlu0 %2122  ;;  %3334 = vmatprep.subr.msk.mxu1 %vm186_vm0, %v2212_v21  ;;  %vm5676_vm5 = vmmov %vm5674_vm2 }
 0xbd3   : > { %3335 = vmatpush1.msk.msra.mxu1 %vm5672_vm10, %v2210_v30  ;;  %vm5677_vm10 = vcmp.lt.s32.totalorder %v3613_v6, 15  ;;  %v2126_v59 = vsel %vm229_vm13, %v2119_v48, %v2123_v50  ;;  %v3148_v30 = vld [vmem:[%s5501_s1 + $0x100] sm:$0xff] }
 0xbd4   : > { %2343 = vmatprep.subr.mxu1 %v4922_v27  ;;  %v2181_v12 = vpop.permute.xlu1 %2180  ;;  %v2186_v27 = vsel %vm5675_vm7, %v2179_v54, %v2183_v43 }
 0xbd5   : > { %2344 = vmatpush1.msra.mxu1 %v4918_v26 }
 0xbd6   : > { %v2185_v58 = vpop.permute.xlu0 %2184  ;;  %2345 = vmatprep.subr.mxu1 %v4894_v60  ;;  %v2188_v60 = vsel %vm5676_vm5, %v2183_v43, %v2179_v54  ;;  %vm5681_vm5 = vcmp.lt.s32.totalorder %v3613_v6, 16 }
 0xbd7   : > { %v2187_v35 = vsel %vm5673_vm15, %v2181_v12, %v2185_v58  ;;  %v2189_v22 = vsel %vm5674_vm2, %v2185_v58, %v2181_v12  ;;  %2346 = vmatpush1.msra.mxu1 %v4892_v4  ;;  %vm5678_vm15 = vmmov %vm5677_vm10 }
 0xbd8   : > { %3336 = vmatprep.subr.msk.mxu1 %vm182_vm4, %v2187_v35  ;;  %v2161_v16 = vpop.permute.xlu1 %2160  ;;  %vm5679_vm2 = vmmov %vm5677_vm10 }
 0xbd9   : > { %3337 = vmatpush1.msk.msra.mxu1 %vm181_vm9, %v2189_v22  ;;  %v2166_v54 = vsel %vm5679_vm2, %v2159_v44, %v2163_v55  ;;  %vm5680_vm7 = vmmov %vm5679_vm2 }
 0xbda   : > { %v2165_v26 = vpop.permute.xlu0 %2164  ;;  %3338 = vmatprep.subr.msk.mxu1 %vm182_vm4, %v2186_v27  ;;  %v2168_v43 = vsel %vm5680_vm7, %v2163_v55, %v2159_v44  ;;  %vm5684_vm2 = vmmov %vm5681_vm5  ;;  %vm5685_vm7 = vcmp.lt.s32.totalorder %v3613_v6, 111 }
 0xbdb   : > { %v2167_v4 = vsel %vm5677_vm10, %v2161_v16, %v2165_v26  ;;  %v2169_v63 = vsel %vm5678_vm15, %v2165_v26, %v2161_v16  ;;  %3339 = vmatpush1.msk.msra.mxu1 %vm181_vm9, %v2188_v60  ;;  %vm5682_vm10 = vmmov %vm5681_vm5  ;;  %v2148_v55 = vsel %vm5684_vm2, %v4987_v34, %v4985_v62  ;;  %v3162_v60 = vld [vmem:[%s5502_s2 + $0xa0] sm:$0xff]  ;;  %v3163_v26 = vld [vmem:[%s5502_s2 + $0xa8] sm:$0xff] }
 0xbdc   : > { %3340 = vmatprep.subr.msk.mxu1 %vm186_vm0, %v2167_v4  ;;  %v2141_v5 = vpop.permute.xlu1 %2140  ;;  %vm5683_vm15 = vmmov %vm5681_vm5 }
 0xbdd   : > { %3341 = vmatpush1.msk.msra.mxu1 %vm3729_vm14, %v2169_v63  ;;  %v2146_v44 = vsel %vm5683_vm15, %v4985_v62, %v4987_v34  ;;  %v2128_v62 = vsel %vm229_vm13, %v2123_v50, %v2119_v48 }
 0xbde   : > { %v2145_v56 = vpop.permute.xlu0 %2144  ;;  %3342 = vmatprep.subr.msk.mxu1 %vm186_vm0, %v2166_v54 }
 0xbdf   : > { %v2149_v57 = vsel %vm5681_vm5, %v2145_v56, %v2141_v5  ;;  %3343 = vmatpush1.msk.msra.mxu1 %vm3729_vm14, %v2168_v43  ;;  %v2147_v11 = vsel %vm5682_vm10, %v2141_v5, %v2145_v56  ;;  %vm5686_vm5 = vmmov %vm5685_vm7  ;;  %vm5687_vm10 = vcmp.lt.s32.totalorder %v3627_v13, 15 }
 0xbe0   : > { %2355 = vmatprep.subr.mxu1 %v2147_v11  ;;  %v2121_v31 = vpop.permute.xlu1 %2120  ;;  %vm5688_vm15 = vmmov %vm5686_vm5 }
 0xbe1   : > { %3344 = vmatpush1.msk.msra.mxu1 %vm193_vm12, %v2149_v57  ;;  %vm5689_vm2 = vmmov %vm5686_vm5 }
 0xbe2   : > { %v2125_v52 = vpop.permute.xlu0 %2124  ;;  %2357 = vmatprep.subr.mxu1 %v2146_v44 }
 0xbe3   : > { %v2127_v51 = vsel %vm229_vm13, %v2121_v31, %v2125_v52  ;;  %v2129_v0 = vsel %vm229_vm13, %v2125_v52, %v2121_v31  ;;  %3345 = vmatpush1.msk.msra.mxu1 %vm193_vm12, %v2148_v55 }
 0xbe4   : > { %3346 = vmatprep.subr.msk.mxu1 %vm182_vm4, %v2127_v51  ;;  %v2265_v1 = vpop.permute.xlu1 %2264 }
 0xbe5   : > { %3347 = vmatpush1.msk.msra.mxu1 %vm3765_vm11, %v2129_v0 }
 0xbe6   : > { %v2269_v34 = vpop.permute.xlu0 %2268  ;;  %3348 = vmatprep.subr.msk.mxu1 %vm182_vm4, %v2126_v59 }
 0xbe7   : > { %v2271_v39 = vsel %vm5685_vm7, %v2265_v1, %v2269_v34  ;;  %v2273_v61 = vsel %vm5686_vm5, %v2269_v34, %v2265_v1  ;;  %3349 = vmatpush1.msk.msra.mxu1 %vm3765_vm11, %v2128_v62  ;;  %vm5690_vm7 = vmmov %vm5687_vm10 }
 0xbe8   : > { %3350 = vmatprep.subr.msk.mxu1 %vm3634_vm3, %v2273_v61  ;;  %v2263_v53 = vpop.permute.xlu1 %2262  ;;  %vm5691_vm5 = vmmov %vm5689_vm2 }
 0xbe9   : > { %3351 = vmatpush2.msk.msra.mxu1 %vm5687_vm10, %v2271_v39  ;;  %vm5692_vm10 = vmmov %vm5689_vm2 }
 0xbea   : > { %v2267_v40 = vpop.permute.xlu0 %2266 }
 0xbeb   : > { %v2270_v48 = vsel %vm5688_vm15, %v2263_v53, %v2267_v40  ;;  %v2272_v21 = vsel %vm5689_vm2, %v2267_v40, %v2263_v53  ;;  %vm5693_vm15 = vmmov %vm5690_vm7  ;;  %vm5694_vm2 = vcmp.lt.s32.totalorder %v3613_v6, 113 }
 0xbec   : > { %3352 = vmatprep.subr.msk.mxu1 %vm3634_vm3, %v2272_v21 }
 0xbed   : > { %3353 = vmatpush2.msk.msra.mxu1 %vm5690_vm7, %v2270_v48  ;;  %vm5695_vm7 = vmmov %vm5694_vm2 }
 0xbee   : > { %2396 = vmatmul.mubr.f32.vlgmr.msra.gmra.mxu1 %v3148_v30  ;;  %v5194_v4 = vpop.permute.xlu0 %2750 }
 0xbf2   : > { %v5198_v5 = vpop.permute.xlu0 %2735 }
 0xbf5   : > { %v2326_v50 = vpop.permute.xlu1 %2325 }
 0xbf6   : > { %v5202_v43 = vpop.permute.xlu0 %2714 }
 0xbf9   : > { %v5196_v63 = vpop.permute.xlu1 %2752 }
 0xbfa   : > { %v5206_v57 = vpop.permute.xlu0 %2699 }
 0xbfd   : > { %v5200_v54 = vpop.permute.xlu1 %2737 }
 0xbfe   : > { %v5210_v31 = vpop.permute.xlu0 %2678 }
 0xc01   : > { %v5204_v56 = vpop.permute.xlu1 %2716 }
 0xc05   : > { %v5208_v11 = vpop.permute.xlu1 %2701 }
 0xc09   : > { %v5212_v44 = vpop.permute.xlu1 %2680 }
 0xcae   : > { %v2397_v12 = vpop.f32.mrf.mxu1 }
 0xcaf   : > { %v2398_v58 = vadd.f32 %v2397_v12, %v2326_v50 }
 0xcb0   : > { %v2399_v35 = vpop.f32.mrf.mxu1 }
 0xcb1   : > { %v5123_v22 = vadd.f32 %v2398_v58, %v4778_v7  ;;  %v2400_v16 = vadd.f32 %v2399_v35, %v2326_v50  ;;  %v3154_v7 = vld [vmem:[%s5502_s2 + $0x90] sm:$0xff] }
 0xcb3   : > { %v5126_v27 = vadd.f32 %v2400_v16, %v4781_v15  ;;  %2476 = vrot.lane.b32.xlu0 %v5123_v22, %s3491_s27  ;;  %v3155_v15 = vld [vmem:[%s5502_s2 + $0x98] sm:$0xff] }
 0xcb5   : > { %2478 = vrot.lane.b32.xlu1 %v5126_v27, %s3491_s27  ;;  %s3506_s27 = smov 31  }
 0xcb7   : > { %2466 = vrot.lane.b32.xlu0 %v5123_v22, %s3490_s26 }
 0xcb9   : > { %2468 = vrot.lane.b32.xlu1 %v5126_v27, %s3490_s26  ;;  %s3505_s26 = smov 30  }
 0xcbb   : > { %2456 = vrot.lane.b32.xlu0 %v5123_v22, %s3492_s28 }
 0xcbd   : > { %2458 = vrot.lane.b32.xlu1 %v5126_v27, %s3492_s28  ;;  %s3507_s28 = smov 32  }
 0xcbf   : > { %2446 = vrot.lane.b32.xlu0 %v5123_v22, %s3493_s29 }
 0xcc1   : > { %2448 = vrot.lane.b32.xlu1 %v5126_v27, %s3493_s29  ;;  %s3508_s29 = smov 33  }
 0xcc3   : > { %2434 = vrot.lane.b32.xlu0 %v5123_v22, %s3494_s30 }
 0xcc5   : > { %2436 = vrot.lane.b32.xlu1 %v5126_v27, %s3494_s30  ;;  %s3509_s30 = smov 34  }
 0xcc7   : > { %2424 = vrot.lane.b32.xlu0 %v5123_v22, %s3497_s4 }
 0xcc9   : > { %2426 = vrot.lane.b32.xlu1 %v5126_v27, %s3497_s4  ;;  %s3510_s4 = smov 94  }
 0xccb   : > { %2414 = vrot.lane.b32.xlu0 %v5123_v22, %s3498_s5 }
 0xccd   : > { %2416 = vrot.lane.b32.xlu1 %v5126_v27, %s3498_s5  ;;  %s3511_s5 = smov 95  }
 0xccf   : > { %2404 = vrot.lane.b32.xlu0 %v5123_v22, %s3499_s6 }
 0xcd1   : > { %2406 = vrot.lane.b32.xlu1 %v5126_v27, %s3499_s6  ;;  %s3512_s6 = smov 96  }
 0xcd3   : > { %2663 = vrot.lane.b32.xlu0 %v4972_v3, %s3505_s26 }
 0xcd5   : > { %2665 = vrot.lane.b32.xlu1 %v4976_v49, %s3505_s26 }
 0xcd7   : > { %2648 = vrot.lane.b32.xlu0 %v4972_v3, %s3506_s27 }
 0xcd9   : > { %2650 = vrot.lane.b32.xlu1 %v4976_v49, %s3506_s27 }
 0xcdb   : > { %2633 = vrot.lane.b32.xlu0 %v4972_v3, %s3507_s28 }
 0xcdd   : > { %2635 = vrot.lane.b32.xlu1 %v4976_v49, %s3507_s28 }
 0xcdf   : > { %2618 = vrot.lane.b32.xlu0 %v4972_v3, %s3508_s29 }
 0xce1   : > { %2620 = vrot.lane.b32.xlu1 %v4976_v49, %s3508_s29 }
 0xce3   : > { %2603 = vrot.lane.b32.xlu0 %v4972_v3, %s3509_s30 }
 0xce5   : > { %2605 = vrot.lane.b32.xlu1 %v4976_v49, %s3509_s30 }
 0xce7   : > { %2846 = vrot.lane.b32.xlu0 %v4972_v3, %s3510_s4 }
 0xce9   : > { %2848 = vrot.lane.b32.xlu1 %v4976_v49, %s3510_s4 }
 0xceb   : > { %2831 = vrot.lane.b32.xlu0 %v4972_v3, %s3511_s5 }
 0xced   : > { %2833 = vrot.lane.b32.xlu1 %v4976_v49, %s3511_s5 }
 0xcef   : > { %2816 = vrot.lane.b32.xlu0 %v4972_v3, %s3512_s6 }
 0xcf1   : > { %2818 = vrot.lane.b32.xlu1 %v4976_v49, %s3512_s6 }
 0xcf3   : > { %2801 = vrot.lane.b32.xlu0 %v4972_v3, %s3513_s11 }
 0xcf5   : > { %2803 = vrot.lane.b32.xlu1 %v4976_v49, %s3513_s11 }
 0xcf7   : > { %2786 = vrot.lane.b32.xlu0 %v4972_v3, %s3514_s14 }
 0xcf9   : > { %2788 = vrot.lane.b32.xlu1 %v4976_v49, %s3514_s14 }
 0xcfb   : > { %2771 = vrot.lane.b32.xlu0 %v4972_v3, %s3515_s17 }
 0xcfd   : > { %2773 = vrot.lane.b32.xlu1 %v4976_v49, %s3515_s17  ;;  %s158_s17 = sand.u32 1, %s3480_s12   ;;  %s3171_s12 = sshll.u32 (%p3561_p4), %s3549_s15, 4 }
 0xcfe   : > { %s3108_s18 = sshll.u32 %s158_s17, 5  ;;  %s3029_s24 = scalar_lea.vmem (%p3561_p4), %s5503_s3, %s3171_s12 }
 0xcff   : > { %2512 = vperm.xlu0 %3462, %v3154_v7   ;;  %s160_s21 = scalar_lea.vmem [#allocation3], %s3108_s18 }
 0xd01   : > { %2517 = vperm.xlu1 %3463, %v3155_v15  }
 0xd03   : > { %2921 = vperm.xlu0 %3462, %v3162_v60  }
 0xd05   : > { %2926 = vperm.xlu1 %3463, %v3163_v26  }
 0xd25   : > { %v2477_v55 = vpop.permute.xlu0 %2476 }
 0xd27   : > { %v2479_v52 = vpop.permute.xlu1 %2478 }
 0xd28   : > { %v2480_v51 = vsel %vm5691_vm5, %v2477_v55, %v2479_v52  ;;  %v2481_v0 = vsel %vm5692_vm10, %v2479_v52, %v2477_v55  ;;  %vm5698_vm10 = vmmov %vm5693_vm15 }
 0xd29   : > { %v2467_v1 = vpop.permute.xlu0 %2466  ;;  %3354 = vmatprep.subr.msk.mxu0 %vm3634_vm3, %v2481_v0 }
 0xd2a   : > { %3355 = vmatpush1.msk.msra.mxu0 %vm5693_vm15, %v2480_v51  ;;  %vm5699_vm15 = vcmp.lt.s32.totalorder %v3613_v6, 1 }
 0xd2b   : > { %v2469_v59 = vpop.permute.xlu1 %2468 }
 0xd2c   : > { %v2470_v62 = vsel %vm321_vm6, %v2467_v1, %v2469_v59  ;;  %v2471_v34 = vsel %vm321_vm6, %v2469_v59, %v2467_v1  ;;  %vm5696_vm6 = vcmp.lt.s32.totalorder %v3613_v6, 127 }
 0xd2d   : > { %v2457_v39 = vpop.permute.xlu0 %2456  ;;  %3356 = vmatprep.subr.msk.mxu0 %vm5513_vm1, %v2471_v34  ;;  %vm5697_vm5 = vmmov %vm5696_vm6 }
 0xd2e   : > { %2543 = vmatpush1.msra.mxu0 %v2470_v62  ;;  %v3152_v62 = vld [vmem:[%s5501_s1 + $0x120] sm:$0xff] }
 0xd2f   : > { %v2459_v61 = vpop.permute.xlu1 %2458 }
 0xd30   : > { %v2460_v53 = vsel %vm5694_vm2, %v2457_v39, %v2459_v61  ;;  %v2461_v40 = vsel %vm5695_vm7, %v2459_v61, %v2457_v39  ;;  %vm5700_vm2 = vmmov %vm5699_vm15  ;;  %vm5701_vm7 = vcmp.lt.s32.totalorder %v3613_v6, 15 }
 0xd31   : > { %v2447_v48 = vpop.permute.xlu0 %2446  ;;  %3357 = vmatprep.subr.msk.mxu0 %vm3664_vm8, %v2461_v40 }
 0xd32   : > { %3358 = vmatpush1.msk.msra.mxu0 %vm181_vm9, %v2460_v53 }
 0xd33   : > { %v2449_v21 = vpop.permute.xlu1 %2448 }
 0xd34   : > { %v2450_v30 = vsel %vm5696_vm6, %v2447_v48, %v2449_v21  ;;  %v2451_v50 = vsel %vm5697_vm5, %v2449_v21, %v2447_v48  ;;  %vm5702_vm6 = vmmov %vm5701_vm7  ;;  %vm5703_vm5 = vcmp.lt.s32.totalorder %v3613_v6, 16  ;;  %v3159_v21 = vld [vmem:[%s5501_s1 + $0x148] sm:$0xff] }
 0xd35   : > { %v2435_v12 = vpop.permute.xlu0 %2434  ;;  %3359 = vmatprep.subr.msk.mxu0 %vm186_vm0, %v2451_v50 }
 0xd36   : > { %3360 = vmatpush1.msk.msra.mxu0 %vm5698_vm10, %v2450_v30  ;;  %vm5704_vm10 = vmmov %vm5703_vm5 }
 0xd37   : > { %2548 = vmatprep.subr.mxu0 %v5126_v27  ;;  %v2437_v58 = vpop.permute.xlu1 %2436 }
 0xd38   : > { %v2438_v35 = vsel %vm5699_vm15, %v2435_v12, %v2437_v58  ;;  %v2439_v16 = vsel %vm5700_vm2, %v2437_v58, %v2435_v12  ;;  %2549 = vmatpush1.msra.mxu0 %v5123_v22  ;;  %vm5514_vm15 = vcmp.ge.s32.totalorder %v3619_v9, 2  ;;  %vm2754_vm2 = vcmp.lt.s32.totalorder %v3613_v6, 114 }
 0xd39   : > { %v2425_v7 = vpop.permute.xlu0 %2424  ;;  %3361 = vmatprep.subr.msk.mxu0 %vm182_vm4, %v2438_v35  ;;  %v2756_v39 = vsel %vm2754_vm2, %v5196_v63, %v5194_v4  ;;  %v2755_v61 = vsel %vm2754_vm2, %v5194_v4, %v5196_v63  ;;  %v3153_v4 = vld [vmem:[%s5501_s1 + $0x130] sm:$0xff] }
 0xd3a   : > { %3362 = vmatpush1.msk.msra.mxu0 %vm181_vm9, %v2439_v16 }
 0xd3b   : > { %v2427_v15 = vpop.permute.xlu1 %2426 }
 0xd3c   : > { %v2428_v27 = vsel %vm5701_vm7, %v2425_v7, %v2427_v15  ;;  %v2429_v60 = vsel %vm5702_vm6, %v2427_v15, %v2425_v7  ;;  %vm206_vm7 = vmand %vm5513_vm1, %vm5514_vm15  ;;  %vm2739_vm6 = vcmp.lt.s32.totalorder %v3613_v6, 126  ;;  %vm5515_vm1 = vcmp.lt.s32.totalorder %v3627_v13, 14 }
 0xd3d   : > { %v2415_v26 = vpop.permute.xlu0 %2414  ;;  %3363 = vmatprep.subr.msk.mxu0 %vm186_vm0, %v2428_v27  ;;  %v2741_v40 = vsel %vm2739_vm6, %v5200_v54, %v5198_v5  ;;  %v2740_v63 = vsel %vm2739_vm6, %v5198_v5, %v5200_v54 }
 0xd3e   : > { %3364 = vmatpush1.msk.msra.mxu0 %vm3729_vm14, %v2429_v60 }
 0xd3f   : > { %v2417_v22 = vpop.permute.xlu1 %2416 }
 0xd40   : > { %v2419_v55 = vsel %vm5703_vm5, %v2417_v22, %v2415_v26  ;;  %v2418_v52 = vsel %vm5704_vm10, %v2415_v26, %v2417_v22  ;;  %vm177_vm5 = vcmp.ge.s32.totalorder %v3627_v13, 2  ;;  %vm5705_vm10 = vcmask 588800  }
 0xd41   : > { %v2405_v51 = vpop.permute.xlu0 %2404  ;;  %2554 = vmatprep.subr.mxu0 %v2418_v52  ;;  %vm5706_vm2 = vmmov %vm5705_vm10 }
 0xd42   : > { %3365 = vmatpush1.msk.msra.mxu0 %vm193_vm12, %v2419_v55  ;;  %vm5708_vm6 = vmmov %vm5706_vm2 }
 0xd43   : > { %v2407_v0 = vpop.permute.xlu1 %2406 }
 0xd44   : > { %v2408_v1 = vsel %vm229_vm13, %v2405_v51, %v2407_v0  ;;  %v2409_v59 = vsel %vm229_vm13, %v2407_v0, %v2405_v51  ;;  %vm190_vm13 = vcmp.lt.s32.totalorder %v3619_v9, 14 }
 0xd45   : > { %3366 = vmatprep.subr.msk.mxu0 %vm182_vm4, %v2408_v1  ;;  %v5284_v34 = vpop.permute.xlu0 %2663 }
 0xd46   : > { %3367 = vmatpush1.msk.msra.mxu0 %vm3765_vm11, %v2409_v59 }
 0xd47   : > { %3156 = vmatmul.mubr.msk.f32.vlgmr.msra.gmra.mxu0 %vm5705_vm10, %v3152_v62  ;;  %3368 = vmatprep.subr.msk.mxu0 %vm206_vm7, %v2756_v39  ;;  %v2666_v53 = vpop.permute.xlu1 %2665  ;;  %vm5707_vm7 = vcmp.lt.s32.totalorder %v3627_v13, 15  ;;  %vm2718_vm10 = vcmp.lt.s32.totalorder %v3613_v6, 2 }
 0xd48   : > { %3369 = vmatpush1.msk.msra.mxu0 %vm177_vm5, %v2755_v61  ;;  %2596 = vmatprep.mubr.f32.mxu0 %v3495_v2  ;;  %v2719_v54 = vsel %vm2718_vm10, %v5202_v43, %v5204_v56 }
 0xd49   : > { %3370 = vmatprep.subr.msk.mxu0 %vm190_vm13, %v2741_v40  ;;  %v2649_v48 = vpop.permute.xlu0 %2648 }
 0xd4a   : > { %3371 = vmatpush1.msk.msra.mxu0 %vm5515_vm1, %v2740_v63 }
 0xd4b   : > { %3157 = vmatmul.mubr.msk.f32.gmra.mxu0 %vm5706_vm2, %v3153_v4  ;;  %3372 = vmatprep.subr.msk.mxu0 %vm186_vm0, %v3694_v28  ;;  %v2651_v2 = vpop.permute.xlu1 %2650  ;;  %vm2703_vm2 = vcmp.lt.s32.totalorder %v3613_v6, 14 }
 0xd4c   : > { %3373 = vmatpush1.msk.msra.mxu0 %vm5707_vm7, %v3698_v29  ;;  %3164 = vmatprep.mubr.msk.f32.mxu0 %vm5708_vm6, %v3159_v21  ;;  %v2720_v29 = vsel %vm2718_vm10, %v5204_v56, %v5202_v43  ;;  %vm201_vm7 = vmand %vm193_vm12, %vm5515_vm1  ;;  %vm2682_vm6 = vcmp.lt.s32.totalorder %v3613_v6, 18  ;;  %vm175_vm10 = vcmp.ge.s32.totalorder %v3622_v10, 32 }
 0xd4d   : > { %2941 = vmatprep.subr.mxu0 %v4976_v49  ;;  %v2634_v5 = vpop.permute.xlu0 %2633  ;;  %v2683_v36 = vsel %vm2682_vm6, %v5210_v31, %v5212_v44 }
 0xd4e   : > { %2942 = vmatpush1.msra.mxu0 %v4972_v3 }
 0xd4f   : > { %3374 = vmatprep.subr.msk.mxu0 %vm182_vm4, %v3711_v32  ;;  %v2636_v28 = vpop.permute.xlu1 %2635  ;;  %v2704_v32 = vsel %vm2703_vm2, %v5206_v57, %v5208_v11 }
 0xd50   : > { %3375 = vmatpush1.msk.msra.mxu0 %vm181_vm9, %v3715_v33  ;;  %v2705_v33 = vsel %vm2703_vm2, %v5208_v11, %v5206_v57  ;;  %vm2667_vm2 = vcmp.lt.s32.totalorder %v3613_v6, 30 }
 0xd51   : > { %3376 = vmatprep.subr.msk.mxu0 %vm5514_vm15, %v2719_v54  ;;  %v2619_v3 = vpop.permute.xlu0 %2618  ;;  %v2669_v45 = vsel %vm2667_vm2, %v2666_v53, %v5284_v34 }
 0xd52   : > { %3377 = vmatpush1.msk.msra.mxu0 %vm177_vm5, %v2720_v29 }
 0xd53   : > { %3378 = vmatprep.subr.msk.mxu0 %vm190_vm13, %v2704_v32  ;;  %v2621_v49 = vpop.permute.xlu1 %2620 }
 0xd54   : > { %3379 = vmatpush1.msk.msra.mxu0 %vm201_vm7, %v2705_v33  ;;  %vm2652_vm7 = vcmp.lt.s32.totalorder %v3613_v6, 31 }
 0xd55   : > { %3380 = vmatprep.subr.msk.mxu0 %vm186_vm0, %v3735_v37  ;;  %v2604_v43 = vpop.permute.xlu0 %2603  ;;  %v2654_v57 = vsel %vm2652_vm7, %v2651_v2, %v2649_v48 }
 0xd56   : > { %3381 = vmatpush1.msk.msra.mxu0 %vm3729_vm14, %v3739_v38  ;;  %vm195_vm14 = vmand %vm193_vm12, %vm177_vm5  ;;  %v2684_v38 = vsel %vm2682_vm6, %v5212_v44, %v5210_v31  ;;  %vm5709_vm6 = vcmp.lt.s32.totalorder %v3627_v13, 15 }
 0xd57   : > { %2951 = vmatprep.subr.mxu0 %v3750_v41  ;;  %v2606_v56 = vpop.permute.xlu1 %2605 }
 0xd58   : > { %3382 = vmatpush1.msk.msra.mxu0 %vm193_vm12, %v3754_v42  ;;  %vm191_vm12 = vmand %vm175_vm10, %vm5515_vm1  ;;  %v2668_v42 = vsel %vm2667_vm2, %v5284_v34, %v2666_v53  ;;  %vm2622_vm1 = vcmp.lt.s32.totalorder %v3613_v6, 33  ;;  %vm2607_vm2 = vcmp.lt.s32.totalorder %v3613_v6, 34 }
 0xd59   : > { %3383 = vmatprep.subr.msk.mxu0 %vm182_vm4, %v3771_v46  ;;  %v2847_v37 = vpop.permute.xlu0 %2846  ;;  %v2623_v50 = vsel %vm2622_vm1, %v2619_v3, %v2621_v49  ;;  %v2624_v12 = vsel %vm2622_vm1, %v2621_v49, %v2619_v3  ;;  %v2608_v35 = vsel %vm2607_vm2, %v2604_v43, %v2606_v56  ;;  %v2609_v16 = vsel %vm2607_vm2, %v2606_v56, %v2604_v43 }
 0xd5a   : > { %3384 = vmatpush1.msk.msra.mxu0 %vm3765_vm11, %v3775_v47  ;;  %vm2637_vm11 = vcmp.lt.s32.totalorder %v3613_v6, 32  ;;  %v2653_v47 = vsel %vm2652_vm7, %v2649_v48, %v2651_v2  ;;  %vm214_vm7 = vcmp.lt.s32.totalorder %v3616_v8, 224  ;;  %vm5711_vm2 = vcmp.lt.s32.totalorder %v3627_v13, 14 }
 0xd5b   : > { %3385 = vmatprep.subr.msk.mxu0 %vm5514_vm15, %v2683_v36  ;;  %v2849_v41 = vpop.permute.xlu1 %2848  ;;  %vm187_vm15 = vmand %vm175_vm10, %vm5709_vm6  ;;  %v2638_v31 = vsel %vm2637_vm11, %v2634_v5, %v2636_v28  ;;  %v2639_v44 = vsel %vm2637_vm11, %v2636_v28, %v2634_v5  ;;  %vm2835_vm11 = vcmp.lt.s32.totalorder %v3613_v6, 95  ;;  %vm5710_vm6 = vcmp.ge.s32.totalorder %v3619_v9, 2 }
 0xd5c   : > { %3386 = vmatpush1.msk.msra.mxu0 %vm195_vm14, %v2684_v38  ;;  %vm183_vm14 = vmand %vm175_vm10, %vm181_vm9 }
 0xd5d   : > { %3387 = vmatprep.subr.msk.mxu0 %vm190_vm13, %v2668_v42  ;;  %v2832_v46 = vpop.permute.xlu0 %2831  ;;  %vm222_vm1 = vmand %vm214_vm7, %vm190_vm13 }
 0xd5e   : > { %3388 = vmatpush1.msk.msra.mxu0 %vm191_vm12, %v2669_v45  ;;  %vm179_vm12 = vmand %vm175_vm10, %vm177_vm5 }
 0xd5f   : > { %3389 = vmatprep.subr.msk.mxu0 %vm186_vm0, %v2653_v47  ;;  %v2834_v11 = vpop.permute.xlu1 %2833 }
 0xd60   : > { %3390 = vmatpush1.msk.msra.mxu0 %vm187_vm15, %v2654_v57  ;;  %vm2850_vm15 = vcmp.lt.s32.totalorder %v3613_v6, 94  ;;  %v2837_v60 = vsel %vm2835_vm11, %v2834_v11, %v2832_v46  ;;  %v2836_v26 = vsel %vm2835_vm11, %v2832_v46, %v2834_v11 }
 0xd61   : > { %2961 = vmatprep.subr.mxu0 %v2638_v31  ;;  %v2817_v30 = vpop.permute.xlu0 %2816  ;;  %v2852_v10 = vsel %vm2850_vm15, %v2849_v41, %v2847_v37  ;;  %v2851_v15 = vsel %vm2850_vm15, %v2847_v37, %v2849_v41  ;;  %vm2790_vm15 = vcmp.lt.s32.totalorder %v3613_v6, 98 }
 0xd62   : > { %3391 = vmatpush1.msk.msra.mxu0 %vm175_vm10, %v2639_v44  ;;  %vm220_vm10 = vmand %vm214_vm7, %vm186_vm0 }
 0xd63   : > { %3392 = vmatprep.subr.msk.mxu0 %vm182_vm4, %v2623_v50  ;;  %v2819_v58 = vpop.permute.xlu1 %2818  ;;  %vm218_vm0 = vmand %vm214_vm7, %vm182_vm4  ;;  %vm5714_vm4 = vcmp.lt.s32.totalorder %v3616_v8, 240  ;;  %v3160_v8 = vld [vmem:[%s5501_s1 + $0x150] sm:$0xff] }
 0xd64   : > { %3393 = vmatpush1.msk.msra.mxu0 %vm183_vm14, %v2624_v12  ;;  %vm2820_vm14 = vcmp.lt.s32.totalorder %v3613_v6, 96 }
 0xd65   : > { %3394 = vmatprep.subr.msk.mxu0 %vm5710_vm6, %v2608_v35  ;;  %v2802_v7 = vpop.permute.xlu0 %2801  ;;  %vm2805_vm6 = vcmp.lt.s32.totalorder %v3613_v6, 97  ;;  %v2822_v55 = vsel %vm2820_vm14, %v2819_v58, %v2817_v30  ;;  %v2821_v52 = vsel %vm2820_vm14, %v2817_v30, %v2819_v58  ;;  %vm212_vm14 = vmand %vm5714_vm4, %vm190_vm13 }
 0xd66   : > { %3395 = vmatpush1.msk.msra.mxu0 %vm179_vm12, %v2609_v16  ;;  %vm5712_vm12 = vcmp.lt.s32.totalorder %v3627_v13, 15  ;;  %vm5717_vm13 = vmmov %vm5714_vm4 }
 0xd67   : > { %3396 = vmatprep.subr.msk.mxu0 %vm222_vm1, %v2852_v10  ;;  %v2804_v27 = vpop.permute.xlu1 %2803  ;;  %vm5713_vm1 = vcmp.ge.s32.totalorder %v3619_v9, 2  ;;  %v3161_v9 = vld [vmem:[%s5501_s1 + $0x158] sm:$0xff] }
 0xd68   : > { %3397 = vmatpush2.msk.msra.mxu0 %vm5711_vm2, %v2851_v15  ;;  %v2807_v0 = vsel %vm2805_vm6, %v2804_v27, %v2802_v7  ;;  %vm216_vm11 = vmand %vm214_vm7, %vm5713_vm1  ;;  %v2806_v1 = vsel %vm2805_vm6, %v2802_v7, %v2804_v27 }
 0xd69   : > { %3398 = vmatprep.subr.msk.mxu0 %vm220_vm10, %v2837_v60  ;;  %v2787_v22 = vpop.permute.xlu0 %2786  ;;  %vm2775_vm10 = vcmp.lt.s32.totalorder %v3613_v6, 110  ;;  %v3158_v6 = vld [vmem:[%s5501_s1 + $0x140] sm:$0xff] }
 0xd6a   : > { %3399 = vmatpush2.msk.msra.mxu0 %vm5712_vm12, %v2836_v26 }
 0xd6b   : > { %3400 = vmatprep.subr.msk.mxu0 %vm214_vm7, %v2822_v55  ;;  %v2789_v51 = vpop.permute.xlu1 %2788  ;;  %vm5715_vm7 = vmmov %vm5711_vm2 }
 0xd6c   : > { %2986 = vmatpush2.msra.mxu0 %v2821_v52  ;;  %v2792_v62 = vsel %vm2790_vm15, %v2789_v51, %v2787_v22  ;;  %v2791_v34 = vsel %vm2790_vm15, %v2787_v22, %v2789_v51  ;;  %vm5716_vm2 = vmmov %vm5712_vm12 }
 0xd6d   : > { %3401 = vmatprep.subr.msk.mxu0 %vm218_vm0, %v2807_v0  ;;  %v2772_v59 = vpop.permute.xlu0 %2771 }
 0xd6e   : > { %3402 = vmatpush2.msk.msra.mxu0 %vm181_vm9, %v2806_v1 }
 0xd6f   : > { %3403 = vmatprep.subr.msk.mxu0 %vm216_vm11, %v2792_v62  ;;  %v2774_v39 = vpop.permute.xlu1 %2773 }
 0xd70   : > { %v2776_v61 = vsel %vm2775_vm10, %v2772_v59, %v2774_v39  ;;  %v2777_v53 = vsel %vm2775_vm10, %v2774_v39, %v2772_v59  ;;  %3404 = vmatpush2.msk.msra.mxu0 %vm177_vm5, %v2791_v34 }
 0xd71   : > { %3405 = vmatprep.subr.msk.mxu0 %vm212_vm14, %v2777_v53 }
 0xd72   : > { %3406 = vmatpush2.msk.msra.mxu0 %vm5715_vm7, %v2776_v61 }
 0xd73   : > { %3407 = vmatprep.subr.msk.mxu0 %vm3634_vm3, %v3643_v17  ;;  %vm5718_vm3 = vcmask 588800  }
 0xd74   : > { %3408 = vmatpush2.msk.msra.mxu0 %vm5716_vm2, %v3647_v18 }
 0xd75   : > { %3409 = vmatprep.subr.msk.mxu0 %vm5717_vm13, %v3658_v19 }
 0xd76   : > { %2996 = vmatpush2.msra.mxu0 %v3673_v23 }
 0xd77   : > { %3410 = vmatprep.subr.msk.mxu0 %vm3664_vm8, %v3679_v24 }
 0xd78   : > { %3411 = vmatpush2.msk.msra.mxu0 %vm181_vm9, %v3683_v25 }
 0xd79   : > { %3000 = vmatmul.mubr.f32.vlgmr.msra.gmra.mxu0 %v3158_v6 }
 0xd7a   : > { %3165 = vmatprep.mubr.msk.f32.mxu0 %vm5718_vm3, %v3161_v9  ;;  %v2513_v18 = vpop.permute.xlu0 %2512 }
 0xd7c   : > { %v2518_v20 = vpop.permute.xlu1 %2517 }
 0xd7d   : > { %3006 = vmatmul.mubr.f32.gmra.mxu0 %v3160_v8 }
 0xd7e   : > { %v2922_v24 = vpop.permute.xlu0 %2921 }
 0xd80   : > { %v2927_v2 = vpop.permute.xlu1 %2926 }
 0xe07   : > { %v2592_v14 = vpop.f32.mrf.mxu0 }
 0xe08   : > { %v2593_v13 = vadd.f32 %v2592_v14, %v2513_v18 }
 0xe09   : > { %v2594_v17 = vpop.f32.mrf.mxu0 }
 0xe0a   : > { %v2595_v63 = vadd.f32 %v2594_v17, %v2513_v18 }
 0xe0b   : > { %v2598_v19 = vpop.f32.mrf.mxu0 }
 0xe0c   : > { %v2599_v28 = vadd.f32 %v2598_v19, %v2518_v20 }
 0xe0d   : > { %v2600_v23 = vpop.f32.mrf.mxu0 }
 0xe0e   : > { %v2601_v32 = vadd.f32 %v2600_v23, %v2518_v20 }
 0xe39   : > { %v3001_v40 = vpop.f32.mrf.mxu0 }
 0xe3a   : > { %v3002_v25 = vadd.f32 %v3001_v40, %v2922_v24 }
 0xe3b   : > { %v3003_v4 = vpop.f32.mrf.mxu0 }
 0xe3c   : > { %v3012_v48 = vadd.f32 %v3002_v25, %v2593_v13  ;;  %v3004_v21 = vadd.f32 %v3003_v4, %v2922_v24 }
 0xe3d   : > { %v3007_v5 = vpop.f32.mrf.mxu0 }
 0xe3e   : > { %3016 = vst [vmem:[%s160_s21] sm:$0xff] %v3012_v48  ;;  %v3013_v54 = vadd.f32 %v3004_v21, %v2595_v63  ;;  %v3008_v29 = vadd.f32 %v3007_v5, %v2927_v2 }
 0xe3f   : > { %v3009_v3 = vpop.f32.mrf.mxu0 }
 0xe40   : > { %3017 = vst [vmem:[%s160_s21 + $0x8] sm:$0xff] %v3013_v54  ;;  %v3014_v33 = vadd.f32 %v3008_v29, %v2599_v28  ;;  %v3010_v49 = vadd.f32 %v3009_v3, %v2927_v2  ;;  %3026 = sbr.rel (!%p3561_p4) target bundleno = 3661 (0xe4d), region = 36 }
 0xe42   : > { %3018 = vst [vmem:[%s160_s21 + $0x10] sm:$0xff] %v3014_v33  ;;  %v3015_v43 = vadd.f32 %v3010_v49, %v2601_v32 }
 0xe44   : > { %3019 = vst [vmem:[%s160_s21 + $0x18] sm:$0xff] %v3015_v43 }
 0xe45   : > { %v3042_v56 = vld [vmem:[%s160_s21] sm:$0xff] }
 0xe46   : > { %3043 = vst [vmem:[%s3029_s24] sm:$0xff] %v3042_v56 }
 0xe47   : > { %v3044_v37 = vld [vmem:[%s160_s21 + $0x8] sm:$0xff] }
 0xe48   : > { %3045 = vst [vmem:[%s3029_s24 + $0x8] sm:$0xff] %v3044_v37 }
 0xe49   : > { %v3046_v36 = vld [vmem:[%s160_s21 + $0x10] sm:$0xff] }
 0xe4a   : > { %3047 = vst [vmem:[%s3029_s24 + $0x20] sm:$0xff] %v3046_v36 }
 0xe4b   : > { %v3048_v38 = vld [vmem:[%s160_s21 + $0x18] sm:$0xff] }
 0xe4c   : > { %3049 = vst [vmem:[%s3029_s24 + $0x28] sm:$0xff] %v3048_v38 }
 0xe4d PF: > { %p10_p8 = scmp.ge.s32.totalorder %s3551_s16, 4   ;;  %s5719_s12 = smov %s3484_s13 }
 0xe4e   : > { %s5720_s13 = smov %s3559_s19  ;;  %s5721_s14 = smov %s3551_s16 }
 0xe4f   :  { %12 = sbr.rel (!%p10_p8) target bundleno = 2 (0x2), region = 105 }

</bundles_post_ra>
